<compile_context>
chip_gen: v7x
topology: tpu7x:2x2x1
jax: 0.10.0
libtpu: 0.0.40
codegen_flags: <defaults>
</compile_context>

<pallas_src>
import functools
import math

import jax
import jax.numpy as jnp
from jax.experimental import pallas as pl
from jax.experimental.pallas import tpu as pltpu


# ---------------------------------------------------------------------------
# Hardware queries (cached; safe fallbacks)
# ---------------------------------------------------------------------------

@functools.lru_cache(maxsize=1)
def _vmem_limit_bytes():
    # 3/4 of physical VMEM: ~96 MiB on 128 MiB parts (v5e/v6e), ~48 MiB on v7x.
    cap = 64 * 1024 * 1024
    try:
        cap = int(pltpu.get_tpu_info().vmem_capacity_bytes)
    except Exception:
        pass
    return int((cap * 3) // 4)


@functools.lru_cache(maxsize=1)
def _has_megacore():
    # 2 TensorCores per chip (v7x). Used to pick split-vs-fused and tiling.
    try:
        kind = jax.devices()[0].device_kind.lower()
        return ("v7" in kind) or ("7x" in kind)
    except Exception:
        return False


# ---------------------------------------------------------------------------
# Shape / tiling policy (shared by prepare + forward so padding is consistent)
# ---------------------------------------------------------------------------

def _round_up(x, m):
    return ((x + m - 1) // m) * m


def _head_tiling(img_out, max_tile=1024):
    """Return (tn, n_pad, n_tiles) for the final Linear's output features."""
    n128 = _round_up(img_out, 128)
    if n128 <= max_tile:
        tn = n128
        # On 2-TensorCore parts prefer >=2 tiles so the "parallel" axis splits.
        if _has_megacore() and n128 >= 256 and n128 % 256 == 0:
            tn = n128 // 2
    else:
        tn = max_tile
    n_pad = _round_up(n128, tn)
    return tn, n_pad, n_pad // tn


# ---------------------------------------------------------------------------
# Kernel math helpers (all elementwise math in f32; matmul inputs bf16)
# ---------------------------------------------------------------------------

def _leaky_relu(x, slope=0.01):
    return jnp.where(x >= 0, x, slope * x)


def _dot_bf16(x_f32, w_ref, b_ref):
    # bf16 x bf16 on the MXU, f32 accumulation, f32 bias add.
    return (
        jnp.dot(x_f32.astype(jnp.bfloat16), w_ref[...],
                preferred_element_type=jnp.float32)
        + b_ref[...]
    )


def _batchnorm_train(x, gamma, beta, eps, inv_b):
    # Training-mode BatchNorm1d, two-pass (centered) biased variance, eps=0.8.
    mu = jnp.sum(x, axis=0, keepdims=True) * inv_b
    xc = x - mu
    var = jnp.sum(xc * xc, axis=0, keepdims=True) * inv_b
    return xc * jax.lax.rsqrt(var + eps) * gamma + beta


def _trunk_compute(z_ref,
                   w1_ref, b1_ref,
                   w2_ref, b2_ref, g2_ref, be2_ref,
                   w3_ref, b3_ref, g3_ref, be3_ref,
                   w4_ref, b4_ref, g4_ref, be4_ref):
    """Layers 1-4: Linear(+BN)+LeakyReLU chain producing h of shape (B, 1024)."""
    eps = jnp.float32(0.8)
    inv_b = jnp.float32(1.0 / z_ref.shape[0])

    x = z_ref[...].astype(jnp.float32)

    # block(latent, 128, normalize=False)
    h = _leaky_relu(_dot_bf16(x, w1_ref, b1_ref))
    # block(128, 256)
    h = _dot_bf16(h, w2_ref, b2_ref)
    h = _leaky_relu(_batchnorm_train(h, g2_ref[...], be2_ref[...], eps, inv_b))
    # block(256, 512)
    h = _dot_bf16(h, w3_ref, b3_ref)
    h = _leaky_relu(_batchnorm_train(h, g3_ref[...], be3_ref[...], eps, inv_b))
    # block(512, 1024)
    h = _dot_bf16(h, w4_ref, b4_ref)
    h = _leaky_relu(_batchnorm_train(h, g4_ref[...], be4_ref[...], eps, inv_b))
    return h  # f32 (B, 1024)


# ---------------------------------------------------------------------------
# Kernels
# ---------------------------------------------------------------------------

def _trunk_kernel(z_ref,
                  w1_ref, b1_ref,
                  w2_ref, b2_ref, g2_ref, be2_ref,
                  w3_ref, b3_ref, g3_ref, be3_ref,
                  w4_ref, b4_ref, g4_ref, be4_ref,
                  h_ref):
    """Split path (v7x): trunk only; h emitted in bf16."""
    h_ref[...] = _trunk_compute(
        z_ref, w1_ref, b1_ref, w2_ref, b2_ref, g2_ref, be2_ref,
        w3_ref, b3_ref, g3_ref, be3_ref, w4_ref, b4_ref, g4_ref, be4_ref,
    ).astype(jnp.bfloat16)


def _head_kernel(h_ref, w5_ref, b5_ref, out_ref):
    """Split path (v7x): Linear(1024, n_pad) + tanh, tiled over output features."""
    y = (
        jnp.dot(h_ref[...], w5_ref[...], preferred_element_type=jnp.float32)
        + b5_ref[...]
    )
    out_ref[...] = jnp.tanh(y)


def _fused_kernel(z_ref,
                  w1_ref, b1_ref,
                  w2_ref, b2_ref, g2_ref, be2_ref,
                  w3_ref, b3_ref, g3_ref, be3_ref,
                  w4_ref, b4_ref, g4_ref, be4_ref,
                  w5_ref, b5_ref,
                  out_ref,
                  h_scr):
    """Fused path (v5e/v6e): trunk at grid step 0 into a bf16 VMEM scratch,
    head tile every step. Single launch, no h HBM round-trip."""

    @pl.when(pl.program_id(0) == 0)
    def _():
        h_scr[...] = _trunk_compute(
            z_ref, w1_ref, b1_ref, w2_ref, b2_ref, g2_ref, be2_ref,
            w3_ref, b3_ref, g3_ref, be3_ref, w4_ref, b4_ref, g4_ref, be4_ref,
        ).astype(jnp.bfloat16)

    y = (
        jnp.dot(h_scr[...], w5_ref[...], preferred_element_type=jnp.float32)
        + b5_ref[...]
    )
    out_ref[...] = jnp.tanh(y)


# ---------------------------------------------------------------------------
# Parameters
# ---------------------------------------------------------------------------

def init_generator_params(key, latent_dim, img_out):
    """Param init mimicking PyTorch Linear default U[-1/sqrt(in), 1/sqrt(in)].

    Weights are stored as (in_features, out_features) in bf16 (streamed dtype);
    biases and BN affine params stay f32."""
    dims = [latent_dim, 128, 256, 512, 1024, img_out]
    params = {}
    keys = jax.random.split(key, 2 * (len(dims) - 1))
    for i in range(len(dims) - 1):
        fan_in, fan_out = dims[i], dims[i + 1]
        bound = 1.0 / (fan_in ** 0.5)
        w = jax.random.uniform(keys[2 * i], (fan_in, fan_out),
                               jnp.float32, -bound, bound)
        params[f"w{i+1}"] = w.astype(jnp.bfloat16)
        params[f"b{i+1}"] = jax.random.uniform(
            keys[2 * i + 1], (1, fan_out), jnp.float32, -bound, bound)
    # BatchNorm affine params (layers 2..4): gamma=1, beta=0 (fresh init)
    for i, width in zip((2, 3, 4), (256, 512, 1024)):
        params[f"g{i}"] = jnp.ones((1, width), jnp.float32)
        params[f"be{i}"] = jnp.zeros((1, width), jnp.float32)
    return params


def prepare_generator_params(params, img_out):
    """One-time lane padding of the final layer to the head tile width.

    Call this ONCE (outside the training/inference step) so the hot path does
    no per-call jnp.pad of w5/b5 (avoids re-streaming the largest weight)."""
    _, n_pad, _ = _head_tiling(img_out)
    p = dict(params)
    if params["w5"].shape[1] != n_pad:
        extra = n_pad - params["w5"].shape[1]
        p["w5"] = jnp.pad(params["w5"], ((0, 0), (0, extra)))
        p["b5"] = jnp.pad(params["b5"], ((0, 0), (0, extra)))
    return p


# ---------------------------------------------------------------------------
# Forward
# ---------------------------------------------------------------------------

@functools.partial(jax.jit, static_argnames=("img_shape",))
def generator_forward(z, params, img_shape):
    batch, latent = z.shape
    img_out = math.prod(img_shape)

    tn, n_pad, n_tiles = _head_tiling(img_out)
    vmem_limit = _vmem_limit_bytes()

    w5 = params["w5"]
    b5 = params["b5"]
    if w5.shape[1] != n_pad:
        # Fallback (off the fast path): caller did not run prepare_generator_params.
        w5 = jnp.pad(w5, ((0, 0), (0, n_pad - w5.shape[1])))
        b5 = jnp.pad(b5, ((0, 0), (0, n_pad - b5.shape[1])))

    trunk_args = (
        z,
        params["w1"], params["b1"],
        params["w2"], params["b2"], params["g2"], params["be2"],
        params["w3"], params["b3"], params["g3"], params["be3"],
        params["w4"], params["b4"], params["g4"], params["be4"],
    )

    trunk_flops = 2 * batch * (latent * 128 + 128 * 256 + 256 * 512 + 512 * 1024)
    head_flops = 2 * batch * 1024 * n_pad
    trunk_bytes = (sum(int(a.size) * a.dtype.itemsize for a in trunk_args)
                   + batch * 1024 * 2)                         # h (bf16)
    head_bytes = (batch * 1024 * 2                              # h (bf16)
                  + 1024 * n_pad * 2 + n_pad * 4                # w5 / b5
                  + batch * n_pad * 4)                          # out

    if _has_megacore() and n_tiles >= 1:
        # ---- v7x: two calls; head's N tiles split across the 2 TensorCores.
        vmem_spec = pl.BlockSpec(memory_space=pltpu.MemorySpace.VMEM)
        h = pl.pallas_call(
            _trunk_kernel,
            out_shape=jax.ShapeDtypeStruct((batch, 1024), jnp.bfloat16),
            in_specs=[vmem_spec] * len(trunk_args),
            out_specs=vmem_spec,
            compiler_params=pltpu.CompilerParams(vmem_limit_bytes=vmem_limit),
            cost_estimate=pl.CostEstimate(
                flops=trunk_flops,
                transcendentals=256 + 512 + 1024,   # rsqrt per BN feature
                bytes_accessed=trunk_bytes),
        )(*trunk_args)

        head = pl.pallas_call(
            _head_kernel,
            out_shape=jax.ShapeDtypeStruct((batch, n_pad), jnp.float32),
            grid_spec=pltpu.PrefetchScalarGridSpec(
                num_scalar_prefetch=0,
                grid=(n_tiles,),
                in_specs=[
                    pl.BlockSpec((batch, 1024), lambda j: (0, 0)),  # h resident
                    pl.BlockSpec((1024, tn), lambda j: (0, j)),     # w5 tile
                    pl.BlockSpec((1, tn), lambda j: (0, j)),        # b5 tile
                ],
                out_specs=pl.BlockSpec((batch, tn), lambda j: (0, j)),
            ),
            compiler_params=pltpu.CompilerParams(
                dimension_semantics=("parallel",),
                vmem_limit_bytes=vmem_limit),
            cost_estimate=pl.CostEstimate(
                flops=head_flops,
                transcendentals=batch * n_pad,      # tanh
                bytes_accessed=head_bytes),
        )(h, w5, b5)
    else:
        # ---- v5e/v6e (1 TC): single fused call; trunk runs at grid step 0.
        trunk_specs = [pl.BlockSpec(a.shape, lambda j: (0, 0)) for a in trunk_args]
        head = pl.pallas_call(
            _fused_kernel,
            out_shape=jax.ShapeDtypeStruct((batch, n_pad), jnp.float32),
            grid_spec=pltpu.PrefetchScalarGridSpec(
                num_scalar_prefetch=0,
                grid=(n_tiles,),
                in_specs=trunk_specs + [
                    pl.BlockSpec((1024, tn), lambda j: (0, j)),     # w5 tile
                    pl.BlockSpec((1, tn), lambda j: (0, j)),        # b5 tile
                ],
                out_specs=pl.BlockSpec((batch, tn), lambda j: (0, j)),
                scratch_shapes=[pltpu.VMEM((batch, 1024), jnp.bfloat16)],
            ),
            compiler_params=pltpu.CompilerParams(
                dimension_semantics=("arbitrary",),   # head steps reuse step-0 scratch
                vmem_limit_bytes=vmem_limit),
            cost_estimate=pl.CostEstimate(
                flops=trunk_flops + head_flops,
                transcendentals=256 + 512 + 1024 + batch * n_pad,
                bytes_accessed=trunk_bytes + head_bytes - 2 * batch * 1024 * 2),
        )(*trunk_args, w5, b5)

    # Plain-JAX glue: drop lane padding only if present, reshape to image.
    if n_pad != img_out:
        head = head[:, :img_out]
    return head.reshape((batch,) + tuple(img_shape))


# ---------------------------------------------------------------------------
# Pure-JAX reference (mirrors the kernel's bf16 matmul-input casting)
# ---------------------------------------------------------------------------

def _reference_forward(z, params, img_shape):
    eps = 0.8

    def leaky(x):
        return jnp.where(x >= 0, x, 0.01 * x)

    def bn(x, g, b):
        mu = jnp.mean(x, axis=0, keepdims=True)
        var = jnp.mean((x - mu) ** 2, axis=0, keepdims=True)
        return (x - mu) / jnp.sqrt(var + eps) * g + b

    def lin(x, w, b):
        # same bf16 rounding of activations / weights as the kernel,
        # accumulation in f32
        return (x.astype(jnp.bfloat16).astype(jnp.float32)
                @ w.astype(jnp.float32)) + b

    h = leaky(lin(z, params["w1"], params["b1"]))
    h = leaky(bn(lin(h, params["w2"], params["b2"]), params["g2"], params["be2"]))
    h = leaky(bn(lin(h, params["w3"], params["b3"]), params["g3"], params["be3"]))
    h = leaky(bn(lin(h, params["w4"], params["b4"]), params["g4"], params["be4"]))
    h = jnp.tanh(lin(h, params["w5"], params["b5"]))
    return h.reshape((z.shape[0],) + tuple(img_shape))


if __name__ == "__main__":
    latent_dim = 32
    img_shape = (1, 16, 16)          # prod = 256 output features
    batch = 8

    key = jax.random.PRNGKey(0)
    k_params, k_z = jax.random.split(key)
    raw_params = init_generator_params(k_params, latent_dim, 16 * 16)
    params = prepare_generator_params(raw_params, 16 * 16)   # one-time padding
    z = jax.random.normal(k_z, (batch, latent_dim), jnp.float32)

    img = generator_forward(z, params, img_shape)
    jax.block_until_ready(img)

    ref = _reference_forward(z, raw_params, img_shape)
    assert img.shape == (batch,) + img_shape, img.shape
    assert jnp.allclose(img, ref, atol=2e-3, rtol=2e-3), float(
        jnp.max(jnp.abs(img - ref)))

    print("KERNEL_OK")
</pallas_src>

<mosaic_0001>
module attributes {stable_mosaic.version = 11 : i64} {
  func.func @_fused_kernel(%arg0: i32, %arg1: memref<8x32xf32, #tpu.memory_space<vmem>>, %arg2: memref<32x128xbf16, #tpu.memory_space<vmem>>, %arg3: memref<1x128xf32, #tpu.memory_space<vmem>>, %arg4: memref<128x256xbf16, #tpu.memory_space<vmem>>, %arg5: memref<1x256xf32, #tpu.memory_space<vmem>>, %arg6: memref<1x256xf32, #tpu.memory_space<vmem>>, %arg7: memref<1x256xf32, #tpu.memory_space<vmem>>, %arg8: memref<256x512xbf16, #tpu.memory_space<vmem>>, %arg9: memref<1x512xf32, #tpu.memory_space<vmem>>, %arg10: memref<1x512xf32, #tpu.memory_space<vmem>>, %arg11: memref<1x512xf32, #tpu.memory_space<vmem>>, %arg12: memref<512x1024xbf16, #tpu.memory_space<vmem>>, %arg13: memref<1x1024xf32, #tpu.memory_space<vmem>>, %arg14: memref<1x1024xf32, #tpu.memory_space<vmem>>, %arg15: memref<1x1024xf32, #tpu.memory_space<vmem>>, %arg16: memref<1024x256xbf16, #tpu.memory_space<vmem>>, %arg17: memref<1x256xf32, #tpu.memory_space<vmem>>, %arg18: memref<8x256xf32, #tpu.memory_space<vmem>>, %arg19: memref<8x1024xbf16, #tpu.memory_space<vmem>>) attributes {dimension_semantics = [#tpu.dimension_semantics<arbitrary>], iteration_bounds = array<i64: 1>, scalar_prefetch = 0 : i64, scratch_operands = 1 : i64, tpu.core_type = #tpu.core_type<tc>, window_params = [{pipeline_mode = #tpu.pipeline_mode<synchronous>, transform_indices = @transform_0, window_bounds = array<i64: 8, 32>}, {pipeline_mode = #tpu.pipeline_mode<synchronous>, transform_indices = @transform_1, window_bounds = array<i64: 32, 128>}, {pipeline_mode = #tpu.pipeline_mode<synchronous>, transform_indices = @transform_2, window_bounds = array<i64: 1, 128>}, {pipeline_mode = #tpu.pipeline_mode<synchronous>, transform_indices = @transform_3, window_bounds = array<i64: 128, 256>}, {pipeline_mode = #tpu.pipeline_mode<synchronous>, transform_indices = @transform_4, window_bounds = array<i64: 1, 256>}, {pipeline_mode = #tpu.pipeline_mode<synchronous>, transform_indices = @transform_5, window_bounds = array<i64: 1, 256>}, {pipeline_mode = #tpu.pipeline_mode<synchronous>, transform_indices = @transform_6, window_bounds = array<i64: 1, 256>}, {pipeline_mode = #tpu.pipeline_mode<synchronous>, transform_indices = @transform_7, window_bounds = array<i64: 256, 512>}, {pipeline_mode = #tpu.pipeline_mode<synchronous>, transform_indices = @transform_8, window_bounds = array<i64: 1, 512>}, {pipeline_mode = #tpu.pipeline_mode<synchronous>, transform_indices = @transform_9, window_bounds = array<i64: 1, 512>}, {pipeline_mode = #tpu.pipeline_mode<synchronous>, transform_indices = @transform_10, window_bounds = array<i64: 1, 512>}, {pipeline_mode = #tpu.pipeline_mode<synchronous>, transform_indices = @transform_11, window_bounds = array<i64: 512, 1024>}, {pipeline_mode = #tpu.pipeline_mode<synchronous>, transform_indices = @transform_12, window_bounds = array<i64: 1, 1024>}, {pipeline_mode = #tpu.pipeline_mode<synchronous>, transform_indices = @transform_13, window_bounds = array<i64: 1, 1024>}, {pipeline_mode = #tpu.pipeline_mode<synchronous>, transform_indices = @transform_14, window_bounds = array<i64: 1, 1024>}, {transform_indices = @transform_15, window_bounds = array<i64: 1024, 256>}, {transform_indices = @transform_16, window_bounds = array<i64: 1, 256>}, {transform_indices = @transform_17, window_bounds = array<i64: 8, 256>}]} {
    %c0_i32 = arith.constant 0 : i32
    %0 = arith.cmpi eq, %arg0, %c0_i32 : i32
    %1 = arith.extui %0 : i1 to i32
    %c0_i32_0 = arith.constant 0 : i32
    %2 = arith.cmpi ne, %1, %c0_i32_0 : i32
    scf.if %2 {
      %c0_8 = arith.constant 0 : index
      %c0_9 = arith.constant 0 : index
      %11 = vector.load %arg1[%c0_8, %c0_9] : memref<8x32xf32, #tpu.memory_space<vmem>>, vector<8x32xf32>
      %12 = arith.truncf %11 : vector<8x32xf32> to vector<8x32xbf16>
      %c0_10 = arith.constant 0 : index
      %c0_11 = arith.constant 0 : index
      %13 = vector.load %arg2[%c0_10, %c0_11] : memref<32x128xbf16, #tpu.memory_space<vmem>>, vector<32x128xbf16>
      %cst_12 = arith.constant dense<0.000000e+00> : vector<8x128xf32>
      %14 = tpu.matmul %12, %13, %cst_12 {dimension_numbers = #tpu.dot_dimension_numbers<[1], [0], [0], [1], [0, 0, 1, 1], [], []>} : vector<8x32xbf16>, vector<32x128xbf16>, vector<8x128xf32> -> vector<8x128xf32>
      %c0_13 = arith.constant 0 : index
      %c0_14 = arith.constant 0 : index
      %15 = vector.load %arg3[%c0_13, %c0_14] : memref<1x128xf32, #tpu.memory_space<vmem>>, vector<1x128xf32>
      %16 = vector.broadcast %15 : vector<1x128xf32> to vector<8x128xf32>
      %17 = arith.addf %14, %16 : vector<8x128xf32>
      %cst_15 = arith.constant 0.000000e+00 : f32
      %18 = vector.broadcast %cst_15 : f32 to vector<8x128xf32>
      %19 = arith.cmpf oge, %17, %18 : vector<8x128xf32>
      %cst_16 = arith.constant 0.00999999977 : f32
      %20 = vector.broadcast %cst_16 : f32 to vector<8x128xf32>
      %21 = arith.mulf %20, %17 : vector<8x128xf32>
      %22 = arith.select %19, %17, %21 : vector<8x128xi1>, vector<8x128xf32>
      %23 = arith.truncf %22 : vector<8x128xf32> to vector<8x128xbf16>
      %c0_17 = arith.constant 0 : index
      %c0_18 = arith.constant 0 : index
      %24 = vector.load %arg4[%c0_17, %c0_18] : memref<128x256xbf16, #tpu.memory_space<vmem>>, vector<128x256xbf16>
      %cst_19 = arith.constant dense<0.000000e+00> : vector<8x256xf32>
      %25 = tpu.matmul %23, %24, %cst_19 {dimension_numbers = #tpu.dot_dimension_numbers<[1], [0], [0], [1], [0, 0, 1, 1], [], []>} : vector<8x128xbf16>, vector<128x256xbf16>, vector<8x256xf32> -> vector<8x256xf32>
      %c0_20 = arith.constant 0 : index
      %c0_21 = arith.constant 0 : index
      %26 = vector.load %arg5[%c0_20, %c0_21] : memref<1x256xf32, #tpu.memory_space<vmem>>, vector<1x256xf32>
      %27 = vector.broadcast %26 : vector<1x256xf32> to vector<8x256xf32>
      %28 = arith.addf %25, %27 : vector<8x256xf32>
      %c0_22 = arith.constant 0 : index
      %c0_23 = arith.constant 0 : index
      %29 = vector.load %arg6[%c0_22, %c0_23] : memref<1x256xf32, #tpu.memory_space<vmem>>, vector<1x256xf32>
      %c0_24 = arith.constant 0 : index
      %c0_25 = arith.constant 0 : index
      %30 = vector.load %arg7[%c0_24, %c0_25] : memref<1x256xf32, #tpu.memory_space<vmem>>, vector<1x256xf32>
      %cst_26 = arith.constant dense<0.000000e+00> : vector<256xf32>
      %31 = vector.multi_reduction <add>, %28, %cst_26 [0] : vector<8x256xf32> to vector<256xf32>
      %32 = vector.shape_cast %31 : vector<256xf32> to vector<1x256xf32>
      %cst_27 = arith.constant 1.250000e-01 : f32
      %33 = vector.broadcast %cst_27 : f32 to vector<1x256xf32>
      %34 = arith.mulf %32, %33 : vector<1x256xf32>
      %35 = vector.broadcast %34 : vector<1x256xf32> to vector<8x256xf32>
      %36 = arith.subf %28, %35 : vector<8x256xf32>
      %37 = arith.mulf %36, %36 : vector<8x256xf32>
      %cst_28 = arith.constant dense<0.000000e+00> : vector<256xf32>
      %38 = vector.multi_reduction <add>, %37, %cst_28 [0] : vector<8x256xf32> to vector<256xf32>
      %39 = vector.shape_cast %38 : vector<256xf32> to vector<1x256xf32>
      %cst_29 = arith.constant 1.250000e-01 : f32
      %40 = vector.broadcast %cst_29 : f32 to vector<1x256xf32>
      %41 = arith.mulf %39, %40 : vector<1x256xf32>
      %cst_30 = arith.constant 8.000000e-01 : f32
      %42 = vector.broadcast %cst_30 : f32 to vector<1x256xf32>
      %43 = arith.addf %41, %42 : vector<1x256xf32>
      %44 = math.rsqrt %43 : vector<1x256xf32>
      %45 = vector.broadcast %44 : vector<1x256xf32> to vector<8x256xf32>
      %46 = arith.mulf %36, %45 : vector<8x256xf32>
      %47 = vector.broadcast %29 : vector<1x256xf32> to vector<8x256xf32>
      %48 = arith.mulf %46, %47 : vector<8x256xf32>
      %49 = vector.broadcast %30 : vector<1x256xf32> to vector<8x256xf32>
      %50 = arith.addf %48, %49 : vector<8x256xf32>
      %cst_31 = arith.constant 0.000000e+00 : f32
      %51 = vector.broadcast %cst_31 : f32 to vector<8x256xf32>
      %52 = arith.cmpf oge, %50, %51 : vector<8x256xf32>
      %cst_32 = arith.constant 0.00999999977 : f32
      %53 = vector.broadcast %cst_32 : f32 to vector<8x256xf32>
      %54 = arith.mulf %53, %50 : vector<8x256xf32>
      %55 = arith.select %52, %50, %54 : vector<8x256xi1>, vector<8x256xf32>
      %56 = arith.truncf %55 : vector<8x256xf32> to vector<8x256xbf16>
      %c0_33 = arith.constant 0 : index
      %c0_34 = arith.constant 0 : index
      %57 = vector.load %arg8[%c0_33, %c0_34] : memref<256x512xbf16, #tpu.memory_space<vmem>>, vector<256x512xbf16>
      %cst_35 = arith.constant dense<0.000000e+00> : vector<8x512xf32>
      %58 = tpu.matmul %56, %57, %cst_35 {dimension_numbers = #tpu.dot_dimension_numbers<[1], [0], [0], [1], [0, 0, 1, 1], [], []>} : vector<8x256xbf16>, vector<256x512xbf16>, vector<8x512xf32> -> vector<8x512xf32>
      %c0_36 = arith.constant 0 : index
      %c0_37 = arith.constant 0 : index
      %59 = vector.load %arg9[%c0_36, %c0_37] : memref<1x512xf32, #tpu.memory_space<vmem>>, vector<1x512xf32>
      %60 = vector.broadcast %59 : vector<1x512xf32> to vector<8x512xf32>
      %61 = arith.addf %58, %60 : vector<8x512xf32>
      %c0_38 = arith.constant 0 : index
      %c0_39 = arith.constant 0 : index
      %62 = vector.load %arg10[%c0_38, %c0_39] : memref<1x512xf32, #tpu.memory_space<vmem>>, vector<1x512xf32>
      %c0_40 = arith.constant 0 : index
      %c0_41 = arith.constant 0 : index
      %63 = vector.load %arg11[%c0_40, %c0_41] : memref<1x512xf32, #tpu.memory_space<vmem>>, vector<1x512xf32>
      %cst_42 = arith.constant dense<0.000000e+00> : vector<512xf32>
      %64 = vector.multi_reduction <add>, %61, %cst_42 [0] : vector<8x512xf32> to vector<512xf32>
      %65 = vector.shape_cast %64 : vector<512xf32> to vector<1x512xf32>
      %cst_43 = arith.constant 1.250000e-01 : f32
      %66 = vector.broadcast %cst_43 : f32 to vector<1x512xf32>
      %67 = arith.mulf %65, %66 : vector<1x512xf32>
      %68 = vector.broadcast %67 : vector<1x512xf32> to vector<8x512xf32>
      %69 = arith.subf %61, %68 : vector<8x512xf32>
      %70 = arith.mulf %69, %69 : vector<8x512xf32>
      %cst_44 = arith.constant dense<0.000000e+00> : vector<512xf32>
      %71 = vector.multi_reduction <add>, %70, %cst_44 [0] : vector<8x512xf32> to vector<512xf32>
      %72 = vector.shape_cast %71 : vector<512xf32> to vector<1x512xf32>
      %cst_45 = arith.constant 1.250000e-01 : f32
      %73 = vector.broadcast %cst_45 : f32 to vector<1x512xf32>
      %74 = arith.mulf %72, %73 : vector<1x512xf32>
      %cst_46 = arith.constant 8.000000e-01 : f32
      %75 = vector.broadcast %cst_46 : f32 to vector<1x512xf32>
      %76 = arith.addf %74, %75 : vector<1x512xf32>
      %77 = math.rsqrt %76 : vector<1x512xf32>
      %78 = vector.broadcast %77 : vector<1x512xf32> to vector<8x512xf32>
      %79 = arith.mulf %69, %78 : vector<8x512xf32>
      %80 = vector.broadcast %62 : vector<1x512xf32> to vector<8x512xf32>
      %81 = arith.mulf %79, %80 : vector<8x512xf32>
      %82 = vector.broadcast %63 : vector<1x512xf32> to vector<8x512xf32>
      %83 = arith.addf %81, %82 : vector<8x512xf32>
      %cst_47 = arith.constant 0.000000e+00 : f32
      %84 = vector.broadcast %cst_47 : f32 to vector<8x512xf32>
      %85 = arith.cmpf oge, %83, %84 : vector<8x512xf32>
      %cst_48 = arith.constant 0.00999999977 : f32
      %86 = vector.broadcast %cst_48 : f32 to vector<8x512xf32>
      %87 = arith.mulf %86, %83 : vector<8x512xf32>
      %88 = arith.select %85, %83, %87 : vector<8x512xi1>, vector<8x512xf32>
      %89 = arith.truncf %88 : vector<8x512xf32> to vector<8x512xbf16>
      %c0_49 = arith.constant 0 : index
      %c0_50 = arith.constant 0 : index
      %90 = vector.load %arg12[%c0_49, %c0_50] : memref<512x1024xbf16, #tpu.memory_space<vmem>>, vector<512x1024xbf16>
      %cst_51 = arith.constant dense<0.000000e+00> : vector<8x1024xf32>
      %91 = tpu.matmul %89, %90, %cst_51 {dimension_numbers = #tpu.dot_dimension_numbers<[1], [0], [0], [1], [0, 0, 1, 1], [], []>} : vector<8x512xbf16>, vector<512x1024xbf16>, vector<8x1024xf32> -> vector<8x1024xf32>
      %c0_52 = arith.constant 0 : index
      %c0_53 = arith.constant 0 : index
      %92 = vector.load %arg13[%c0_52, %c0_53] : memref<1x1024xf32, #tpu.memory_space<vmem>>, vector<1x1024xf32>
      %93 = vector.broadcast %92 : vector<1x1024xf32> to vector<8x1024xf32>
      %94 = arith.addf %91, %93 : vector<8x1024xf32>
      %c0_54 = arith.constant 0 : index
      %c0_55 = arith.constant 0 : index
      %95 = vector.load %arg14[%c0_54, %c0_55] : memref<1x1024xf32, #tpu.memory_space<vmem>>, vector<1x1024xf32>
      %c0_56 = arith.constant 0 : index
      %c0_57 = arith.constant 0 : index
      %96 = vector.load %arg15[%c0_56, %c0_57] : memref<1x1024xf32, #tpu.memory_space<vmem>>, vector<1x1024xf32>
      %cst_58 = arith.constant dense<0.000000e+00> : vector<1024xf32>
      %97 = vector.multi_reduction <add>, %94, %cst_58 [0] : vector<8x1024xf32> to vector<1024xf32>
      %98 = vector.shape_cast %97 : vector<1024xf32> to vector<1x1024xf32>
      %cst_59 = arith.constant 1.250000e-01 : f32
      %99 = vector.broadcast %cst_59 : f32 to vector<1x1024xf32>
      %100 = arith.mulf %98, %99 : vector<1x1024xf32>
      %101 = vector.broadcast %100 : vector<1x1024xf32> to vector<8x1024xf32>
      %102 = arith.subf %94, %101 : vector<8x1024xf32>
      %103 = arith.mulf %102, %102 : vector<8x1024xf32>
      %cst_60 = arith.constant dense<0.000000e+00> : vector<1024xf32>
      %104 = vector.multi_reduction <add>, %103, %cst_60 [0] : vector<8x1024xf32> to vector<1024xf32>
      %105 = vector.shape_cast %104 : vector<1024xf32> to vector<1x1024xf32>
      %cst_61 = arith.constant 1.250000e-01 : f32
      %106 = vector.broadcast %cst_61 : f32 to vector<1x1024xf32>
      %107 = arith.mulf %105, %106 : vector<1x1024xf32>
      %cst_62 = arith.constant 8.000000e-01 : f32
      %108 = vector.broadcast %cst_62 : f32 to vector<1x1024xf32>
      %109 = arith.addf %107, %108 : vector<1x1024xf32>
      %110 = math.rsqrt %109 : vector<1x1024xf32>
      %111 = vector.broadcast %110 : vector<1x1024xf32> to vector<8x1024xf32>
      %112 = arith.mulf %102, %111 : vector<8x1024xf32>
      %113 = vector.broadcast %95 : vector<1x1024xf32> to vector<8x1024xf32>
      %114 = arith.mulf %112, %113 : vector<8x1024xf32>
      %115 = vector.broadcast %96 : vector<1x1024xf32> to vector<8x1024xf32>
      %116 = arith.addf %114, %115 : vector<8x1024xf32>
      %cst_63 = arith.constant 0.000000e+00 : f32
      %117 = vector.broadcast %cst_63 : f32 to vector<8x1024xf32>
      %118 = arith.cmpf oge, %116, %117 : vector<8x1024xf32>
      %cst_64 = arith.constant 0.00999999977 : f32
      %119 = vector.broadcast %cst_64 : f32 to vector<8x1024xf32>
      %120 = arith.mulf %119, %116 : vector<8x1024xf32>
      %121 = arith.select %118, %116, %120 : vector<8x1024xi1>, vector<8x1024xf32>
      %122 = arith.truncf %121 : vector<8x1024xf32> to vector<8x1024xbf16>
      %c0_65 = arith.constant 0 : index
      %c0_66 = arith.constant 0 : index
      %123 = vector.load %arg19[%c0_65, %c0_66] : memref<8x1024xbf16, #tpu.memory_space<vmem>>, vector<8x1024xbf16>
      tpu.vector_store %arg19[%c0_65, %c0_66], %122 {strides = array<i32>} : memref<8x1024xbf16, #tpu.memory_space<vmem>>, vector<8x1024xbf16>,
    } else {
    }
    %c0 = arith.constant 0 : index
    %c0_1 = arith.constant 0 : index
    %3 = vector.load %arg19[%c0, %c0_1] : memref<8x1024xbf16, #tpu.memory_space<vmem>>, vector<8x1024xbf16>
    %c0_2 = arith.constant 0 : index
    %c0_3 = arith.constant 0 : index
    %4 = vector.load %arg16[%c0_2, %c0_3] : memref<1024x256xbf16, #tpu.memory_space<vmem>>, vector<1024x256xbf16>
    %cst = arith.constant dense<0.000000e+00> : vector<8x256xf32>
    %5 = tpu.matmul %3, %4, %cst {dimension_numbers = #tpu.dot_dimension_numbers<[1], [0], [0], [1], [0, 0, 1, 1], [], []>} : vector<8x1024xbf16>, vector<1024x256xbf16>, vector<8x256xf32> -> vector<8x256xf32>
    %c0_4 = arith.constant 0 : index
    %c0_5 = arith.constant 0 : index
    %6 = vector.load %arg17[%c0_4, %c0_5] : memref<1x256xf32, #tpu.memory_space<vmem>>, vector<1x256xf32>
    %7 = vector.broadcast %6 : vector<1x256xf32> to vector<8x256xf32>
    %8 = arith.addf %5, %7 : vector<8x256xf32>
    %9 = math.tanh %8 : vector<8x256xf32>
    %c0_6 = arith.constant 0 : index
    %c0_7 = arith.constant 0 : index
    %10 = vector.load %arg18[%c0_6, %c0_7] : memref<8x256xf32, #tpu.memory_space<vmem>>, vector<8x256xf32>
    tpu.vector_store %arg18[%c0_6, %c0_7], %9 {strides = array<i32>} : memref<8x256xf32, #tpu.memory_space<vmem>>, vector<8x256xf32>,
    return
  }
  func.func @transform_0(%arg0: i32) -> (i32, i32) {
    %c0_i32 = arith.constant 0 : i32
    %c0_i32_0 = arith.constant 0 : i32
    %c0_i32_1 = arith.constant 0 : i32
    return %c0_i32, %c0_i32_0 : i32, i32
  }
  func.func @transform_1(%arg0: i32) -> (i32, i32) {
    %c0_i32 = arith.constant 0 : i32
    %c0_i32_0 = arith.constant 0 : i32
    %c0_i32_1 = arith.constant 0 : i32
    return %c0_i32, %c0_i32_0 : i32, i32
  }
  func.func @transform_2(%arg0: i32) -> (i32, i32) {
    %c0_i32 = arith.constant 0 : i32
    %c0_i32_0 = arith.constant 0 : i32
    %c0_i32_1 = arith.constant 0 : i32
    return %c0_i32, %c0_i32_0 : i32, i32
  }
  func.func @transform_3(%arg0: i32) -> (i32, i32) {
    %c0_i32 = arith.constant 0 : i32
    %c0_i32_0 = arith.constant 0 : i32
    %c0_i32_1 = arith.constant 0 : i32
    return %c0_i32, %c0_i32_0 : i32, i32
  }
  func.func @transform_4(%arg0: i32) -> (i32, i32) {
    %c0_i32 = arith.constant 0 : i32
    %c0_i32_0 = arith.constant 0 : i32
    %c0_i32_1 = arith.constant 0 : i32
    return %c0_i32, %c0_i32_0 : i32, i32
  }
  func.func @transform_5(%arg0: i32) -> (i32, i32) {
    %c0_i32 = arith.constant 0 : i32
    %c0_i32_0 = arith.constant 0 : i32
    %c0_i32_1 = arith.constant 0 : i32
    return %c0_i32, %c0_i32_0 : i32, i32
  }
  func.func @transform_6(%arg0: i32) -> (i32, i32) {
    %c0_i32 = arith.constant 0 : i32
    %c0_i32_0 = arith.constant 0 : i32
    %c0_i32_1 = arith.constant 0 : i32
    return %c0_i32, %c0_i32_0 : i32, i32
  }
  func.func @transform_7(%arg0: i32) -> (i32, i32) {
    %c0_i32 = arith.constant 0 : i32
    %c0_i32_0 = arith.constant 0 : i32
    %c0_i32_1 = arith.constant 0 : i32
    return %c0_i32, %c0_i32_0 : i32, i32
  }
  func.func @transform_8(%arg0: i32) -> (i32, i32) {
    %c0_i32 = arith.constant 0 : i32
    %c0_i32_0 = arith.constant 0 : i32
    %c0_i32_1 = arith.constant 0 : i32
    return %c0_i32, %c0_i32_0 : i32, i32
  }
  func.func @transform_9(%arg0: i32) -> (i32, i32) {
    %c0_i32 = arith.constant 0 : i32
    %c0_i32_0 = arith.constant 0 : i32
    %c0_i32_1 = arith.constant 0 : i32
    return %c0_i32, %c0_i32_0 : i32, i32
  }
  func.func @transform_10(%arg0: i32) -> (i32, i32) {
    %c0_i32 = arith.constant 0 : i32
    %c0_i32_0 = arith.constant 0 : i32
    %c0_i32_1 = arith.constant 0 : i32
    return %c0_i32, %c0_i32_0 : i32, i32
  }
  func.func @transform_11(%arg0: i32) -> (i32, i32) {
    %c0_i32 = arith.constant 0 : i32
    %c0_i32_0 = arith.constant 0 : i32
    %c0_i32_1 = arith.constant 0 : i32
    return %c0_i32, %c0_i32_0 : i32, i32
  }
  func.func @transform_12(%arg0: i32) -> (i32, i32) {
    %c0_i32 = arith.constant 0 : i32
    %c0_i32_0 = arith.constant 0 : i32
    %c0_i32_1 = arith.constant 0 : i32
    return %c0_i32, %c0_i32_0 : i32, i32
  }
  func.func @transform_13(%arg0: i32) -> (i32, i32) {
    %c0_i32 = arith.constant 0 : i32
    %c0_i32_0 = arith.constant 0 : i32
    %c0_i32_1 = arith.constant 0 : i32
    return %c0_i32, %c0_i32_0 : i32, i32
  }
  func.func @transform_14(%arg0: i32) -> (i32, i32) {
    %c0_i32 = arith.constant 0 : i32
    %c0_i32_0 = arith.constant 0 : i32
    %c0_i32_1 = arith.constant 0 : i32
    return %c0_i32, %c0_i32_0 : i32, i32
  }
  func.func @transform_15(%arg0: i32) -> (i32, i32) {
    %c0_i32 = arith.constant 0 : i32
    %c0_i32_0 = arith.constant 0 : i32
    return %c0_i32, %arg0 : i32, i32
  }
  func.func @transform_16(%arg0: i32) -> (i32, i32) {
    %c0_i32 = arith.constant 0 : i32
    %c0_i32_0 = arith.constant 0 : i32
    return %c0_i32, %arg0 : i32, i32
  }
  func.func @transform_17(%arg0: i32) -> (i32, i32) {
    %c0_i32 = arith.constant 0 : i32
    %c0_i32_0 = arith.constant 0 : i32
    return %c0_i32, %arg0 : i32, i32
  }
}

</mosaic_0001>

<bundles_post_ra>
// kernel: generator_forward.1
= control target key start
LH: loop header
LB: loop body
LE: loop exit
PB: predicated region body
PF: predicated region fallthrough
CT: control target
= control target key end

     0   :  { %s5998_s0 = inlined_call_operand.hbm [shape: f32[8,32], index: 0, kind: input, shape index: {}]   ;;  %s5999_s1 = inlined_call_operand.vmem [shape: bf16[32,128], index: 1, kind: input, shape index: {}]   ;;  %s6000_s2 = inlined_call_operand.vmem [shape: f32[1,128], index: 2, kind: input, shape index: {}]   ;;  %s6001_s3 = inlined_call_operand.hbm [shape: bf16[128,256], index: 3, kind: input, shape index: {}]   ;;  %s6002_s4 = inlined_call_operand.hbm [shape: f32[1,256], index: 4, kind: input, shape index: {}]   ;;  %s6003_s5 = inlined_call_operand.hbm [shape: f32[1,256], index: 5, kind: input, shape index: {}]   ;;  %s6004_s6 = inlined_call_operand.hbm [shape: f32[1,256], index: 6, kind: input, shape index: {}]   ;;  %s6005_s7 = inlined_call_operand.hbm [shape: bf16[256,512], index: 7, kind: input, shape index: {}]   ;;  %s6006_s8 = inlined_call_operand.hbm [shape: f32[1,512], index: 8, kind: input, shape index: {}]   ;;  %s6007_s9 = inlined_call_operand.vmem [shape: f32[1,512], index: 9, kind: input, shape index: {}]   ;;  %s6008_s10 = inlined_call_operand.hbm [shape: f32[1,512], index: 10, kind: input, shape index: {}]   ;;  %s6009_s11 = inlined_call_operand.hbm [shape: bf16[512,1024], index: 11, kind: input, shape index: {}]   ;;  %s6010_s12 = inlined_call_operand.vmem [shape: f32[1,1024], index: 12, kind: input, shape index: {}]   ;;  %s6011_s13 = inlined_call_operand.vmem [shape: f32[1,1024], index: 13, kind: input, shape index: {}]   ;;  %s6012_s14 = inlined_call_operand.hbm [shape: f32[1,1024], index: 14, kind: input, shape index: {}]   ;;  %s6013_s15 = inlined_call_operand.hbm [shape: bf16[1024,256], index: 15, kind: input, shape index: {}]   ;;  %s6014_s16 = inlined_call_operand.hbm [shape: f32[1,256], index: 16, kind: input, shape index: {}]   ;;  %s6015_s17 = inlined_call_operand.vmem [shape: f32[8,256], index: 17, kind: output, shape index: {}]  }
   0x1   :  { %6019 = sst [smem:[#allocation29_spill]] %s5998_s0 }
   0x2   :  { %6020 = sst [smem:[#allocation30_spill]] %s5999_s1 }
   0x3   :  { %6021 = sst [smem:[#allocation31_spill]] %s6015_s17 }
   0x4   :  { %22 = vsyncpa [#allocation4], 0 }
   0x5   :  { %23 = vsyncpa [#allocation6], 0 }
   0x6   :  { %24 = vsyncpa [#allocation9], 0 }
   0x7   :  { %25 = vsyncpa [#allocation12], 0 }
   0x8   :  { %26 = vsyncpa [#allocation15], 0 }
   0x9   :  { %27 = vsyncpa [#allocation18], 0 }
   0xa   :  { %28 = vsyncpa [#allocation21], 0  ;;  %s5529_s24 = smov [#allocation5]   ;;  %s5251_s28 = scalar_lea.hbm %s6001_s3, 2048 }
   0xb   :  { %s48_s25 = sshll.u32 %s5529_s24, 4  ;;  %p5252_p0 = scmp.ne.s32.totalorder %s6001_s3, %s5251_s28  ;;  %s49_s25 = int_to_ptr.vmem [resolvable:$true] %s48_s25 }
   0xc   :  { %p5255_p1 = scmp.lt.u32.totalorder %s5251_s28, %s6001_s3 }
   0xe   :  { %p5257_p2 = pnand %p5255_p1, %p5252_p0 }
  0x10   :  { %5260 = shalt.err (!%p5257_p2)
}
  0x11   :  { %s5261_s19 = scalar_lea.vmem %s49_s25, 2048  ;;  %p5266_p4 = scmp.lt.s32.totalorder %s49_s25, %s49_s25 }
  0x12   :  { %p5262_p3 = scmp.ne.s32.totalorder %s49_s25, %s5261_s19  ;;  %p5267_p5 = scmp.lt.s32.totalorder %s5261_s19, %s5261_s19 }
  0x14   :  { %p5268_p6 = por %p5267_p5, %p5266_p4 }
  0x16   :  { %p5269_p7 = pnand %p5268_p6, %p5262_p3 }
  0x18   :  { %5272 = shalt.err (!%p5269_p7)
}
  0x19   :  { %s5530_s1 = smov 128   ;;  %s5531_s20 = smov 8  }
  0x1a   :  { %54 = dma.hbm_to_vmem [thread:$0]  %s6001_s3, 2048, %s49_s25, [#allocation6], %s5530_s1, %s5530_s1, %s5531_s20  }
  0x1b   :  { %s5532_s23 = smov [#allocation8]   ;;  %s5533_s26 = smov [#allocation11]  }
  0x1c   :  { %s71_s24 = sshll.u32 %s5532_s23, 4  ;;  %s90_s27 = sshll.u32 %s5533_s26, 4  ;;  %s72_s24 = int_to_ptr.vmem [resolvable:$true] %s71_s24  ;;  %s91_s27 = int_to_ptr.vmem [resolvable:$true] %s90_s27 }
  0x1d   :  { %s5273_s0 = scalar_lea.hbm %s6003_s5, 32 }
  0x1e   :  { %p5274_p8 = scmp.ne.s32.totalorder %s6003_s5, %s5273_s0  ;;  %p5277_p9 = scmp.lt.u32.totalorder %s5273_s0, %s6003_s5 }
  0x20   :  { %p5279_p10 = pnand %p5277_p9, %p5274_p8 }
  0x22   :  { %5282 = shalt.err (!%p5279_p10)
}
  0x23   :  { %s5283_s3 = scalar_lea.vmem %s72_s24, 32  ;;  %p5288_p12 = scmp.lt.s32.totalorder %s72_s24, %s72_s24 }
  0x24   :  { %p5284_p11 = scmp.ne.s32.totalorder %s72_s24, %s5283_s3  ;;  %p5289_p13 = scmp.lt.s32.totalorder %s5283_s3, %s5283_s3 }
  0x26   :  { %p5290_p0 = por %p5289_p13, %p5288_p12 }
  0x28   :  { %p5291_p1 = pnand %p5290_p0, %p5284_p11 }
  0x2a   :  { %5294 = shalt.err (!%p5291_p1)
}
  0x2b   :  { %74 = dma.hbm_to_vmem [thread:$0]  %s6003_s5, 32, %s72_s24, [#allocation9]  }
  0x2c   :  { %s5295_s26 = scalar_lea.hbm %s6005_s7, 8192 }
  0x2d   :  { %p5296_p2 = scmp.ne.s32.totalorder %s6005_s7, %s5295_s26  ;;  %p5299_p3 = scmp.lt.u32.totalorder %s5295_s26, %s6005_s7 }
  0x2f   :  { %p5301_p4 = pnand %p5299_p3, %p5296_p2 }
  0x31   :  { %5304 = shalt.err (!%p5301_p4)
}
  0x32   :  { %s5305_s30 = scalar_lea.vmem %s91_s27, 8192  ;;  %p5310_p6 = scmp.lt.s32.totalorder %s91_s27, %s91_s27 }
  0x33   :  { %p5306_p5 = scmp.ne.s32.totalorder %s91_s27, %s5305_s30  ;;  %p5311_p7 = scmp.lt.s32.totalorder %s5305_s30, %s5305_s30 }
  0x35   :  { %p5312_p8 = por %p5311_p7, %p5310_p6 }
  0x37   :  { %p5313_p9 = pnand %p5312_p8, %p5306_p5 }
  0x39   :  { %5316 = shalt.err (!%p5313_p9)
}
  0x3a   :  { %s5534_s5 = smov 256   ;;  %s5535_s24 = smov 16  }
  0x3b   :  { %96 = dma.hbm_to_vmem [thread:$0]  %s6005_s7, 8192, %s91_s27, [#allocation12], %s5534_s5, %s5534_s5, %s5535_s24  }
  0x3c   :  { %s5536_s3 = smov [#allocation14]   ;;  %s5537_s21 = smov [#allocation17]  }
  0x3d   :  { %s115_s25 = sshll.u32 %s5536_s3, 4  ;;  %s141_s22 = sshll.u32 %s5537_s21, 4  ;;  %s116_s25 = int_to_ptr.vmem [resolvable:$true] %s115_s25  ;;  %s142_s22 = int_to_ptr.vmem [resolvable:$true] %s141_s22 }
  0x3e   :  { %s5317_s17 = scalar_lea.hbm %s6008_s10, 64 }
  0x3f   :  { %p5318_p10 = scmp.ne.s32.totalorder %s6008_s10, %s5317_s17  ;;  %p5321_p11 = scmp.lt.u32.totalorder %s5317_s17, %s6008_s10 }
  0x41   :  { %p5323_p12 = pnand %p5321_p11, %p5318_p10 }
  0x43   :  { %5326 = shalt.err (!%p5323_p12)
}
  0x44   :  { %s5327_s7 = scalar_lea.vmem %s116_s25, 64  ;;  %p5332_p0 = scmp.lt.s32.totalorder %s116_s25, %s116_s25 }
  0x45   :  { %p5328_p13 = scmp.ne.s32.totalorder %s116_s25, %s5327_s7  ;;  %p5333_p1 = scmp.lt.s32.totalorder %s5327_s7, %s5327_s7 }
  0x47   :  { %p5334_p2 = por %p5333_p1, %p5332_p0 }
  0x49   :  { %p5335_p3 = pnand %p5334_p2, %p5328_p13 }
  0x4b   :  { %5338 = shalt.err (!%p5335_p3)
}
  0x4c   :  { %118 = dma.hbm_to_vmem [thread:$0]  %s6008_s10, 64, %s116_s25, [#allocation15]  }
  0x4d   :  { %s5339_s19 = scalar_lea.hbm %s6012_s14, 128 }
  0x4e   :  { %p5340_p4 = scmp.ne.s32.totalorder %s6012_s14, %s5339_s19  ;;  %p5343_p5 = scmp.lt.u32.totalorder %s5339_s19, %s6012_s14 }
  0x50   :  { %p5345_p6 = pnand %p5343_p5, %p5340_p4 }
  0x52   :  { %5348 = shalt.err (!%p5345_p6)
}
  0x53   :  { %s5349_s17 = scalar_lea.vmem %s142_s22, 128  ;;  %p5354_p8 = scmp.lt.s32.totalorder %s142_s22, %s142_s22 }
  0x54   :  { %p5350_p7 = scmp.ne.s32.totalorder %s142_s22, %s5349_s17  ;;  %p5355_p9 = scmp.lt.s32.totalorder %s5349_s17, %s5349_s17 }
  0x56   :  { %p5356_p10 = por %p5355_p9, %p5354_p8 }
  0x58   :  { %p5357_p11 = pnand %p5356_p10, %p5350_p7 }
  0x5a   :  { %5360 = shalt.err (!%p5357_p11)
}
  0x5b   :  { %144 = dma.hbm_to_vmem [thread:$0]  %s6012_s14, 128, %s142_s22, [#allocation18]  }
  0x5c   :  { %s5538_s28 = smov [#allocation3]   ;;  %s5539_s0 = smov [#allocation7]  }
  0x5d   :  { %s35_s29 = sshll.u32 %s5538_s28, 4  ;;  %s61_s30 = sshll.u32 %s5539_s0, 4  ;;  %s36_s29 = int_to_ptr.vmem [resolvable:$true] %s35_s29  ;;  %s62_s30 = int_to_ptr.vmem [resolvable:$true] %s61_s30 }
  0x5e   :  { %s6022_s5 = sld [smem:[#allocation29_spill]] }
  0x64   :  { %s5361_s24 = scalar_lea.hbm %s6022_s5, 128 }
  0x65   :  { %p5362_p12 = scmp.ne.s32.totalorder %s6022_s5, %s5361_s24  ;;  %p5365_p13 = scmp.lt.u32.totalorder %s5361_s24, %s6022_s5 }
  0x67   :  { %p5367_p0 = pnand %p5365_p13, %p5362_p12 }
  0x69   :  { %5370 = shalt.err (!%p5367_p0)
}
  0x6a   :  { %s5371_s14 = scalar_lea.vmem %s36_s29, 128  ;;  %p5376_p2 = scmp.lt.s32.totalorder %s36_s29, %s36_s29 }
  0x6b   :  { %p5372_p1 = scmp.ne.s32.totalorder %s36_s29, %s5371_s14  ;;  %p5377_p3 = scmp.lt.s32.totalorder %s5371_s14, %s5371_s14 }
  0x6d   :  { %p5378_p4 = por %p5377_p3, %p5376_p2 }
  0x6f   :  { %p5379_p5 = pnand %p5378_p4, %p5372_p1 }
  0x71   :  { %5382 = shalt.err (!%p5379_p5)
}
  0x72   :  { %38 = dma.hbm_to_vmem [thread:$0]  %s6022_s5, 128, %s36_s29, [#allocation4]  }
  0x73   :  { %s5383_s10 = scalar_lea.hbm %s6002_s4, 32 }
  0x74   :  { %p5384_p6 = scmp.ne.s32.totalorder %s6002_s4, %s5383_s10  ;;  %p5387_p7 = scmp.lt.u32.totalorder %s5383_s10, %s6002_s4 }
  0x76   :  { %p5389_p8 = pnand %p5387_p7, %p5384_p6 }
  0x78   :  { %5392 = shalt.err (!%p5389_p8)
}
  0x79   :  { %s5393_s27 = scalar_lea.vmem %s62_s30, 32  ;;  %p5398_p10 = scmp.lt.s32.totalorder %s62_s30, %s62_s30 }
  0x7a   :  { %p5394_p9 = scmp.ne.s32.totalorder %s62_s30, %s5393_s27  ;;  %p5399_p11 = scmp.lt.s32.totalorder %s5393_s27, %s5393_s27 }
  0x7c   :  { %p5400_p12 = por %p5399_p11, %p5398_p10 }
  0x7e   :  { %p5401_p13 = pnand %p5400_p12, %p5394_p9 }
  0x80   :  { %5404 = shalt.err (!%p5401_p13)
}
  0x81   :  { %64 = dma.hbm_to_vmem [thread:$0]  %s6002_s4, 32, %s62_s30, [#allocation6]  }
  0x82   :  { %s5540_s24 = smov [#allocation10]   ;;  %s5541_s19 = smov [#allocation13]  }
  0x83   :  { %s81_s18 = sshll.u32 %s5540_s24, 4  ;;  %s103_s3 = sshll.u32 %s5541_s19, 4  ;;  %s82_s18 = int_to_ptr.vmem [resolvable:$true] %s81_s18  ;;  %s104_s3 = int_to_ptr.vmem [resolvable:$true] %s103_s3 }
  0x84   :  { %s5405_s22 = scalar_lea.hbm %s6004_s6, 32 }
  0x85   :  { %p5406_p0 = scmp.ne.s32.totalorder %s6004_s6, %s5405_s22  ;;  %p5409_p1 = scmp.lt.u32.totalorder %s5405_s22, %s6004_s6 }
  0x87   :  { %p5411_p2 = pnand %p5409_p1, %p5406_p0 }
  0x89   :  { %5414 = shalt.err (!%p5411_p2)
}
  0x8a   :  { %s5415_s4 = scalar_lea.vmem %s82_s18, 32  ;;  %p5420_p4 = scmp.lt.s32.totalorder %s82_s18, %s82_s18 }
  0x8b   :  { %p5416_p3 = scmp.ne.s32.totalorder %s82_s18, %s5415_s4  ;;  %p5421_p5 = scmp.lt.s32.totalorder %s5415_s4, %s5415_s4 }
  0x8d   :  { %p5422_p6 = por %p5421_p5, %p5420_p4 }
  0x8f   :  { %p5423_p7 = pnand %p5422_p6, %p5416_p3 }
  0x91   :  { %5426 = shalt.err (!%p5423_p7)
}
  0x92   :  { %84 = dma.hbm_to_vmem [thread:$0]  %s6004_s6, 32, %s82_s18, [#allocation9]  }
  0x93   :  { %s5427_s7 = scalar_lea.hbm %s6006_s8, 64 }
  0x94   :  { %p5428_p8 = scmp.ne.s32.totalorder %s6006_s8, %s5427_s7  ;;  %p5431_p9 = scmp.lt.u32.totalorder %s5427_s7, %s6006_s8 }
  0x96   :  { %p5433_p10 = pnand %p5431_p9, %p5428_p8 }
  0x98   :  { %5436 = shalt.err (!%p5433_p10)
}
  0x99   :  { %s5437_s19 = scalar_lea.vmem %s104_s3, 64  ;;  %p5442_p12 = scmp.lt.s32.totalorder %s104_s3, %s104_s3 }
  0x9a   :  { %p5438_p11 = scmp.ne.s32.totalorder %s104_s3, %s5437_s19  ;;  %p5443_p13 = scmp.lt.s32.totalorder %s5437_s19, %s5437_s19 }
  0x9c   :  { %p5444_p0 = por %p5443_p13, %p5442_p12 }
  0x9e   :  { %p5445_p1 = pnand %p5444_p0, %p5438_p11 }
  0xa0   :  { %5448 = shalt.err (!%p5445_p1)
}
  0xa1   :  { %106 = dma.hbm_to_vmem [thread:$0]  %s6006_s8, 64, %s104_s3, [#allocation12]  }
  0xa2   :  { %s5542_s21 = smov [#allocation16]   ;;  %s5449_s26 = scalar_lea.hbm %s6009_s11, 32768 }
  0xa3   :  { %s124_s14 = sshll.u32 %s5542_s21, 4  ;;  %p5450_p2 = scmp.ne.s32.totalorder %s6009_s11, %s5449_s26  ;;  %s125_s14 = int_to_ptr.vmem [resolvable:$true] %s124_s14 }
  0xa4   :  { %p5453_p3 = scmp.lt.u32.totalorder %s5449_s26, %s6009_s11 }
  0xa6   :  { %p5455_p4 = pnand %p5453_p3, %p5450_p2 }
  0xa8   :  { %5458 = shalt.err (!%p5455_p4)
}
  0xa9   :  { %s5459_s25 = scalar_lea.vmem %s125_s14, 32768  ;;  %p5464_p6 = scmp.lt.s32.totalorder %s125_s14, %s125_s14 }
  0xaa   :  { %p5460_p5 = scmp.ne.s32.totalorder %s125_s14, %s5459_s25  ;;  %p5465_p7 = scmp.lt.s32.totalorder %s5459_s25, %s5459_s25 }
  0xac   :  { %p5466_p8 = por %p5465_p7, %p5464_p6 }
  0xae   :  { %p5467_p9 = pnand %p5466_p8, %p5460_p5 }
  0xb0   :  { %5470 = shalt.err (!%p5467_p9)
}
  0xb1   :  { %s5543_s8 = smov 512   ;;  %s5544_s3 = smov 32  }
  0xb2   :  { %130 = dma.hbm_to_vmem [thread:$0]  %s6009_s11, 32768, %s125_s14, [#allocation15], %s5543_s8, %s5543_s8, %s5544_s3  }
  0xb3   :  { %s5545_s7 = smov [#allocation19]   ;;  %s5546_s29 = smov [#allocation20]  }
  0xb4   :  { %s150_s27 = sshll.u32 %s5545_s7, 4  ;;  %s163_s5 = sshll.u32 %s5546_s29, 4  ;;  %s151_s27 = int_to_ptr.vmem [resolvable:$true] %s150_s27  ;;  %s164_s5 = int_to_ptr.vmem [resolvable:$true] %s163_s5 }
  0xb5   :  { %s5471_s6 = scalar_lea.hbm %s6013_s15, 16384 }
  0xb6   :  { %p5472_p10 = scmp.ne.s32.totalorder %s6013_s15, %s5471_s6  ;;  %p5475_p11 = scmp.lt.u32.totalorder %s5471_s6, %s6013_s15 }
  0xb8   :  { %p5477_p12 = pnand %p5475_p11, %p5472_p10 }
  0xba   :  { %5480 = shalt.err (!%p5477_p12)
}
  0xbb   :  { %s5481_s11 = scalar_lea.vmem %s151_s27, 16384  ;;  %p5486_p0 = scmp.lt.s32.totalorder %s151_s27, %s151_s27 }
  0xbc   :  { %p5482_p13 = scmp.ne.s32.totalorder %s151_s27, %s5481_s11  ;;  %p5487_p1 = scmp.lt.s32.totalorder %s5481_s11, %s5481_s11 }
  0xbe   :  { %p5488_p2 = por %p5487_p1, %p5486_p0 }
  0xc0   :  { %p5489_p3 = pnand %p5488_p2, %p5482_p13 }
  0xc2   :  { %5492 = shalt.err (!%p5489_p3)
}
  0xc3   :  { %156 = dma.hbm_to_vmem [thread:$0]  %s6013_s15, 16384, %s151_s27, [#allocation18], %s5530_s1, %s5530_s1, %s5531_s20  }
  0xc4   :  { %s5493_s4 = scalar_lea.hbm %s6014_s16, 32 }
  0xc5   :  { %p5494_p4 = scmp.ne.s32.totalorder %s6014_s16, %s5493_s4  ;;  %p5497_p5 = scmp.lt.u32.totalorder %s5493_s4, %s6014_s16 }
  0xc7   :  { %p5499_p6 = pnand %p5497_p5, %p5494_p4 }
  0xc9   :  { %5502 = shalt.err (!%p5499_p6)
}
  0xca   :  { %s5503_s28 = scalar_lea.vmem %s164_s5, 32  ;;  %p5508_p8 = scmp.lt.s32.totalorder %s164_s5, %s164_s5 }
  0xcb   :  { %p5504_p7 = scmp.ne.s32.totalorder %s164_s5, %s5503_s28  ;;  %p5509_p9 = scmp.lt.s32.totalorder %s5503_s28, %s5503_s28 }
  0xcd   :  { %p5510_p10 = por %p5509_p9, %p5508_p8 }
  0xcf   :  { %p5511_p11 = pnand %p5510_p10, %p5504_p7 }
  0xd1   :  { %5514 = shalt.err (!%p5511_p11)
}
  0xd2   :  { %166 = dma.hbm_to_vmem [thread:$0]  %s6014_s16, 32, %s164_s5, [#allocation21]  }
  0xd3   :  { %5515 = dma.done.wait [#allocation4], 128  }
  0xd4   :  { %5516 = vsyncadd [#allocation4], 4294967168 }
  0xd5   :  { %5517 = dma.done.wait [#allocation6], 2080  }
  0xd6   :  { %5518 = vsyncadd [#allocation6], 4294965216 }
  0xd7   :  { %5519 = dma.done.wait [#allocation9], 64  }
  0xd8   :  { %5520 = vsyncadd [#allocation9], 4294967232 }
  0xd9   :  { %5521 = dma.done.wait [#allocation12], 8256  }
  0xda   :  { %5522 = vsyncadd [#allocation12], 4294959040 }
  0xdb   :  { %5523 = dma.done.wait [#allocation15], 32832  }
  0xdc   :  { %5524 = vsyncadd [#allocation15], 4294934464 }
  0xdd   :  { %5525 = dma.done.wait [#allocation18], 16512  }
  0xde   :  { %5526 = vsyncadd [#allocation18], 4294950784 }
  0xdf   :  { %5527 = dma.done.wait [#allocation21], 32  }
  0xe0   :  { %5528 = vsyncadd [#allocation21], 4294967264  ;;  %v5547_v0 = vmov 0.0   ;;  %vm5548_vm0 = vmmov 0   ;;  %s6023_s0 = sld [smem:[#allocation30_spill]]  ;;  %v208_v3 = vld [vmem:[#allocation3] sm:$0xff] }
  0xe1   :  { %4840 = vmatprep.subr.bf16.mxu0 %v5547_v0  ;;  %4844 = vmatprep.mubr.msk.bf16.mxu0 %vm5548_vm0, %v5547_v0  ;;  %v4907_v4 = vld [vmem:[#allocation5 + $0x4] ss:$8 sps:$4 sm:$0xff]   ;;  %v4909_v5 = vld [vmem:[#allocation5] ss:$8 sps:$4 sm:$0xff]   ;;  %v4910_v6 = vld [vmem:[#allocation5 + $0x14] ss:$8 sps:$4 sm:$0xff]   ;;  %v209_v7 = vpack.c.bf16 %v208_v3, %v208_v3 }
  0xe2   :  { %389 = vmatprep.subr.bf16.mxu1 %v4907_v4  ;;  %vm233_vm1 = vcmask 261120   ;;  %v4912_v8 = vld [vmem:[#allocation5 + $0x10] ss:$8 sps:$4 sm:$0xff]   ;;  %v4913_v9 = vld [vmem:[#allocation5 + $0x24] ss:$8 sps:$4 sm:$0xff]   ;;  %v5549_v21 = vmov 0  }
  0xe3   :  { %390 = vmatpush1.bf16.msra.mxu1 %v4909_v5  ;;  %v4915_v10 = vld [vmem:[#allocation5 + $0x20] ss:$8 sps:$4 sm:$0xff]   ;;  %v4916_v11 = vld [vmem:[#allocation5 + $0x34] ss:$8 sps:$4 sm:$0xff]   ;;  %v4918_v12 = vld [vmem:[#allocation5 + $0x30] ss:$8 sps:$4 sm:$0xff]   ;;  %421 = vmatprep.mubr.bf16.mxu1 %v5549_v21 }
  0xe4   :  { %391 = vmatprep.subr.bf16.mxu1 %v4910_v6  ;;  %v4919_v13 = vld [vmem:[#allocation5 + $0x44] ss:$8 sps:$4 sm:$0xff]   ;;  %v4921_v14 = vld [vmem:[#allocation5 + $0x40] ss:$8 sps:$4 sm:$0xff]   ;;  %v4922_v15 = vld [vmem:[#allocation5 + $0x54] ss:$8 sps:$4 sm:$0xff]  }
  0xe5   :  { %v4924_v16 = vld [vmem:[#allocation5 + $0x50] ss:$8 sps:$4 sm:$0xff]   ;;  %v4925_v17 = vld [vmem:[#allocation5 + $0x64] ss:$8 sps:$4 sm:$0xff]   ;;  %v4927_v18 = vld [vmem:[#allocation5 + $0x60] ss:$8 sps:$4 sm:$0xff]  }
  0xe6   :  { %v4905_v1 = vld [vmem:[%s6023_s0] sm:$0xff]   ;;  %v4906_v2 = vld [vmem:[%s6023_s0 + $0x8] sm:$0xff]   ;;  %s6024_s21 = sld [smem:[#allocation31_spill]] }
  0xe7   :  { %4841 = vmatpush3.bf16.msra.mxu0 %v4905_v1  ;;  %392 = vmatpush1.bf16.msra.mxu1 %v4912_v8  ;;  %v4928_v19 = vld [vmem:[#allocation5 + $0x74] ss:$8 sps:$4 sm:$0xff]   ;;  %v4930_v20 = vld [vmem:[#allocation5 + $0x70] ss:$8 sps:$4 sm:$0xff]   ;;  %v297_v3 = vld [vmem:[#allocation7] sm:$0x3] }
  0xe8   :  { %4842 = vmatprep.subr.bf16.mxu0 %v5547_v0  ;;  %393 = vmatprep.subr.bf16.mxu1 %v4913_v9  ;;  %v4933_v22 = vld [vmem:[#allocation11 + $0x4] ss:$16 sps:$4 sm:$0xff]   ;;  %v4345_v23 = vld [vmem:[%s6000_s2] ss:$0 sm:$0xff]  ;;  %v4981_v63 = vld [vmem:[#allocation11 + $0xc] ss:$16 sps:$4 sm:$0xff]   ;;  %v299_v0 = vlaneseq }
  0xe9   :  { %v4931_v31 = vld [vmem:[#allocation11] ss:$16 sps:$4 sm:$0xff]   ;;  %v4936_v33 = vld [vmem:[#allocation11 + $0x24] ss:$16 sps:$4 sm:$0xff]  }
  0xea   :  { %v4934_v34 = vld [vmem:[#allocation11 + $0x20] ss:$16 sps:$4 sm:$0xff]   ;;  %v4939_v35 = vld [vmem:[#allocation11 + $0x44] ss:$16 sps:$4 sm:$0xff]   ;;  %v5799_v1 = vshrl.u32 %v299_v0, 7 }
  0xeb   :  { %4843 = vmatpush3.bf16.msra.mxu0 %v4906_v2  ;;  %394 = vmatpush1.bf16.msra.mxu1 %v4915_v10  ;;  %v4937_v36 = vld [vmem:[#allocation11 + $0x40] ss:$16 sps:$4 sm:$0xff]   ;;  %v4942_v37 = vld [vmem:[#allocation11 + $0x64] ss:$16 sps:$4 sm:$0xff]  }
  0xec   :  { %395 = vmatprep.subr.bf16.mxu1 %v4916_v11  ;;  %v4940_v38 = vld [vmem:[#allocation11 + $0x60] ss:$16 sps:$4 sm:$0xff]   ;;  %v4945_v39 = vld [vmem:[#allocation11 + $0x84] ss:$16 sps:$4 sm:$0xff]   ;;  %v5802_v2 = vsub.s32 0, %v5799_v1  ;;  %v5805_v4 = vsub.s32 1, %v5799_v1 }
  0xed   :  { %v4943_v40 = vld [vmem:[#allocation11 + $0x80] ss:$16 sps:$4 sm:$0xff]   ;;  %v4948_v41 = vld [vmem:[#allocation11 + $0xa4] ss:$16 sps:$4 sm:$0xff]  }
  0xee   :  { %4845 = vmatmul.mubr.msk.bf16.vlgmr.msra.gmra.mrb[0].mxu0 %vm233_vm1, %v209_v7  ;;  %v4946_v42 = vld [vmem:[#allocation11 + $0xa0] ss:$16 sps:$4 sm:$0xff]   ;;  %v4951_v43 = vld [vmem:[#allocation11 + $0xc4] ss:$16 sps:$4 sm:$0xff]   ;;  %v302_v5 = vrot.slane %v297_v3, %v5802_v2  ;;  %v306_v6 = vrot.slane %v297_v3, %v5805_v4 }
  0xef   :  { %396 = vmatpush1.bf16.msra.mxu1 %v4918_v12  ;;  %v4949_v44 = vld [vmem:[#allocation11 + $0xc0] ss:$16 sps:$4 sm:$0xff]   ;;  %v4954_v45 = vld [vmem:[#allocation11 + $0xe4] ss:$16 sps:$4 sm:$0xff]  }
  0xf0   :  { %397 = vmatprep.subr.bf16.mxu1 %v4919_v13  ;;  %v4952_v46 = vld [vmem:[#allocation11 + $0xe0] ss:$16 sps:$4 sm:$0xff]   ;;  %v4957_v47 = vld [vmem:[#allocation11 + $0x104] ss:$16 sps:$4 sm:$0xff]  }
  0xf1   :  { %v4955_v48 = vld [vmem:[#allocation11 + $0x100] ss:$16 sps:$4 sm:$0xff]   ;;  %v4960_v49 = vld [vmem:[#allocation11 + $0x124] ss:$16 sps:$4 sm:$0xff]  }
  0xf2   :  { %v4958_v50 = vld [vmem:[#allocation11 + $0x120] ss:$16 sps:$4 sm:$0xff]   ;;  %v4963_v51 = vld [vmem:[#allocation11 + $0x144] ss:$16 sps:$4 sm:$0xff]  }
  0xf3   :  { %398 = vmatpush1.bf16.msra.mxu1 %v4921_v14  ;;  %v4961_v52 = vld [vmem:[#allocation11 + $0x140] ss:$16 sps:$4 sm:$0xff]   ;;  %v4966_v53 = vld [vmem:[#allocation11 + $0x164] ss:$16 sps:$4 sm:$0xff]  }
  0xf4   :  { %399 = vmatprep.subr.bf16.mxu1 %v4922_v15  ;;  %v4964_v54 = vld [vmem:[#allocation11 + $0x160] ss:$16 sps:$4 sm:$0xff]   ;;  %v4969_v55 = vld [vmem:[#allocation11 + $0x184] ss:$16 sps:$4 sm:$0xff]  }
  0xf5   :  { %v4967_v56 = vld [vmem:[#allocation11 + $0x180] ss:$16 sps:$4 sm:$0xff]   ;;  %v4972_v57 = vld [vmem:[#allocation11 + $0x1a4] ss:$16 sps:$4 sm:$0xff]  }
  0xf6   :  { %v4970_v58 = vld [vmem:[#allocation11 + $0x1a0] ss:$16 sps:$4 sm:$0xff]   ;;  %v4975_v59 = vld [vmem:[#allocation11 + $0x1c4] ss:$16 sps:$4 sm:$0xff]  }
  0xf7   :  { %400 = vmatpush1.bf16.msra.mxu1 %v4924_v16  ;;  %v4973_v60 = vld [vmem:[#allocation11 + $0x1c0] ss:$16 sps:$4 sm:$0xff]   ;;  %v4978_v61 = vld [vmem:[#allocation11 + $0x1e4] ss:$16 sps:$4 sm:$0xff]  }
  0xf8   :  { %401 = vmatprep.subr.bf16.mxu1 %v4925_v17  ;;  %v4976_v62 = vld [vmem:[#allocation11 + $0x1e0] ss:$16 sps:$4 sm:$0xff]  }
  0xfb   :  { %402 = vmatpush1.bf16.msra.mxu1 %v4927_v18 }
  0xfc   :  { %403 = vmatprep.subr.bf16.mxu1 %v4928_v19 }
  0xff   :  { %404 = vmatpush1.bf16.msra.mxu1 %v4930_v20 }
 0x100   :  { %910 = vmatprep.subr.bf16.mxu1 %v4933_v22 }
 0x1c1   :  { %v271_v24 = vpop.f32.mrb[0].mxu0 }
 0x1c2   :  { %v272_v25 = vadd.f32 %v4345_v23, %v271_v24  ;;  %v4846_v26 = vpop.f32.mrb[1].mxu0 }
 0x1c3   :  { %v274_v27 = vpop.f32.mrb[2].mxu0 }
 0x1c4   :  { %vm277_vm2 = vcmp.ge.f32.partialorder %v272_v25, 0.0  ;;  %v278_v28 = vmul.f32 0.01, %v272_v25  ;;  %v4847_v29 = vpop.f32.mrb[3].mxu0 }
 0x1c6   :  { %v279_v30 = vsel %vm277_vm2, %v272_v25, %v278_v28 }
 0x1c7   :  { %v280_v32 = vpack.c.bf16 %v279_v30, %v279_v30 }
 0x1c9   :  { %422 = vmatmul.mubr.bf16.vlgmr.msra.gmra.mrb[0].mxu1 %v280_v32 }
 0x1ca   :  { %911 = vmatpush1.bf16.msra.mxu1 %v4931_v31 }
 0x1cb   :  { %912 = vmatprep.subr.bf16.mxu1 %v4936_v33 }
 0x1ce   :  { %913 = vmatpush1.bf16.msra.mxu1 %v4934_v34 }
 0x1cf   :  { %914 = vmatprep.subr.bf16.mxu1 %v4939_v35 }
 0x1d2   :  { %915 = vmatpush1.bf16.msra.mxu1 %v4937_v36 }
 0x1d3   :  { %916 = vmatprep.subr.bf16.mxu1 %v4942_v37 }
 0x1d6   :  { %917 = vmatpush1.bf16.msra.mxu1 %v4940_v38 }
 0x1d7   :  { %918 = vmatprep.subr.bf16.mxu1 %v4945_v39 }
 0x1da   :  { %919 = vmatpush1.bf16.msra.mxu1 %v4943_v40 }
 0x1db   :  { %920 = vmatprep.subr.bf16.mxu1 %v4948_v41 }
 0x1de   :  { %921 = vmatpush1.bf16.msra.mxu1 %v4946_v42 }
 0x1df   :  { %922 = vmatprep.subr.bf16.mxu1 %v4951_v43 }
 0x1e2   :  { %923 = vmatpush1.bf16.msra.mxu1 %v4949_v44 }
 0x1e3   :  { %924 = vmatprep.subr.bf16.mxu1 %v4954_v45 }
 0x1e6   :  { %925 = vmatpush1.bf16.msra.mxu1 %v4952_v46 }
 0x1e7   :  { %926 = vmatprep.subr.bf16.mxu1 %v4957_v47  ;;  %v430_v47 = vld [vmem:[#allocation8] sm:$0x3] }
 0x1ea   :  { %927 = vmatpush1.bf16.msra.mxu1 %v4955_v48  ;;  %v431_v48 = vld [vmem:[#allocation10] sm:$0x3] }
 0x1eb   :  { %928 = vmatprep.subr.bf16.mxu1 %v4960_v49  ;;  %v474_v49 = vrot.slane %v430_v47, %v5802_v2 }
 0x1ee   :  { %929 = vmatpush1.bf16.msra.mxu1 %v4958_v50 }
 0x1ef   :  { %930 = vmatprep.subr.bf16.mxu1 %v4963_v51  ;;  %v478_v51 = vrot.slane %v430_v47, %v5805_v4 }
 0x1f2   :  { %931 = vmatpush1.bf16.msra.mxu1 %v4961_v52 }
 0x1f3   :  { %932 = vmatprep.subr.bf16.mxu1 %v4966_v53 }
 0x1f6   :  { %933 = vmatpush1.bf16.msra.mxu1 %v4964_v54  ;;  %v487_v54 = vrot.slane %v431_v48, %v5802_v2 }
 0x1f7   :  { %934 = vmatprep.subr.bf16.mxu1 %v4969_v55 }
 0x1fa   :  { %935 = vmatpush1.bf16.msra.mxu1 %v4967_v56  ;;  %v491_v56 = vrot.slane %v431_v48, %v5805_v4 }
 0x1fb   :  { %936 = vmatprep.subr.bf16.mxu1 %v4972_v57 }
 0x1fe   :  { %937 = vmatpush1.bf16.msra.mxu1 %v4970_v58 }
 0x1ff   :  { %938 = vmatprep.subr.bf16.mxu1 %v4975_v59 }
 0x202   :  { %939 = vmatpush1.bf16.msra.mxu1 %v4973_v60 }
 0x203   :  { %940 = vmatprep.subr.bf16.mxu1 %v4978_v61 }
 0x206   :  { %941 = vmatpush1.bf16.msra.mxu1 %v4976_v62 }
 0x207   :  { %951 = vmatprep.subr.bf16.mxu1 %v4981_v63 }
 0x29c   :  { %v423_v7 = vpop.f32.mrb[0].mxu1 }
 0x29d   :  { %v424_v8 = vadd.f32 %v423_v7, %v302_v5  ;;  %v425_v9 = vpop.f32.mrb[1].mxu1  ;;  %v4979_v5 = vld [vmem:[#allocation11 + $0x8] ss:$16 sps:$4 sm:$0xff]   ;;  %v4984_v7 = vld [vmem:[#allocation11 + $0x2c] ss:$16 sps:$4 sm:$0xff]  }
 0x29e   :  { %v426_v10 = vadd.f32 %v425_v9, %v306_v6  ;;  %v427_v11 = vpop.f32.mrb[2].mxu1  ;;  %v4987_v9 = vld [vmem:[#allocation11 + $0x4c] ss:$16 sps:$4 sm:$0xff]  }
 0x29f   :  { %v432_v12 = vrot.slane %v424_v8, 4  ;;  %v428_v13 = vpop.f32.mrb[3].mxu1  ;;  %v4990_v11 = vld [vmem:[#allocation11 + $0x6c] ss:$16 sps:$4 sm:$0xff]  }
 0x2a0   :  { %v438_v14 = vrot.slane %v426_v10, 4  ;;  %v4993_v13 = vld [vmem:[#allocation11 + $0x8c] ss:$16 sps:$4 sm:$0xff]  }
 0x2a1   :  { %v433_v15 = vadd.f32 %v432_v12, %v424_v8  ;;  %v4988_v12 = vld [vmem:[#allocation11 + $0x68] ss:$16 sps:$4 sm:$0xff]  }
 0x2a2   :  { %v439_v16 = vadd.f32 %v438_v14, %v426_v10  ;;  %v4991_v14 = vld [vmem:[#allocation11 + $0x88] ss:$16 sps:$4 sm:$0xff]  }
 0x2a3   :  { %v434_v17 = vrot.slane %v433_v15, 2 }
 0x2a4   :  { %v440_v18 = vrot.slane %v439_v16, 2 }
 0x2a5   :  { %v435_v19 = vadd.f32 %v434_v17, %v433_v15  ;;  %v4996_v15 = vld [vmem:[#allocation11 + $0xac] ss:$16 sps:$4 sm:$0xff]  }
 0x2a6   :  { %v441_v20 = vadd.f32 %v440_v18, %v439_v16  ;;  %v4994_v16 = vld [vmem:[#allocation11 + $0xa8] ss:$16 sps:$4 sm:$0xff]   ;;  %v4999_v17 = vld [vmem:[#allocation11 + $0xcc] ss:$16 sps:$4 sm:$0xff]  }
 0x2a7   :  { %v436_v21 = vrot.slane %v435_v19, 1  ;;  %v4997_v18 = vld [vmem:[#allocation11 + $0xc8] ss:$16 sps:$4 sm:$0xff]  }
 0x2a8   :  { %v442_v22 = vrot.slane %v441_v20, 1 }
 0x2a9   :  { %v437_v23 = vadd.f32 %v436_v21, %v435_v19  ;;  %v5002_v19 = vld [vmem:[#allocation11 + $0xec] ss:$16 sps:$4 sm:$0xff]  }
 0x2aa   :  { %v443_v24 = vadd.f32 %v442_v22, %v441_v20  ;;  %v5000_v20 = vld [vmem:[#allocation11 + $0xe8] ss:$16 sps:$4 sm:$0xff]   ;;  %v5005_v21 = vld [vmem:[#allocation11 + $0x10c] ss:$16 sps:$4 sm:$0xff]  }
 0x2ab   :  { %v444_v25 = vmul.f32 0.125, %v437_v23  ;;  %v5003_v22 = vld [vmem:[#allocation11 + $0x108] ss:$16 sps:$4 sm:$0xff]   ;;  %v5008_v23 = vld [vmem:[#allocation11 + $0x12c] ss:$16 sps:$4 sm:$0xff]  }
 0x2ac   :  { %v445_v26 = vmul.f32 0.125, %v443_v24  ;;  %v5006_v24 = vld [vmem:[#allocation11 + $0x128] ss:$16 sps:$4 sm:$0xff]  }
 0x2ad   :  { %v446_v27 = vsub.f32 %v424_v8, %v444_v25  ;;  %v4982_v8 = vld [vmem:[#allocation11 + $0x28] ss:$16 sps:$4 sm:$0xff]   ;;  %v5011_v25 = vld [vmem:[#allocation11 + $0x14c] ss:$16 sps:$4 sm:$0xff]  }
 0x2ae   :  { %v447_v28 = vsub.f32 %v426_v10, %v445_v26  ;;  %v4985_v10 = vld [vmem:[#allocation11 + $0x48] ss:$16 sps:$4 sm:$0xff]  }
 0x2af   :  { %v448_v29 = vmul.f32 %v446_v27, %v446_v27  ;;  %v5009_v26 = vld [vmem:[#allocation11 + $0x148] ss:$16 sps:$4 sm:$0xff]  }
 0x2b0   :  { %v449_v30 = vmul.f32 %v447_v28, %v447_v28 }
 0x2b1   :  { %v450_v31 = vrot.slane %v448_v29, 4 }
 0x2b2   :  { %v456_v32 = vrot.slane %v449_v30, 4 }
 0x2b3   :  { %v451_v33 = vadd.f32 %v450_v31, %v448_v29  ;;  %v5017_v29 = vld [vmem:[#allocation11 + $0x18c] ss:$16 sps:$4 sm:$0xff]  }
 0x2b4   :  { %v457_v34 = vadd.f32 %v456_v32, %v449_v30  ;;  %v5015_v30 = vld [vmem:[#allocation11 + $0x188] ss:$16 sps:$4 sm:$0xff]   ;;  %v5020_v31 = vld [vmem:[#allocation11 + $0x1ac] ss:$16 sps:$4 sm:$0xff]  }
 0x2b5   :  { %v452_v35 = vrot.slane %v451_v33, 2  ;;  %v5018_v32 = vld [vmem:[#allocation11 + $0x1a8] ss:$16 sps:$4 sm:$0xff]  }
 0x2b6   :  { %v458_v36 = vrot.slane %v457_v34, 2 }
 0x2b7   :  { %v453_v37 = vadd.f32 %v452_v35, %v451_v33  ;;  %v5023_v33 = vld [vmem:[#allocation11 + $0x1cc] ss:$16 sps:$4 sm:$0xff]  }
 0x2b8   :  { %v459_v38 = vadd.f32 %v458_v36, %v457_v34  ;;  %v5021_v34 = vld [vmem:[#allocation11 + $0x1c8] ss:$16 sps:$4 sm:$0xff]   ;;  %v5026_v35 = vld [vmem:[#allocation11 + $0x1ec] ss:$16 sps:$4 sm:$0xff]  }
 0x2b9   :  { %v454_v39 = vrot.slane %v453_v37, 1  ;;  %v1136_v36 = vld [vmem:[#allocation16] sm:$0xff] }
 0x2ba   :  { %v460_v40 = vrot.slane %v459_v38, 1 }
 0x2bb   :  { %v455_v41 = vadd.f32 %v454_v39, %v453_v37  ;;  %v1140_v37 = vld [vmem:[#allocation16 + $0x20] sm:$0xff] }
 0x2bc   :  { %v461_v42 = vadd.f32 %v460_v40, %v459_v38  ;;  %v5024_v38 = vld [vmem:[#allocation11 + $0x1e8] ss:$16 sps:$4 sm:$0xff]   ;;  %v4430_v39 = vcombine.high %v1136_v36, %v1140_v37  ;;  %v4429_v40 = vcombine.low %v1136_v36, %v1140_v37 }
 0x2bd   :  { %v462_v43 = vmul.f32 0.125, %v455_v41  ;;  %v1144_v41 = vld [vmem:[#allocation16 + $0x40] sm:$0xff] }
 0x2be   :  { %v463_v44 = vmul.f32 0.125, %v461_v42  ;;  %v1148_v42 = vld [vmem:[#allocation16 + $0x60] sm:$0xff] }
 0x2bf   :  { %v464_v45 = vadd.f32 0.8, %v462_v43  ;;  %v4438_v43 = vcombine.high %v1144_v41, %v1148_v42  ;;  %v1256_v36 = vld [vmem:[#allocation16 + $0x3c0] sm:$0xff] }
 0x2c0   :  { %v465_v46 = vadd.f32 0.8, %v463_v44  ;;  %v4437_v44 = vcombine.low %v1144_v41, %v1148_v42  ;;  %v1260_v37 = vld [vmem:[#allocation16 + $0x3e0] sm:$0xff] }
 0x2c1   :  { %5219 = vrsqrt.f32 %v464_v45  ;;  %v1152_v45 = vld [vmem:[#allocation16 + $0x80] sm:$0xff] }
 0x2c2   :  { %5221 = vrsqrt.f32 %v465_v46  ;;  %v1156_v46 = vld [vmem:[#allocation16 + $0xa0] sm:$0xff] }
 0x2c3   :  { %v4446_v47 = vcombine.high %v1152_v45, %v1156_v46  ;;  %v4445_v48 = vcombine.low %v1152_v45, %v1156_v46  ;;  %v1268_v41 = vld [vmem:[#allocation16 + $0x420] sm:$0xff]  ;;  %v5819_v45 = vld [vmem:[#allocation16 + $0x28] sm:$0xff] }
 0x2cb   :  { %v5220_v50 = vpop.eup %5219 }
 0x2cc   :  { %v5222_v52 = vpop.eup %5221  ;;  %v468_v53 = vmul.f32 %v5220_v50, %v446_v27  ;;  %v5014_v27 = vld [vmem:[#allocation11 + $0x16c] ss:$16 sps:$4 sm:$0xff]  }
 0x2cd   :  { %v469_v55 = vmul.f32 %v5222_v52, %v447_v28  ;;  %v5012_v28 = vld [vmem:[#allocation11 + $0x168] ss:$16 sps:$4 sm:$0xff]  }
 0x2ce   :  { %v481_v57 = vmul.f32 %v474_v49, %v468_v53  ;;  %v1160_v49 = vld [vmem:[#allocation16 + $0xc0] sm:$0xff] }
 0x2cf   :  { %v482_v58 = vmul.f32 %v478_v51, %v469_v55  ;;  %v1164_v50 = vld [vmem:[#allocation16 + $0xe0] sm:$0xff] }
 0x2d0   :  { %v494_v59 = vadd.f32 %v487_v54, %v481_v57  ;;  %v4454_v51 = vcombine.high %v1160_v49, %v1164_v50  ;;  %v4453_v52 = vcombine.low %v1160_v49, %v1164_v50  ;;  %v1168_v53 = vld [vmem:[#allocation16 + $0x100] sm:$0xff] }
 0x2d1   :  { %v495_v60 = vadd.f32 %v491_v56, %v482_v58  ;;  %v1172_v54 = vld [vmem:[#allocation16 + $0x120] sm:$0xff] }
 0x2d2   :  { %vm496_vm3 = vcmp.ge.f32.partialorder %v494_v59, 0.0  ;;  %v498_v61 = vmul.f32 0.01, %v494_v59  ;;  %v4462_v55 = vcombine.high %v1168_v53, %v1172_v54  ;;  %v4461_v56 = vcombine.low %v1168_v53, %v1172_v54  ;;  %v1176_v57 = vld [vmem:[#allocation16 + $0x140] sm:$0xff] }
 0x2d3   :  { %vm497_vm4 = vcmp.ge.f32.partialorder %v495_v60, 0.0  ;;  %v499_v62 = vmul.f32 0.01, %v495_v60  ;;  %v1180_v58 = vld [vmem:[#allocation16 + $0x160] sm:$0xff] }
 0x2d4   :  { %v500_v63 = vsel %vm496_vm3, %v494_v59, %v498_v61  ;;  %v4470_v59 = vcombine.high %v1176_v57, %v1180_v58  ;;  %v1184_v61 = vld [vmem:[#allocation16 + $0x180] sm:$0xff] }
 0x2d5   :  { %v501_v0 = vsel %vm497_vm4, %v495_v60, %v499_v62  ;;  %v5813_v6 = vpack.c.bf16 %v500_v63, %v500_v63  ;;  %v4469_v60 = vcombine.low %v1176_v57, %v1180_v58  ;;  %v1188_v62 = vld [vmem:[#allocation16 + $0x1a0] sm:$0xff] }
 0x2d6   :  { %v503_v3 = vpack.c.bf16 %v501_v0, %v501_v0  ;;  %v4478_v63 = vcombine.high %v1184_v61, %v1188_v62  ;;  %v4477_v0 = vcombine.low %v1184_v61, %v1188_v62  ;;  %v1276_v49 = vld [vmem:[#allocation16 + $0x460] sm:$0xff] }
 0x2d7   :  { %v1284_v53 = vld [vmem:[#allocation16 + $0x4a0] sm:$0xff] }
 0x2d8   :  { %942 = vmatprep.mubr.bf16.mxu1 %v503_v3  ;;  %v1292_v57 = vld [vmem:[#allocation16 + $0x4e0] sm:$0xff] }
 0x2d9   :  { %943 = vmatmul.mubr.bf16.vlgmr.msra.gmra.mrb[4].mxu1 %v5813_v6  ;;  %v1300_v61 = vld [vmem:[#allocation16 + $0x520] sm:$0xff] }
 0x2da   :  { %952 = vmatpush1.bf16.msra.mxu1 %v4979_v5  ;;  %983 = vmatprep.mubr.bf16.mxu1 %v503_v3  ;;  %v1192_v3 = vld [vmem:[#allocation16 + $0x1c0] sm:$0xff] }
 0x2db   :  { %953 = vmatprep.subr.bf16.mxu1 %v4984_v7  ;;  %v1196_v5 = vld [vmem:[#allocation16 + $0x1e0] sm:$0xff] }
 0x2dc   :  { %v4485_v7 = vcombine.low %v1192_v3, %v1196_v5 }
 0x2de   :  { %954 = vmatpush1.bf16.msra.mxu1 %v4982_v8  ;;  %v1200_v8 = vld [vmem:[#allocation16 + $0x200] sm:$0xff] }
 0x2df   :  { %955 = vmatprep.subr.bf16.mxu1 %v4987_v9  ;;  %v1204_v9 = vld [vmem:[#allocation16 + $0x220] sm:$0xff] }
 0x2e2   :  { %956 = vmatpush1.bf16.msra.mxu1 %v4985_v10  ;;  %v4494_v10 = vcombine.high %v1200_v8, %v1204_v9 }
 0x2e3   :  { %957 = vmatprep.subr.bf16.mxu1 %v4990_v11  ;;  %v4493_v11 = vcombine.low %v1200_v8, %v1204_v9  ;;  %v1316_v8 = vld [vmem:[#allocation16 + $0x5a0] sm:$0xff] }
 0x2e6   :  { %958 = vmatpush1.bf16.msra.mxu1 %v4988_v12  ;;  %v1208_v12 = vld [vmem:[#allocation16 + $0x240] sm:$0xff] }
 0x2e7   :  { %959 = vmatprep.subr.bf16.mxu1 %v4993_v13  ;;  %v1212_v13 = vld [vmem:[#allocation16 + $0x260] sm:$0xff] }
 0x2ea   :  { %960 = vmatpush1.bf16.msra.mxu1 %v4991_v14  ;;  %v4502_v14 = vcombine.high %v1208_v12, %v1212_v13 }
 0x2eb   :  { %961 = vmatprep.subr.bf16.mxu1 %v4996_v15  ;;  %v4501_v15 = vcombine.low %v1208_v12, %v1212_v13  ;;  %v1324_v12 = vld [vmem:[#allocation16 + $0x5e0] sm:$0xff] }
 0x2ee   :  { %962 = vmatpush1.bf16.msra.mxu1 %v4994_v16  ;;  %v1216_v16 = vld [vmem:[#allocation16 + $0x280] sm:$0xff] }
 0x2ef   :  { %963 = vmatprep.subr.bf16.mxu1 %v4999_v17  ;;  %v1220_v17 = vld [vmem:[#allocation16 + $0x2a0] sm:$0xff] }
 0x2f2   :  { %964 = vmatpush1.bf16.msra.mxu1 %v4997_v18  ;;  %v4510_v18 = vcombine.high %v1216_v16, %v1220_v17 }
 0x2f3   :  { %965 = vmatprep.subr.bf16.mxu1 %v5002_v19  ;;  %v4509_v19 = vcombine.low %v1216_v16, %v1220_v17  ;;  %v1332_v16 = vld [vmem:[#allocation16 + $0x620] sm:$0xff] }
 0x2f6   :  { %966 = vmatpush1.bf16.msra.mxu1 %v5000_v20  ;;  %v1224_v20 = vld [vmem:[#allocation16 + $0x2c0] sm:$0xff] }
 0x2f7   :  { %967 = vmatprep.subr.bf16.mxu1 %v5005_v21  ;;  %v1228_v21 = vld [vmem:[#allocation16 + $0x2e0] sm:$0xff] }
 0x2fa   :  { %968 = vmatpush1.bf16.msra.mxu1 %v5003_v22  ;;  %v4518_v22 = vcombine.high %v1224_v20, %v1228_v21 }
 0x2fb   :  { %969 = vmatprep.subr.bf16.mxu1 %v5008_v23  ;;  %v4517_v23 = vcombine.low %v1224_v20, %v1228_v21  ;;  %v1340_v20 = vld [vmem:[#allocation16 + $0x660] sm:$0xff] }
 0x2fe   :  { %970 = vmatpush1.bf16.msra.mxu1 %v5006_v24  ;;  %v1232_v24 = vld [vmem:[#allocation16 + $0x300] sm:$0xff] }
 0x2ff   :  { %971 = vmatprep.subr.bf16.mxu1 %v5011_v25  ;;  %v1236_v25 = vld [vmem:[#allocation16 + $0x320] sm:$0xff] }
 0x302   :  { %972 = vmatpush1.bf16.msra.mxu1 %v5009_v26  ;;  %v4526_v26 = vcombine.high %v1232_v24, %v1236_v25 }
 0x303   :  { %973 = vmatprep.subr.bf16.mxu1 %v5014_v27  ;;  %v4525_v27 = vcombine.low %v1232_v24, %v1236_v25  ;;  %v1348_v24 = vld [vmem:[#allocation16 + $0x6a0] sm:$0xff] }
 0x306   :  { %974 = vmatpush1.bf16.msra.mxu1 %v5012_v28  ;;  %v1240_v28 = vld [vmem:[#allocation16 + $0x340] sm:$0xff] }
 0x307   :  { %975 = vmatprep.subr.bf16.mxu1 %v5017_v29  ;;  %v1244_v29 = vld [vmem:[#allocation16 + $0x360] sm:$0xff] }
 0x30a   :  { %976 = vmatpush1.bf16.msra.mxu1 %v5015_v30  ;;  %v4534_v30 = vcombine.high %v1240_v28, %v1244_v29 }
 0x30b   :  { %977 = vmatprep.subr.bf16.mxu1 %v5020_v31  ;;  %v4533_v31 = vcombine.low %v1240_v28, %v1244_v29  ;;  %v1356_v28 = vld [vmem:[#allocation16 + $0x6e0] sm:$0xff] }
 0x30e   :  { %978 = vmatpush1.bf16.msra.mxu1 %v5018_v32  ;;  %v1248_v32 = vld [vmem:[#allocation16 + $0x380] sm:$0xff] }
 0x30f   :  { %979 = vmatprep.subr.bf16.mxu1 %v5023_v33  ;;  %v1252_v33 = vld [vmem:[#allocation16 + $0x3a0] sm:$0xff] }
 0x312   :  { %980 = vmatpush1.bf16.msra.mxu1 %v5021_v34  ;;  %v4542_v34 = vcombine.high %v1248_v32, %v1252_v33 }
 0x313   :  { %981 = vmatprep.subr.bf16.mxu1 %v5026_v35  ;;  %v4541_v35 = vcombine.low %v1248_v32, %v1252_v33  ;;  %v1364_v32 = vld [vmem:[#allocation16 + $0x720] sm:$0xff] }
 0x316   :  { %982 = vmatpush1.bf16.msra.mxu1 %v5024_v38  ;;  %v1264_v38 = vld [vmem:[#allocation16 + $0x400] sm:$0xff] }
 0x317   :  { %2714 = vmatprep.subr.bf16.mxu1 %v4430_v39  ;;  %v4549_v39 = vcombine.low %v1256_v36, %v1260_v37  ;;  %v4557_v42 = vcombine.low %v1264_v38, %v1268_v41 }
 0x319   :  { %984 = vmatmul.mubr.bf16.vlgmr.msra.gmra.mrb[8].mxu1 %v5813_v6  ;;  %v4486_v6 = vcombine.high %v1192_v3, %v1196_v5  ;;  %v1308_v3 = vld [vmem:[#allocation16 + $0x560] sm:$0xff] }
 0x31a   :  { %2715 = vmatpush1.bf16.msra.mxu1 %v4429_v40  ;;  %v4550_v40 = vcombine.high %v1256_v36, %v1260_v37  ;;  %v1372_v36 = vld [vmem:[#allocation16 + $0x760] sm:$0xff] }
 0x31b   :  { %2716 = vmatprep.subr.bf16.mxu1 %v4438_v43  ;;  %v4558_v43 = vcombine.high %v1264_v38, %v1268_v41 }
 0x31d   :  { %2755 = vmatprep.subr.bf16.mxu0 %v4558_v43  ;;  %v1384_v43 = vld [vmem:[#allocation16 + $0x7c0] sm:$0xff] }
 0x31e   :  { %2717 = vmatpush1.bf16.msra.mxu1 %v4437_v44  ;;  %2756 = vmatpush1.bf16.msra.mxu0 %v4557_v42  ;;  %v5817_v44 = vld [vmem:[#allocation16 + $0x8] sm:$0xff] }
 0x31f   :  { %2718 = vmatprep.subr.bf16.mxu1 %v4446_v47  ;;  %v4432_v46 = vcombine.high %v5817_v44, %v5819_v45  ;;  %v4431_v47 = vcombine.low %v5817_v44, %v5819_v45 }
 0x322   :  { %2719 = vmatpush1.bf16.msra.mxu1 %v4445_v48  ;;  %v1272_v48 = vld [vmem:[#allocation16 + $0x440] sm:$0xff] }
 0x323   :  { %2720 = vmatprep.subr.bf16.mxu1 %v4454_v51  ;;  %v4566_v50 = vcombine.high %v1272_v48, %v1276_v49  ;;  %v4565_v51 = vcombine.low %v1272_v48, %v1276_v49 }
 0x325   :  { %2757 = vmatprep.subr.bf16.mxu0 %v4566_v50  ;;  %v5825_v50 = vld [vmem:[#allocation16 + $0x10] sm:$0xff] }
 0x326   :  { %2721 = vmatpush1.bf16.msra.mxu1 %v4453_v52  ;;  %2758 = vmatpush1.bf16.msra.mxu0 %v4565_v51  ;;  %v1280_v52 = vld [vmem:[#allocation16 + $0x480] sm:$0xff]  ;;  %v5827_v51 = vld [vmem:[#allocation16 + $0x30] sm:$0xff] }
 0x327   :  { %2722 = vmatprep.subr.bf16.mxu1 %v4462_v55  ;;  %v4574_v54 = vcombine.high %v1280_v52, %v1284_v53  ;;  %v4573_v55 = vcombine.low %v1280_v52, %v1284_v53  ;;  %v5829_v52 = vld [vmem:[#allocation13] sm:$0xf]  ;;  %v4434_v53 = vcombine.high %v5825_v50, %v5827_v51 }
 0x329   :  { %2759 = vmatprep.subr.bf16.mxu0 %v4574_v54  ;;  %v4433_v54 = vcombine.low %v5825_v50, %v5827_v51 }
 0x32a   :  { %2723 = vmatpush1.bf16.msra.mxu1 %v4461_v56  ;;  %2760 = vmatpush1.bf16.msra.mxu0 %v4573_v55  ;;  %v1288_v56 = vld [vmem:[#allocation16 + $0x4c0] sm:$0xff]  ;;  %v573_v55 = vrot.slane %v5829_v52, %v5802_v2 }
 0x32b   :  { %2724 = vmatprep.subr.bf16.mxu1 %v4470_v59  ;;  %v4582_v58 = vcombine.high %v1288_v56, %v1292_v57  ;;  %v4581_v59 = vcombine.low %v1288_v56, %v1292_v57  ;;  %v577_v56 = vrot.slane %v5829_v52, %v5805_v4 }
 0x32d   :  { %2761 = vmatprep.subr.bf16.mxu0 %v4582_v58 }
 0x32e   :  { %2725 = vmatpush1.bf16.msra.mxu1 %v4469_v60  ;;  %2762 = vmatpush1.bf16.msra.mxu0 %v4581_v59  ;;  %v1296_v60 = vld [vmem:[#allocation16 + $0x500] sm:$0xff] }
 0x32f   :  { %2726 = vmatprep.subr.bf16.mxu1 %v4478_v63  ;;  %v4590_v62 = vcombine.high %v1296_v60, %v1300_v61  ;;  %v4589_v63 = vcombine.low %v1296_v60, %v1300_v61 }
 0x331   :  { %2763 = vmatprep.subr.bf16.mxu0 %v4590_v62 }
 0x332   :  { %2727 = vmatpush1.bf16.msra.mxu1 %v4477_v0  ;;  %2764 = vmatpush1.bf16.msra.mxu0 %v4589_v63  ;;  %v1304_v0 = vld [vmem:[#allocation16 + $0x540] sm:$0xff] }
 0x333   :  { %2728 = vmatprep.subr.bf16.mxu1 %v4486_v6  ;;  %v4598_v5 = vcombine.high %v1304_v0, %v1308_v3  ;;  %v4597_v6 = vcombine.low %v1304_v0, %v1308_v3 }
 0x335   :  { %2765 = vmatprep.subr.bf16.mxu0 %v4598_v5 }
 0x336   :  { %2729 = vmatpush1.bf16.msra.mxu1 %v4485_v7  ;;  %2766 = vmatpush1.bf16.msra.mxu0 %v4597_v6  ;;  %v1312_v7 = vld [vmem:[#allocation16 + $0x580] sm:$0xff] }
 0x337   :  { %2730 = vmatprep.subr.bf16.mxu1 %v4494_v10  ;;  %v4606_v9 = vcombine.high %v1312_v7, %v1316_v8  ;;  %v4605_v10 = vcombine.low %v1312_v7, %v1316_v8 }
 0x339   :  { %2767 = vmatprep.subr.bf16.mxu0 %v4606_v9 }
 0x33a   :  { %2731 = vmatpush1.bf16.msra.mxu1 %v4493_v11  ;;  %2768 = vmatpush1.bf16.msra.mxu0 %v4605_v10  ;;  %v1320_v11 = vld [vmem:[#allocation16 + $0x5c0] sm:$0xff] }
 0x33b   :  { %2732 = vmatprep.subr.bf16.mxu1 %v4502_v14  ;;  %v4614_v13 = vcombine.high %v1320_v11, %v1324_v12  ;;  %v4613_v14 = vcombine.low %v1320_v11, %v1324_v12 }
 0x33d   :  { %2769 = vmatprep.subr.bf16.mxu0 %v4614_v13 }
 0x33e   :  { %2733 = vmatpush1.bf16.msra.mxu1 %v4501_v15  ;;  %2770 = vmatpush1.bf16.msra.mxu0 %v4613_v14  ;;  %v1328_v15 = vld [vmem:[#allocation16 + $0x600] sm:$0xff] }
 0x33f   :  { %2734 = vmatprep.subr.bf16.mxu1 %v4510_v18  ;;  %v4622_v17 = vcombine.high %v1328_v15, %v1332_v16  ;;  %v4621_v18 = vcombine.low %v1328_v15, %v1332_v16 }
 0x341   :  { %2771 = vmatprep.subr.bf16.mxu0 %v4622_v17 }
 0x342   :  { %2735 = vmatpush1.bf16.msra.mxu1 %v4509_v19  ;;  %2772 = vmatpush1.bf16.msra.mxu0 %v4621_v18  ;;  %v1336_v19 = vld [vmem:[#allocation16 + $0x640] sm:$0xff] }
 0x343   :  { %2736 = vmatprep.subr.bf16.mxu1 %v4518_v22  ;;  %v4630_v21 = vcombine.high %v1336_v19, %v1340_v20  ;;  %v4629_v22 = vcombine.low %v1336_v19, %v1340_v20 }
 0x345   :  { %2773 = vmatprep.subr.bf16.mxu0 %v4630_v21 }
 0x346   :  { %2737 = vmatpush1.bf16.msra.mxu1 %v4517_v23  ;;  %2774 = vmatpush1.bf16.msra.mxu0 %v4629_v22  ;;  %v1344_v23 = vld [vmem:[#allocation16 + $0x680] sm:$0xff] }
 0x347   :  { %2738 = vmatprep.subr.bf16.mxu1 %v4526_v26  ;;  %v4638_v25 = vcombine.high %v1344_v23, %v1348_v24  ;;  %v4637_v26 = vcombine.low %v1344_v23, %v1348_v24 }
 0x349   :  { %2775 = vmatprep.subr.bf16.mxu0 %v4638_v25 }
 0x34a   :  { %2739 = vmatpush1.bf16.msra.mxu1 %v4525_v27  ;;  %2776 = vmatpush1.bf16.msra.mxu0 %v4637_v26  ;;  %v1352_v27 = vld [vmem:[#allocation16 + $0x6c0] sm:$0xff] }
 0x34b   :  { %2740 = vmatprep.subr.bf16.mxu1 %v4534_v30  ;;  %v4646_v29 = vcombine.high %v1352_v27, %v1356_v28  ;;  %v4645_v30 = vcombine.low %v1352_v27, %v1356_v28 }
 0x34d   :  { %2777 = vmatprep.subr.bf16.mxu0 %v4646_v29 }
 0x34e   :  { %2741 = vmatpush1.bf16.msra.mxu1 %v4533_v31  ;;  %2778 = vmatpush1.bf16.msra.mxu0 %v4645_v30  ;;  %v1360_v31 = vld [vmem:[#allocation16 + $0x700] sm:$0xff] }
 0x34f   :  { %2742 = vmatprep.subr.bf16.mxu1 %v4542_v34  ;;  %v4654_v33 = vcombine.high %v1360_v31, %v1364_v32  ;;  %v4653_v34 = vcombine.low %v1360_v31, %v1364_v32 }
 0x351   :  { %2779 = vmatprep.subr.bf16.mxu0 %v4654_v33 }
 0x352   :  { %2743 = vmatpush1.bf16.msra.mxu1 %v4541_v35  ;;  %2780 = vmatpush1.bf16.msra.mxu0 %v4653_v34  ;;  %v1368_v35 = vld [vmem:[#allocation16 + $0x740] sm:$0xff] }
 0x353   :  { %2744 = vmatprep.subr.bf16.mxu1 %v4550_v40  ;;  %v4662_v37 = vcombine.high %v1368_v35, %v1372_v36  ;;  %v4661_v38 = vcombine.low %v1368_v35, %v1372_v36  ;;  %v1380_v40 = vld [vmem:[#allocation16 + $0x7a0] sm:$0xff]  ;;  %v5842_v36 = vld [vmem:[%s6007_s9] sm:$0xf] }
 0x355   :  { %2781 = vmatprep.subr.bf16.mxu0 %v4662_v37  ;;  %v5844_v37 = vld [vmem:[#allocation14] sm:$0xf] }
 0x356   :  { %2745 = vmatpush1.bf16.msra.mxu1 %v4549_v39  ;;  %2782 = vmatpush1.bf16.msra.mxu0 %v4661_v38  ;;  %v1376_v39 = vld [vmem:[#allocation16 + $0x780] sm:$0xff]  ;;  %v1074_v38 = vrot.slane %v5842_v36, %v5802_v2 }
 0x357   :  { %2796 = vmatprep.subr.bf16.mxu1 %v4432_v46  ;;  %v4670_v41 = vcombine.high %v1376_v39, %v1380_v40  ;;  %v4669_v42 = vcombine.low %v1376_v39, %v1380_v40  ;;  %v1388_v46 = vld [vmem:[#allocation16 + $0x7e0] sm:$0xff]  ;;  %v1078_v40 = vrot.slane %v5842_v36, %v5805_v4 }
 0x358   :  { %v4677_v48 = vcombine.low %v1384_v43, %v1388_v46  ;;  %v4678_v49 = vcombine.high %v1384_v43, %v1388_v46  ;;  %v1099_v43 = vrot.slane %v5844_v37, %v5802_v2 }
 0x359   :  { %2783 = vmatprep.subr.bf16.mxu0 %v4670_v41 }
 0x35a   :  { %2784 = vmatpush1.bf16.msra.mxu0 %v4669_v42 }
 0x35b   :  { %2785 = vmatprep.subr.bf16.mxu0 %v4678_v49 }
 0x35e   :  { %2786 = vmatpush1.bf16.msra.mxu0 %v4677_v48  ;;  %v1103_v48 = vrot.slane %v5844_v37, %v5805_v4 }
 0x35f   :  { %2878 = vmatprep.subr.bf16.mxu0 %v4434_v53 }
 0x3ac   :  { %v944_v57 = vpop.f32.mrb[4].mxu1 }
 0x3ad   :  { %v945_v58 = vadd.f32 %v944_v57, %v573_v55  ;;  %v946_v59 = vpop.f32.mrb[5].mxu1 }
 0x3ae   :  { %v947_v60 = vadd.f32 %v946_v59, %v577_v56  ;;  %v948_v61 = vpop.f32.mrb[6].mxu1 }
 0x3af   :  { %v994_v62 = vrot.slane %v945_v58, 4  ;;  %v949_v63 = vpop.f32.mrb[7].mxu1  ;;  %v1149_v61 = vld [vmem:[#allocation16 + $0x68] sm:$0xff] }
 0x3b0   :  { %v1000_v0 = vrot.slane %v947_v60, 4  ;;  %v5855_v63 = vsub.s32 2, %v5799_v1 }
 0x3b1   :  { %v995_v3 = vadd.f32 %v994_v62, %v945_v58 }
 0x3b2   :  { %v1001_v5 = vadd.f32 %v1000_v0, %v947_v60 }
 0x3b3   :  { %v996_v6 = vrot.slane %v995_v3, 2 }
 0x3b4   :  { %v1002_v7 = vrot.slane %v1001_v5, 2 }
 0x3b5   :  { %v997_v8 = vadd.f32 %v996_v6, %v995_v3  ;;  %v5860_v3 = vsub.s32 3, %v5799_v1 }
 0x3b6   :  { %v1003_v9 = vadd.f32 %v1002_v7, %v1001_v5  ;;  %v1153_v7 = vld [vmem:[#allocation16 + $0x88] sm:$0xff] }
 0x3b7   :  { %v998_v10 = vrot.slane %v997_v8, 1 }
 0x3b8   :  { %v1004_v11 = vrot.slane %v1003_v9, 1 }
 0x3b9   :  { %v999_v12 = vadd.f32 %v998_v10, %v997_v8  ;;  %v1157_v8 = vld [vmem:[#allocation16 + $0xa8] sm:$0xff]  ;;  %v585_v10 = vrot.slane %v5829_v52, %v5860_v3 }
 0x3ba   :  { %v1005_v13 = vadd.f32 %v1004_v11, %v1003_v9  ;;  %v581_v9 = vrot.slane %v5829_v52, %v5855_v63 }
 0x3bb   :  { %v1018_v14 = vmul.f32 0.125, %v999_v12  ;;  %v4448_v12 = vcombine.high %v1153_v7, %v1157_v8 }
 0x3bc   :  { %v1019_v15 = vmul.f32 0.125, %v1005_v13 }
 0x3bd   :  { %v1022_v16 = vsub.f32 %v945_v58, %v1018_v14  ;;  %v1161_v14 = vld [vmem:[#allocation16 + $0xc8] sm:$0xff] }
 0x3be   :  { %v1023_v17 = vsub.f32 %v947_v60, %v1019_v15  ;;  %v1145_v60 = vld [vmem:[#allocation16 + $0x48] sm:$0xff] }
 0x3bf   :  { %v1026_v18 = vmul.f32 %v1022_v16, %v1022_v16  ;;  %v4440_v6 = vcombine.high %v1145_v60, %v1149_v61  ;;  %v4439_v11 = vcombine.low %v1145_v60, %v1149_v61  ;;  %v1165_v15 = vld [vmem:[#allocation16 + $0xe8] sm:$0xff] }
 0x3c0   :  { %v1027_v19 = vmul.f32 %v1023_v17, %v1023_v17  ;;  %v4456_v45 = vcombine.high %v1161_v14, %v1165_v15 }
 0x3c1   :  { %v1030_v20 = vrot.slane %v1026_v18, 4 }
 0x3c2   :  { %v1036_v21 = vrot.slane %v1027_v19, 4 }
 0x3c3   :  { %v1031_v22 = vadd.f32 %v1030_v20, %v1026_v18  ;;  %v4447_v20 = vcombine.low %v1153_v7, %v1157_v8 }
 0x3c4   :  { %v1037_v23 = vadd.f32 %v1036_v21, %v1027_v19 }
 0x3c5   :  { %v1032_v24 = vrot.slane %v1031_v22, 2 }
 0x3c6   :  { %v1038_v25 = vrot.slane %v1037_v23, 2 }
 0x3c7   :  { %v1033_v26 = vadd.f32 %v1032_v24, %v1031_v22  ;;  %v1169_v22 = vld [vmem:[#allocation16 + $0x108] sm:$0xff] }
 0x3c8   :  { %v1039_v27 = vadd.f32 %v1038_v25, %v1037_v23  ;;  %v1173_v23 = vld [vmem:[#allocation16 + $0x128] sm:$0xff]  ;;  %v4455_v25 = vcombine.low %v1161_v14, %v1165_v15 }
 0x3c9   :  { %v1034_v28 = vrot.slane %v1033_v26, 1  ;;  %v1213_v14 = vld [vmem:[#allocation16 + $0x268] sm:$0xff] }
 0x3ca   :  { %v1040_v29 = vrot.slane %v1039_v27, 1 }
 0x3cb   :  { %v1035_v30 = vadd.f32 %v1034_v28, %v1033_v26 }
 0x3cc   :  { %v1041_v31 = vadd.f32 %v1040_v29, %v1039_v27  ;;  %v4464_v27 = vcombine.high %v1169_v22, %v1173_v23  ;;  %v1177_v29 = vld [vmem:[#allocation16 + $0x148] sm:$0xff] }
 0x3cd   :  { %v1054_v32 = vmul.f32 0.125, %v1035_v30  ;;  %v1181_v30 = vld [vmem:[#allocation16 + $0x168] sm:$0xff] }
 0x3ce   :  { %v1055_v33 = vmul.f32 0.125, %v1041_v31 }
 0x3cf   :  { %v1058_v34 = vadd.f32 0.8, %v1054_v32 }
 0x3d0   :  { %v1059_v35 = vadd.f32 0.8, %v1055_v33  ;;  %v4463_v33 = vcombine.low %v1169_v22, %v1173_v23 }
 0x3d1   :  { %5223 = vrsqrt.f32 %v1058_v34 }
 0x3d2   :  { %5225 = vrsqrt.f32 %v1059_v35  ;;  %v4472_v35 = vcombine.high %v1177_v29, %v1181_v30 }
 0x3db   :  { %v5224_v39 = vpop.eup %5223 }
 0x3dc   :  { %v5226_v41 = vpop.eup %5225  ;;  %v1066_v42 = vmul.f32 %v5224_v39, %v1022_v16  ;;  %v1185_v39 = vld [vmem:[#allocation16 + $0x188] sm:$0xff] }
 0x3dd   :  { %v1067_v46 = vmul.f32 %v5226_v41, %v1023_v17 }
 0x3de   :  { %v1091_v49 = vmul.f32 %v1074_v38, %v1066_v42 }
 0x3df   :  { %v1092_v53 = vmul.f32 %v1078_v40, %v1067_v46  ;;  %v1189_v40 = vld [vmem:[#allocation16 + $0x1a8] sm:$0xff] }
 0x3e0   :  { %v1116_v55 = vadd.f32 %v1099_v43, %v1091_v49  ;;  %v4471_v43 = vcombine.low %v1177_v29, %v1181_v30 }
 0x3e1   :  { %v1117_v56 = vadd.f32 %v1103_v48, %v1092_v53  ;;  %v4480_v48 = vcombine.high %v1185_v39, %v1189_v40  ;;  %v1193_v53 = vld [vmem:[#allocation16 + $0x1c8] sm:$0xff] }
 0x3e2   :  { %vm1120_vm5 = vcmp.ge.f32.partialorder %v1116_v55, 0.0  ;;  %v1124_v57 = vmul.f32 0.01, %v1116_v55 }
 0x3e3   :  { %vm1121_vm6 = vcmp.ge.f32.partialorder %v1117_v56, 0.0  ;;  %v1125_v58 = vmul.f32 0.01, %v1117_v56 }
 0x3e4   :  { %v1128_v59 = vsel %vm1120_vm5, %v1116_v55, %v1124_v57  ;;  %v1197_v55 = vld [vmem:[#allocation16 + $0x1e8] sm:$0xff] }
 0x3e5   :  { %v1129_v62 = vsel %vm1121_vm6, %v1117_v56, %v1125_v58  ;;  %v5862_v5 = vpack.c.bf16 %v1128_v59, %v1128_v59  ;;  %v4479_v58 = vcombine.low %v1185_v39, %v1189_v40  ;;  %v4488_v60 = vcombine.high %v1193_v53, %v1197_v55  ;;  %v1241_v39 = vld [vmem:[#allocation16 + $0x348] sm:$0xff] }
 0x3e6   :  { %v5857_v0 = vpack.c.bf16 %v1129_v62, %v1129_v62  ;;  %v1201_v62 = vld [vmem:[#allocation16 + $0x208] sm:$0xff] }
 0x3e7   :  { %v1245_v40 = vld [vmem:[#allocation16 + $0x368] sm:$0xff] }
 0x3e8   :  { %2746 = vmatprep.mubr.bf16.mxu1 %v5857_v0 }
 0x3e9   :  { %2747 = vmatmul.mubr.bf16.vlgmr.msra.gmra.mrb[12].mxu1 %v5862_v5 }
 0x3ea   :  { %2797 = vmatpush1.bf16.msra.mxu1 %v4431_v47  ;;  %2828 = vmatprep.mubr.bf16.mxu1 %v5857_v0 }
 0x3eb   :  { %2798 = vmatprep.subr.bf16.mxu1 %v4440_v6  ;;  %v1205_v6 = vld [vmem:[#allocation16 + $0x228] sm:$0xff] }
 0x3ec   :  { %v985_v13 = vpop.f32.mrb[8].mxu1 }
 0x3ed   :  { %v986_v16 = vadd.f32 %v985_v13, %v581_v9  ;;  %v987_v17 = vpop.f32.mrb[9].mxu1  ;;  %v4487_v9 = vcombine.low %v1193_v53, %v1197_v55  ;;  %v1209_v13 = vld [vmem:[#allocation16 + $0x248] sm:$0xff]  ;;  %v1086_v55 = vrot.slane %v5842_v36, %v5860_v3 }
 0x3ee   :  { %v988_v18 = vadd.f32 %v987_v17, %v585_v10  ;;  %v989_v19 = vpop.f32.mrb[10].mxu1  ;;  %2799 = vmatpush1.bf16.msra.mxu1 %v4439_v11  ;;  %v4496_v11 = vcombine.high %v1201_v62, %v1205_v6  ;;  %v4495_v17 = vcombine.low %v1201_v62, %v1205_v6  ;;  %v4503_v22 = vcombine.low %v1209_v13, %v1213_v14  ;;  %v1257_v62 = vld [vmem:[#allocation16 + $0x3c8] sm:$0xff] }
 0x3ef   :  { %v1006_v21 = vrot.slane %v986_v16, 4  ;;  %v990_v44 = vpop.f32.mrb[11].mxu1  ;;  %2800 = vmatprep.subr.bf16.mxu1 %v4448_v12  ;;  %v4504_v19 = vcombine.high %v1209_v13, %v1213_v14  ;;  %v1261_v6 = vld [vmem:[#allocation16 + $0x3e8] sm:$0xff] }
 0x3f0   :  { %v1012_v47 = vrot.slane %v988_v18, 4  ;;  %v1221_v44 = vld [vmem:[#allocation16 + $0x2a8] sm:$0xff] }
 0x3f1   :  { %v1007_v52 = vadd.f32 %v1006_v21, %v986_v16  ;;  %v1217_v21 = vld [vmem:[#allocation16 + $0x288] sm:$0xff] }
 0x3f2   :  { %v1013_v24 = vadd.f32 %v1012_v47, %v988_v18  ;;  %2801 = vmatpush1.bf16.msra.mxu1 %v4447_v20  ;;  %v4511_v29 = vcombine.low %v1217_v21, %v1221_v44  ;;  %v1265_v13 = vld [vmem:[#allocation16 + $0x408] sm:$0xff] }
 0x3f3   :  { %v1008_v26 = vrot.slane %v1007_v52, 2  ;;  %2802 = vmatprep.subr.bf16.mxu1 %v4456_v45  ;;  %v1269_v14 = vld [vmem:[#allocation16 + $0x428] sm:$0xff] }
 0x3f4   :  { %v1014_v28 = vrot.slane %v1013_v24, 2 }
 0x3f5   :  { %v1009_v31 = vadd.f32 %v1008_v26, %v1007_v52  ;;  %v4512_v52 = vcombine.high %v1217_v21, %v1221_v44  ;;  %v1229_v26 = vld [vmem:[#allocation16 + $0x2e8] sm:$0xff] }
 0x3f6   :  { %v1015_v32 = vadd.f32 %v1014_v28, %v1013_v24  ;;  %2803 = vmatpush1.bf16.msra.mxu1 %v4455_v25  ;;  %v1225_v25 = vld [vmem:[#allocation16 + $0x2c8] sm:$0xff] }
 0x3f7   :  { %v1010_v34 = vrot.slane %v1009_v31, 1  ;;  %2804 = vmatprep.subr.bf16.mxu1 %v4464_v27  ;;  %v1273_v21 = vld [vmem:[#allocation16 + $0x448] sm:$0xff] }
 0x3f8   :  { %v1016_v38 = vrot.slane %v1015_v32, 1  ;;  %v1277_v44 = vld [vmem:[#allocation16 + $0x468] sm:$0xff] }
 0x3f9   :  { %v1011_v41 = vadd.f32 %v1010_v34, %v1009_v31  ;;  %v4520_v31 = vcombine.high %v1225_v25, %v1229_v26  ;;  %v1237_v34 = vld [vmem:[#allocation16 + $0x328] sm:$0xff] }
 0x3fa   :  { %v1017_v42 = vadd.f32 %v1016_v38, %v1015_v32  ;;  %2805 = vmatpush1.bf16.msra.mxu1 %v4463_v33  ;;  %v1233_v33 = vld [vmem:[#allocation16 + $0x308] sm:$0xff] }
 0x3fb   :  { %v1020_v46 = vmul.f32 0.125, %v1011_v41  ;;  %2806 = vmatprep.subr.bf16.mxu1 %v4472_v35  ;;  %v4519_v35 = vcombine.low %v1225_v25, %v1229_v26  ;;  %v4528_v38 = vcombine.high %v1233_v33, %v1237_v34  ;;  %v4527_v41 = vcombine.low %v1233_v33, %v1237_v34  ;;  %v1158_v25 = vld [vmem:[#allocation16 + $0xb0] sm:$0xff]  ;;  %v1281_v26 = vld [vmem:[#allocation16 + $0x488] sm:$0xff] }
 0x3fc   :  { %v1021_v49 = vmul.f32 0.125, %v1017_v42  ;;  %v4536_v42 = vcombine.high %v1241_v39, %v1245_v40  ;;  %v1166_v33 = vld [vmem:[#allocation16 + $0xf0] sm:$0xff]  ;;  %v1289_v34 = vld [vmem:[#allocation16 + $0x4c8] sm:$0xff] }
 0x3fd   :  { %v5874_v56 = vsub.f32 %v986_v16, %v1020_v46  ;;  %v1253_v46 = vld [vmem:[#allocation16 + $0x3a8] sm:$0xff] }
 0x3fe   :  { %v5876_v57 = vsub.f32 %v988_v18, %v1021_v49  ;;  %2807 = vmatpush1.bf16.msra.mxu1 %v4471_v43  ;;  %v1249_v43 = vld [vmem:[#allocation16 + $0x388] sm:$0xff]  ;;  %v4535_v49 = vcombine.low %v1241_v39, %v1245_v40  ;;  %v1170_v39 = vld [vmem:[#allocation16 + $0x110] sm:$0xff] }
 0x3ff   :  { %v1028_v59 = vmul.f32 %v5874_v56, %v5874_v56  ;;  %2808 = vmatprep.subr.bf16.mxu1 %v4480_v48  ;;  %v1082_v48 = vrot.slane %v5842_v36, %v5855_v63  ;;  %v4552_v36 = vcombine.high %v1257_v62, %v1261_v6  ;;  %v1174_v40 = vld [vmem:[#allocation16 + $0x130] sm:$0xff] }
 0x400   :  { %v1029_v61 = vmul.f32 %v5876_v57, %v5876_v57 }
 0x401   :  { %v1042_v7 = vrot.slane %v1028_v59, 4 }
 0x402   :  { %v1048_v8 = vrot.slane %v1029_v61, 4  ;;  %2809 = vmatpush1.bf16.msra.mxu1 %v4479_v58  ;;  %v4544_v58 = vcombine.high %v1249_v43, %v1253_v46 }
 0x403   :  { %v1043_v10 = vadd.f32 %v1042_v7, %v1028_v59  ;;  %2810 = vmatprep.subr.bf16.mxu1 %v4488_v60 }
 0x404   :  { %v1049_v12 = vadd.f32 %v1048_v8, %v1029_v61  ;;  %v1107_v61 = vrot.slane %v5844_v37, %v5855_v63  ;;  %v1111_v8 = vrot.slane %v5844_v37, %v5860_v3  ;;  %v1146_v37 = vld [vmem:[#allocation16 + $0x50] sm:$0xff] }
 0x405   :  { %v1044_v15 = vrot.slane %v1043_v10, 2 }
 0x406   :  { %v1050_v16 = vrot.slane %v1049_v12, 2  ;;  %2811 = vmatpush1.bf16.msra.mxu1 %v4487_v9 }
 0x407   :  { %v1045_v18 = vadd.f32 %v1044_v15, %v1043_v10  ;;  %2812 = vmatprep.subr.bf16.mxu1 %v4496_v11  ;;  %v4543_v10 = vcombine.low %v1249_v43, %v1253_v46  ;;  %v4551_v15 = vcombine.low %v1257_v62, %v1261_v6 }
 0x408   :  { %v1051_v20 = vadd.f32 %v1050_v16, %v1049_v12 }
 0x409   :  { %v1046_v45 = vrot.slane %v1045_v18, 1 }
 0x40a   :  { %v1052_v47 = vrot.slane %v1051_v20, 1  ;;  %2813 = vmatpush1.bf16.msra.mxu1 %v4495_v17  ;;  %v4560_v17 = vcombine.high %v1265_v13, %v1269_v14 }
 0x40b   :  { %v1047_v23 = vadd.f32 %v1046_v45, %v1045_v18  ;;  %2814 = vmatprep.subr.bf16.mxu1 %v4504_v19 }
 0x40c   :  { %v1053_v24 = vadd.f32 %v1052_v47, %v1051_v20  ;;  %v1150_v20 = vld [vmem:[#allocation16 + $0x70] sm:$0xff]  ;;  %v4559_v47 = vcombine.low %v1265_v13, %v1269_v14 }
 0x40d   :  { %v1056_v27 = vmul.f32 0.125, %v1047_v23  ;;  %v1154_v23 = vld [vmem:[#allocation16 + $0x90] sm:$0xff] }
 0x40e   :  { %v1057_v28 = vmul.f32 0.125, %v1053_v24  ;;  %2815 = vmatpush1.bf16.msra.mxu1 %v4503_v22  ;;  %v4568_v24 = vcombine.high %v1273_v21, %v1277_v44  ;;  %v1194_v14 = vld [vmem:[#allocation16 + $0x1d0] sm:$0xff] }
 0x40f   :  { %v1060_v30 = vadd.f32 0.8, %v1056_v27  ;;  %2816 = vmatprep.subr.bf16.mxu1 %v4512_v52  ;;  %v4442_v52 = vcombine.high %v1146_v37, %v1150_v20  ;;  %v1285_v27 = vld [vmem:[#allocation16 + $0x4a8] sm:$0xff] }
 0x410   :  { %v1061_v32 = vadd.f32 0.8, %v1057_v28  ;;  %v4441_v28 = vcombine.low %v1146_v37, %v1150_v20  ;;  %v4575_v50 = vcombine.low %v1281_v26, %v1285_v27  ;;  %v1206_v20 = vld [vmem:[#allocation16 + $0x230] sm:$0xff] }
 0x411   :  { %5227 = vrsqrt.f32 %v1060_v30  ;;  %v4450_v30 = vcombine.high %v1154_v23, %v1158_v25 }
 0x412   :  { %5229 = vrsqrt.f32 %v1061_v32  ;;  %2817 = vmatpush1.bf16.msra.mxu1 %v4511_v29  ;;  %v4567_v29 = vcombine.low %v1273_v21, %v1277_v44  ;;  %v1162_v32 = vld [vmem:[#allocation16 + $0xd0] sm:$0xff]  ;;  %v1329_v21 = vld [vmem:[#allocation16 + $0x608] sm:$0xff] }
 0x413   :  { %2818 = vmatprep.subr.bf16.mxu1 %v4520_v31  ;;  %v4576_v31 = vcombine.high %v1281_v26, %v1285_v27  ;;  %v4458_v51 = vcombine.high %v1162_v32, %v1166_v33  ;;  %v4457_v43 = vcombine.low %v1162_v32, %v1166_v33  ;;  %v1333_v44 = vld [vmem:[#allocation16 + $0x628] sm:$0xff]  ;;  %v1214_v26 = vld [vmem:[#allocation16 + $0x270] sm:$0xff] }
 0x414   :  { %v1337_v27 = vld [vmem:[#allocation16 + $0x648] sm:$0xff]  ;;  %v1218_v33 = vld [vmem:[#allocation16 + $0x290] sm:$0xff] }
 0x416   :  { %2819 = vmatpush1.bf16.msra.mxu1 %v4519_v35  ;;  %v1293_v35 = vld [vmem:[#allocation16 + $0x4e8] sm:$0xff] }
 0x417   :  { %2820 = vmatprep.subr.bf16.mxu1 %v4528_v38  ;;  %v4449_v38 = vcombine.low %v1154_v23, %v1158_v25  ;;  %v4583_v46 = vcombine.low %v1289_v34, %v1293_v35  ;;  %v1210_v25 = vld [vmem:[#allocation16 + $0x250] sm:$0xff] }
 0x41a   :  { %2821 = vmatpush1.bf16.msra.mxu1 %v4527_v41  ;;  %v1297_v41 = vld [vmem:[#allocation16 + $0x508] sm:$0xff] }
 0x41b   :  { %v5228_v53 = vpop.eup %5227  ;;  %2822 = vmatprep.subr.bf16.mxu1 %v4536_v42  ;;  %v1301_v42 = vld [vmem:[#allocation16 + $0x528] sm:$0xff] }
 0x41c   :  { %v5230_v59 = vpop.eup %5229  ;;  %v1068_v60 = vmul.f32 %v5228_v53, %v5874_v56  ;;  %v1178_v53 = vld [vmem:[#allocation16 + $0x150] sm:$0xff] }
 0x41d   :  { %v1069_v7 = vmul.f32 %v5230_v59, %v5876_v57  ;;  %v1309_v59 = vld [vmem:[#allocation16 + $0x568] sm:$0xff] }
 0x41e   :  { %v1093_v9 = vmul.f32 %v1082_v48, %v1068_v60  ;;  %2823 = vmatpush1.bf16.msra.mxu1 %v4535_v49  ;;  %v4466_v48 = vcombine.high %v1170_v39, %v1174_v40  ;;  %v4592_v49 = vcombine.high %v1297_v41, %v1301_v42  ;;  %v4465_v60 = vcombine.low %v1170_v39, %v1174_v40  ;;  %v1226_v40 = vld [vmem:[#allocation16 + $0x2d0] sm:$0xff] }
 0x41f   :  { %v1094_v11 = vmul.f32 %v1086_v55, %v1069_v7  ;;  %2824 = vmatprep.subr.bf16.mxu1 %v4544_v58  ;;  %v1182_v55 = vld [vmem:[#allocation16 + $0x170] sm:$0xff]  ;;  %v1305_v58 = vld [vmem:[#allocation16 + $0x548] sm:$0xff] }
 0x420   :  { %v1118_v12 = vadd.f32 %v1107_v61, %v1093_v9  ;;  %v4591_v61 = vcombine.low %v1297_v41, %v1301_v42  ;;  %v4474_v62 = vcombine.high %v1178_v53, %v1182_v55  ;;  %v4600_v6 = vcombine.high %v1305_v58, %v1309_v59  ;;  %v1186_v7 = vld [vmem:[#allocation16 + $0x190] sm:$0xff]  ;;  %v1313_v9 = vld [vmem:[#allocation16 + $0x588] sm:$0xff] }
 0x421   :  { %v1119_v56 = vadd.f32 %v1111_v8, %v1094_v11  ;;  %v1190_v8 = vld [vmem:[#allocation16 + $0x1b0] sm:$0xff]  ;;  %v4473_v11 = vcombine.low %v1178_v53, %v1182_v55  ;;  %v1353_v42 = vld [vmem:[#allocation16 + $0x6c8] sm:$0xff] }
 0x422   :  { %2825 = vmatpush1.bf16.msra.mxu1 %v4543_v10  ;;  %vm1122_vm7 = vcmp.ge.f32.partialorder %v1118_v12, 0.0  ;;  %v1126_v16 = vmul.f32 0.01, %v1118_v12  ;;  %v1317_v10 = vld [vmem:[#allocation16 + $0x5a8] sm:$0xff]  ;;  %v1230_v41 = vld [vmem:[#allocation16 + $0x2f0] sm:$0xff] }
 0x423   :  { %2826 = vmatprep.subr.bf16.mxu1 %v4552_v36  ;;  %vm1123_vm8 = vcmp.ge.f32.partialorder %v1119_v56, 0.0  ;;  %v1127_v57 = vmul.f32 0.01, %v1119_v56  ;;  %v4599_v36 = vcombine.low %v1305_v58, %v1309_v59  ;;  %v4608_v13 = vcombine.high %v1313_v9, %v1317_v10  ;;  %v1234_v55 = vld [vmem:[#allocation16 + $0x310] sm:$0xff]  ;;  %v1361_v59 = vld [vmem:[#allocation16 + $0x708] sm:$0xff] }
 0x424   :  { %v1130_v18 = vsel %vm1122_vm7, %v1118_v12, %v1126_v16  ;;  %v4482_v12 = vcombine.high %v1186_v7, %v1190_v8  ;;  %v1325_v16 = vld [vmem:[#allocation16 + $0x5e8] sm:$0xff]  ;;  %v1238_v58 = vld [vmem:[#allocation16 + $0x330] sm:$0xff] }
 0x425   :  { %v1131_v19 = vsel %vm1123_vm8, %v1119_v56, %v1127_v57  ;;  %v5894_v22 = vpack.c.bf16 %v1130_v18, %v1130_v18  ;;  %v1198_v56 = vld [vmem:[#allocation16 + $0x1f0] sm:$0xff]  ;;  %v4481_v57 = vcombine.low %v1186_v7, %v1190_v8 }
 0x426   :  { %2827 = vmatpush1.bf16.msra.mxu1 %v4551_v15  ;;  %v5892_v45 = vpack.c.bf16 %v1131_v19, %v1131_v19  ;;  %v1321_v15 = vld [vmem:[#allocation16 + $0x5c8] sm:$0xff]  ;;  %v4490_v18 = vcombine.high %v1194_v14, %v1198_v56  ;;  %v1202_v19 = vld [vmem:[#allocation16 + $0x210] sm:$0xff] }
 0x427   :  { %2837 = vmatprep.subr.bf16.mxu1 %v4560_v17  ;;  %v4607_v17 = vcombine.low %v1313_v9, %v1317_v10  ;;  %v4616_v37 = vcombine.high %v1321_v15, %v1325_v16  ;;  %v4615_v23 = vcombine.low %v1321_v15, %v1325_v16  ;;  %v1242_v8 = vld [vmem:[#allocation16 + $0x350] sm:$0xff]  ;;  %v1369_v10 = vld [vmem:[#allocation16 + $0x748] sm:$0xff] }
 0x428   :  { %2787 = vmatprep.mubr.bf16.mxu0 %v5892_v45  ;;  %v1246_v9 = vld [vmem:[#allocation16 + $0x370] sm:$0xff]  ;;  %v1377_v16 = vld [vmem:[#allocation16 + $0x788] sm:$0xff] }
 0x429   :  { %2788 = vmatmul.mubr.bf16.vlgmr.msra.gmra.mrb[4].mxu0 %v5894_v22  ;;  %2829 = vmatmul.mubr.bf16.vlgmr.msra.gmra.mrb[16].mxu1 %v5862_v5  ;;  %v1254_v15 = vld [vmem:[#allocation16 + $0x3b0] sm:$0xff] }
 0x42a   :  { %2879 = vmatpush1.bf16.msra.mxu0 %v4433_v54  ;;  %2838 = vmatpush1.bf16.msra.mxu1 %v4559_v47  ;;  %v4584_v54 = vcombine.high %v1289_v34, %v1293_v35  ;;  %v4489_v47 = vcombine.low %v1194_v14, %v1198_v56  ;;  %v1222_v34 = vld [vmem:[#allocation16 + $0x2b0] sm:$0xff]  ;;  %v1345_v35 = vld [vmem:[#allocation16 + $0x688] sm:$0xff] }
 0x42b   :  { %2869 = vmatprep.mubr.bf16.mxu1 %v5892_v45  ;;  %2910 = vmatprep.mubr.bf16.mxu0 %v5857_v0  ;;  %v1250_v56 = vld [vmem:[#allocation16 + $0x390] sm:$0xff] }
 0x42c   :  { %2880 = vmatprep.subr.bf16.mxu0 %v4442_v52  ;;  %2839 = vmatprep.subr.bf16.mxu1 %v4568_v24  ;;  %v4498_v52 = vcombine.high %v1202_v19, %v1206_v20  ;;  %v4624_v24 = vcombine.high %v1329_v21, %v1333_v44 }
 0x42e   :  { %2881 = vmatpush1.bf16.msra.mxu0 %v4441_v28  ;;  %2840 = vmatpush1.bf16.msra.mxu1 %v4567_v29  ;;  %v1341_v28 = vld [vmem:[#allocation16 + $0x668] sm:$0xff]  ;;  %v4497_v29 = vcombine.low %v1202_v19, %v1206_v20  ;;  %v1258_v20 = vld [vmem:[#allocation16 + $0x3d0] sm:$0xff] }
 0x42f   :  { %2882 = vmatprep.subr.bf16.mxu0 %v4450_v30  ;;  %2841 = vmatprep.subr.bf16.mxu1 %v4576_v31  ;;  %v4623_v30 = vcombine.low %v1329_v21, %v1333_v44  ;;  %v4506_v31 = vcombine.high %v1210_v25, %v1214_v26  ;;  %v4632_v32 = vcombine.high %v1337_v27, %v1341_v28  ;;  %v1262_v21 = vld [vmem:[#allocation16 + $0x3f0] sm:$0xff]  ;;  %v1385_v44 = vld [vmem:[#allocation16 + $0x7c8] sm:$0xff] }
 0x432   :  { %2883 = vmatpush1.bf16.msra.mxu0 %v4449_v38  ;;  %2842 = vmatpush1.bf16.msra.mxu1 %v4575_v50  ;;  %v1349_v38 = vld [vmem:[#allocation16 + $0x6a8] sm:$0xff]  ;;  %v4505_v50 = vcombine.low %v1210_v25, %v1214_v26  ;;  %v1266_v26 = vld [vmem:[#allocation16 + $0x410] sm:$0xff] }
 0x433   :  { %2884 = vmatprep.subr.bf16.mxu0 %v4458_v51  ;;  %2843 = vmatprep.subr.bf16.mxu1 %v4584_v54  ;;  %v4631_v51 = vcombine.low %v1337_v27, %v1341_v28  ;;  %v4514_v54 = vcombine.high %v1218_v33, %v1222_v34  ;;  %v4640_v39 = vcombine.high %v1345_v35, %v1349_v38  ;;  %v1270_v27 = vld [vmem:[#allocation16 + $0x430] sm:$0xff]  ;;  %v1139_v28 = vld [vmem:[#allocation16 + $0x18] sm:$0xff] }
 0x436   :  { %2885 = vmatpush1.bf16.msra.mxu0 %v4457_v43  ;;  %2844 = vmatpush1.bf16.msra.mxu1 %v4583_v46  ;;  %v1357_v43 = vld [vmem:[#allocation16 + $0x6e8] sm:$0xff]  ;;  %v4513_v46 = vcombine.low %v1218_v33, %v1222_v34  ;;  %v1274_v34 = vld [vmem:[#allocation16 + $0x450] sm:$0xff] }
 0x437   :  { %2886 = vmatprep.subr.bf16.mxu0 %v4466_v48  ;;  %2845 = vmatprep.subr.bf16.mxu1 %v4592_v49  ;;  %v4639_v48 = vcombine.low %v1345_v35, %v1349_v38  ;;  %v4522_v49 = vcombine.high %v1226_v40, %v1230_v41  ;;  %v4648_v53 = vcombine.high %v1353_v42, %v1357_v43  ;;  %v1278_v35 = vld [vmem:[#allocation16 + $0x470] sm:$0xff]  ;;  %v1147_v38 = vld [vmem:[#allocation16 + $0x58] sm:$0xff] }
 0x43a   :  { %2887 = vmatpush1.bf16.msra.mxu0 %v4465_v60  ;;  %2846 = vmatpush1.bf16.msra.mxu1 %v4591_v61  ;;  %v1365_v60 = vld [vmem:[#allocation16 + $0x728] sm:$0xff]  ;;  %v4521_v61 = vcombine.low %v1226_v40, %v1230_v41  ;;  %v1282_v41 = vld [vmem:[#allocation16 + $0x490] sm:$0xff] }
 0x43b   :  { %2888 = vmatprep.subr.bf16.mxu0 %v4474_v62  ;;  %2847 = vmatprep.subr.bf16.mxu1 %v4600_v6  ;;  %v4647_v62 = vcombine.low %v1353_v42, %v1357_v43  ;;  %v4530_v6 = vcombine.high %v1234_v55, %v1238_v58  ;;  %v4656_v7 = vcombine.high %v1361_v59, %v1365_v60  ;;  %v1286_v42 = vld [vmem:[#allocation16 + $0x4b0] sm:$0xff]  ;;  %v1155_v43 = vld [vmem:[#allocation16 + $0x98] sm:$0xff] }
 0x43e   :  { %2889 = vmatpush1.bf16.msra.mxu0 %v4473_v11  ;;  %2848 = vmatpush1.bf16.msra.mxu1 %v4599_v36  ;;  %v1373_v11 = vld [vmem:[#allocation16 + $0x768] sm:$0xff]  ;;  %v4529_v36 = vcombine.low %v1234_v55, %v1238_v58  ;;  %v1290_v58 = vld [vmem:[#allocation16 + $0x4d0] sm:$0xff] }
 0x43f   :  { %2890 = vmatprep.subr.bf16.mxu0 %v4482_v12  ;;  %2849 = vmatprep.subr.bf16.mxu1 %v4608_v13  ;;  %v4655_v12 = vcombine.low %v1361_v59, %v1365_v60  ;;  %v4538_v13 = vcombine.high %v1242_v8, %v1246_v9  ;;  %v4664_v14 = vcombine.high %v1369_v10, %v1373_v11  ;;  %v1294_v59 = vld [vmem:[#allocation16 + $0x4f0] sm:$0xff]  ;;  %v1163_v60 = vld [vmem:[#allocation16 + $0xd8] sm:$0xff] }
 0x442   :  { %2891 = vmatpush1.bf16.msra.mxu0 %v4481_v57  ;;  %2850 = vmatpush1.bf16.msra.mxu1 %v4607_v17  ;;  %v1381_v57 = vld [vmem:[#allocation16 + $0x7a8] sm:$0xff]  ;;  %v4537_v17 = vcombine.low %v1242_v8, %v1246_v9  ;;  %v1298_v9 = vld [vmem:[#allocation16 + $0x510] sm:$0xff] }
 0x443   :  { %2892 = vmatprep.subr.bf16.mxu0 %v4490_v18  ;;  %2851 = vmatprep.subr.bf16.mxu1 %v4616_v37  ;;  %v4663_v18 = vcombine.low %v1369_v10, %v1373_v11  ;;  %v4546_v37 = vcombine.high %v1250_v56, %v1254_v15  ;;  %v4672_v19 = vcombine.high %v1377_v16, %v1381_v57  ;;  %v1302_v10 = vld [vmem:[#allocation16 + $0x530] sm:$0xff]  ;;  %v1175_v11 = vld [vmem:[#allocation16 + $0x138] sm:$0xff] }
 0x446   :  { %2893 = vmatpush1.bf16.msra.mxu0 %v4489_v47  ;;  %2852 = vmatpush1.bf16.msra.mxu1 %v4615_v23  ;;  %v1389_v47 = vld [vmem:[#allocation16 + $0x7e8] sm:$0xff]  ;;  %v4545_v23 = vcombine.low %v1250_v56, %v1254_v15  ;;  %v1306_v56 = vld [vmem:[#allocation16 + $0x550] sm:$0xff] }
 0x447   :  { %2894 = vmatprep.subr.bf16.mxu0 %v4498_v52  ;;  %2853 = vmatprep.subr.bf16.mxu1 %v4624_v24  ;;  %v4671_v52 = vcombine.low %v1377_v16, %v1381_v57  ;;  %v4554_v24 = vcombine.high %v1258_v20, %v1262_v21  ;;  %v4680_v25 = vcombine.high %v1385_v44, %v1389_v47  ;;  %v1310_v15 = vld [vmem:[#allocation16 + $0x570] sm:$0xff]  ;;  %v1179_v16 = vld [vmem:[#allocation16 + $0x158] sm:$0xff] }
 0x448   :  { %v1183_v57 = vld [vmem:[#allocation16 + $0x178] sm:$0xff] }
 0x44a   :  { %2895 = vmatpush1.bf16.msra.mxu0 %v4497_v29  ;;  %2854 = vmatpush1.bf16.msra.mxu1 %v4623_v30  ;;  %v1143_v29 = vld [vmem:[#allocation16 + $0x38] sm:$0xff]  ;;  %v4553_v30 = vcombine.low %v1258_v20, %v1262_v21  ;;  %v1314_v20 = vld [vmem:[#allocation16 + $0x590] sm:$0xff] }
 0x44b   :  { %2896 = vmatprep.subr.bf16.mxu0 %v4506_v31  ;;  %2855 = vmatprep.subr.bf16.mxu1 %v4632_v32  ;;  %v4679_v31 = vcombine.low %v1385_v44, %v1389_v47  ;;  %v4562_v32 = vcombine.high %v1266_v26, %v1270_v27  ;;  %v4436_v33 = vcombine.high %v1139_v28, %v1143_v29  ;;  %v1318_v21 = vld [vmem:[#allocation16 + $0x5b0] sm:$0xff]  ;;  %v1187_v44 = vld [vmem:[#allocation16 + $0x198] sm:$0xff] }
 0x44c   :  { %v1191_v47 = vld [vmem:[#allocation16 + $0x1b8] sm:$0xff] }
 0x44e   :  { %2897 = vmatpush1.bf16.msra.mxu0 %v4505_v50  ;;  %2856 = vmatpush1.bf16.msra.mxu1 %v4631_v51  ;;  %v1151_v50 = vld [vmem:[#allocation16 + $0x78] sm:$0xff]  ;;  %v4561_v51 = vcombine.low %v1266_v26, %v1270_v27  ;;  %v1322_v26 = vld [vmem:[#allocation16 + $0x5d0] sm:$0xff] }
 0x44f   :  { %2898 = vmatprep.subr.bf16.mxu0 %v4514_v54  ;;  %2857 = vmatprep.subr.bf16.mxu1 %v4640_v39  ;;  %v4435_v54 = vcombine.low %v1139_v28, %v1143_v29  ;;  %v4570_v39 = vcombine.high %v1274_v34, %v1278_v35  ;;  %v4444_v40 = vcombine.high %v1147_v38, %v1151_v50  ;;  %v1326_v27 = vld [vmem:[#allocation16 + $0x5f0] sm:$0xff]  ;;  %v1195_v28 = vld [vmem:[#allocation16 + $0x1d8] sm:$0xff] }
 0x450   :  { %v1199_v29 = vld [vmem:[#allocation16 + $0x1f8] sm:$0xff] }
 0x452   :  { %2899 = vmatpush1.bf16.msra.mxu0 %v4513_v46  ;;  %2858 = vmatpush1.bf16.msra.mxu1 %v4639_v48  ;;  %v1159_v46 = vld [vmem:[#allocation16 + $0xb8] sm:$0xff]  ;;  %v4569_v48 = vcombine.low %v1274_v34, %v1278_v35  ;;  %v1330_v34 = vld [vmem:[#allocation16 + $0x610] sm:$0xff] }
 0x453   :  { %2900 = vmatprep.subr.bf16.mxu0 %v4522_v49  ;;  %2859 = vmatprep.subr.bf16.mxu1 %v4648_v53  ;;  %v4443_v49 = vcombine.low %v1147_v38, %v1151_v50  ;;  %v4578_v53 = vcombine.high %v1282_v41, %v1286_v42  ;;  %v4452_v55 = vcombine.high %v1155_v43, %v1159_v46  ;;  %v1334_v35 = vld [vmem:[#allocation16 + $0x630] sm:$0xff]  ;;  %v1203_v38 = vld [vmem:[#allocation16 + $0x218] sm:$0xff] }
 0x454   :  { %v1207_v50 = vld [vmem:[#allocation16 + $0x238] sm:$0xff] }
 0x456   :  { %2901 = vmatpush1.bf16.msra.mxu0 %v4521_v61  ;;  %2860 = vmatpush1.bf16.msra.mxu1 %v4647_v62  ;;  %v1167_v61 = vld [vmem:[#allocation16 + $0xf8] sm:$0xff]  ;;  %v4577_v62 = vcombine.low %v1282_v41, %v1286_v42  ;;  %v1338_v41 = vld [vmem:[#allocation16 + $0x650] sm:$0xff] }
 0x457   :  { %2902 = vmatprep.subr.bf16.mxu0 %v4530_v6  ;;  %2861 = vmatprep.subr.bf16.mxu1 %v4656_v7  ;;  %v4451_v6 = vcombine.low %v1155_v43, %v1159_v46  ;;  %v4586_v7 = vcombine.high %v1290_v58, %v1294_v59  ;;  %v4460_v8 = vcombine.high %v1163_v60, %v1167_v61  ;;  %v1342_v42 = vld [vmem:[#allocation16 + $0x670] sm:$0xff]  ;;  %v1211_v43 = vld [vmem:[#allocation16 + $0x258] sm:$0xff] }
 0x458   :  { %v1215_v46 = vld [vmem:[#allocation16 + $0x278] sm:$0xff] }
 0x45a   :  { %2903 = vmatpush1.bf16.msra.mxu0 %v4529_v36  ;;  %2862 = vmatpush1.bf16.msra.mxu1 %v4655_v12  ;;  %v4585_v36 = vcombine.low %v1290_v58, %v1294_v59  ;;  %v4459_v12 = vcombine.low %v1163_v60, %v1167_v61  ;;  %v1346_v58 = vld [vmem:[#allocation16 + $0x690] sm:$0xff]  ;;  %v1219_v60 = vld [vmem:[#allocation16 + $0x298] sm:$0xff] }
 0x45b   :  { %2904 = vmatprep.subr.bf16.mxu0 %v4538_v13  ;;  %2863 = vmatprep.subr.bf16.mxu1 %v4664_v14  ;;  %v4594_v13 = vcombine.high %v1298_v9, %v1302_v10  ;;  %v1350_v59 = vld [vmem:[#allocation16 + $0x6b0] sm:$0xff]  ;;  %v1223_v61 = vld [vmem:[#allocation16 + $0x2b8] sm:$0xff] }
 0x45e   :  { %2905 = vmatpush1.bf16.msra.mxu0 %v4537_v17  ;;  %2864 = vmatpush1.bf16.msra.mxu1 %v4663_v18  ;;  %v4593_v17 = vcombine.low %v1298_v9, %v1302_v10  ;;  %v1354_v9 = vld [vmem:[#allocation16 + $0x6d0] sm:$0xff] }
 0x45f   :  { %2906 = vmatprep.subr.bf16.mxu0 %v4546_v37  ;;  %2865 = vmatprep.subr.bf16.mxu1 %v4672_v19  ;;  %v4602_v37 = vcombine.high %v1306_v56, %v1310_v15  ;;  %v4476_v19 = vcombine.high %v1179_v16, %v1183_v57  ;;  %v1358_v10 = vld [vmem:[#allocation16 + $0x6f0] sm:$0xff] }
 0x462   :  { %2907 = vmatpush1.bf16.msra.mxu0 %v4545_v23  ;;  %2866 = vmatpush1.bf16.msra.mxu1 %v4671_v52  ;;  %v4601_v23 = vcombine.low %v1306_v56, %v1310_v15  ;;  %v4475_v52 = vcombine.low %v1179_v16, %v1183_v57  ;;  %v1362_v56 = vld [vmem:[#allocation16 + $0x710] sm:$0xff]  ;;  %v1235_v16 = vld [vmem:[#allocation16 + $0x318] sm:$0xff] }
 0x463   :  { %2908 = vmatprep.subr.bf16.mxu0 %v4554_v24  ;;  %2867 = vmatprep.subr.bf16.mxu1 %v4680_v25  ;;  %v4610_v24 = vcombine.high %v1314_v20, %v1318_v21  ;;  %v4484_v25 = vcombine.high %v1187_v44, %v1191_v47  ;;  %v1366_v15 = vld [vmem:[#allocation16 + $0x730] sm:$0xff]  ;;  %v1239_v57 = vld [vmem:[#allocation16 + $0x338] sm:$0xff] }
 0x466   :  { %2909 = vmatpush1.bf16.msra.mxu0 %v4553_v30  ;;  %2868 = vmatpush1.bf16.msra.mxu1 %v4679_v31  ;;  %v4609_v30 = vcombine.low %v1314_v20, %v1318_v21  ;;  %v4483_v31 = vcombine.low %v1187_v44, %v1191_v47  ;;  %v1370_v20 = vld [vmem:[#allocation16 + $0x750] sm:$0xff]  ;;  %v1243_v44 = vld [vmem:[#allocation16 + $0x358] sm:$0xff] }
 0x467   :  { %2919 = vmatprep.subr.bf16.mxu0 %v4562_v32  ;;  %2960 = vmatprep.subr.bf16.mxu1 %v4436_v33  ;;  %v4618_v32 = vcombine.high %v1322_v26, %v1326_v27  ;;  %v4492_v33 = vcombine.high %v1195_v28, %v1199_v29  ;;  %v1374_v21 = vld [vmem:[#allocation16 + $0x770] sm:$0xff]  ;;  %v1247_v47 = vld [vmem:[#allocation16 + $0x378] sm:$0xff] }
 0x469   :  { %2911 = vmatmul.mubr.bf16.vlgmr.msra.gmra.mrb[8].mxu0 %v5862_v5  ;;  %2870 = vmatmul.mubr.bf16.vlgmr.msra.gmra.mrb[16].mxu1 %v5894_v22 }
 0x46a   :  { %2920 = vmatpush1.bf16.msra.mxu0 %v4561_v51  ;;  %2951 = vmatprep.mubr.bf16.mxu0 %v5892_v45  ;;  %v4617_v51 = vcombine.low %v1322_v26, %v1326_v27  ;;  %v1378_v26 = vld [vmem:[#allocation16 + $0x790] sm:$0xff] }
 0x46b   :  { %2961 = vmatpush1.bf16.msra.mxu1 %v4435_v54  ;;  %2992 = vmatprep.mubr.bf16.mxu1 %v5857_v0  ;;  %v1171_v0 = vld [vmem:[#allocation16 + $0x118] sm:$0xff]  ;;  %v4491_v54 = vcombine.low %v1195_v28, %v1199_v29  ;;  %v1382_v27 = vld [vmem:[#allocation16 + $0x7b0] sm:$0xff] }
 0x46c   :  { %2921 = vmatprep.subr.bf16.mxu0 %v4570_v39  ;;  %2962 = vmatprep.subr.bf16.mxu1 %v4444_v40  ;;  %v4468_v14 = vcombine.high %v1171_v0, %v1175_v11  ;;  %v4467_v18 = vcombine.low %v1171_v0, %v1175_v11  ;;  %v4626_v39 = vcombine.high %v1330_v34, %v1334_v35  ;;  %v1227_v0 = vld [vmem:[#allocation16 + $0x2d8] sm:$0xff] }
 0x46d   :  { %v4500_v40 = vcombine.high %v1203_v38, %v1207_v50  ;;  %v1231_v11 = vld [vmem:[#allocation16 + $0x2f8] sm:$0xff] }
 0x46e   :  { %2922 = vmatpush1.bf16.msra.mxu0 %v4569_v48  ;;  %v4625_v48 = vcombine.low %v1330_v34, %v1334_v35  ;;  %v1251_v28 = vld [vmem:[#allocation16 + $0x398] sm:$0xff]  ;;  %v1386_v34 = vld [vmem:[#allocation16 + $0x7d0] sm:$0xff] }
 0x46f   :  { %2963 = vmatpush1.bf16.msra.mxu1 %v4443_v49  ;;  %2923 = vmatprep.subr.bf16.mxu0 %v4578_v53  ;;  %v4499_v49 = vcombine.low %v1203_v38, %v1207_v50  ;;  %v4634_v53 = vcombine.high %v1338_v41, %v1342_v42  ;;  %v1255_v29 = vld [vmem:[#allocation16 + $0x3b8] sm:$0xff]  ;;  %v1390_v35 = vld [vmem:[#allocation16 + $0x7f0] sm:$0xff] }
 0x470   :  { %2964 = vmatprep.subr.bf16.mxu1 %v4452_v55  ;;  %v4508_v55 = vcombine.high %v1211_v43, %v1215_v46  ;;  %v1259_v38 = vld [vmem:[#allocation16 + $0x3d8] sm:$0xff] }
 0x471   :  { %v1263_v50 = vld [vmem:[#allocation16 + $0x3f8] sm:$0xff] }
 0x472   :  { %2924 = vmatpush1.bf16.msra.mxu0 %v4577_v62  ;;  %v4633_v62 = vcombine.low %v1338_v41, %v1342_v42  ;;  %v1267_v41 = vld [vmem:[#allocation16 + $0x418] sm:$0xff] }
 0x473   :  { %2965 = vmatpush1.bf16.msra.mxu1 %v4451_v6  ;;  %2925 = vmatprep.subr.bf16.mxu0 %v4586_v7  ;;  %v4507_v6 = vcombine.low %v1211_v43, %v1215_v46  ;;  %v4642_v7 = vcombine.high %v1346_v58, %v1350_v59  ;;  %v1271_v42 = vld [vmem:[#allocation16 + $0x438] sm:$0xff]  ;;  %v4681_v43 = vcombine.low %v1386_v34, %v1390_v35 }
 0x474   :  { %2966 = vmatprep.subr.bf16.mxu1 %v4460_v8  ;;  %v4516_v8 = vcombine.high %v1219_v60, %v1223_v61  ;;  %v4555_v46 = vcombine.low %v1259_v38, %v1263_v50 }
 0x476   :  { %2926 = vmatpush1.bf16.msra.mxu0 %v4585_v36  ;;  %v4641_v36 = vcombine.low %v1346_v58, %v1350_v59  ;;  %v5027_v58 = vld [vmem:[#allocation19] ss:$8 sps:$4 sm:$0xff]   ;;  %v4563_v59 = vcombine.low %v1267_v41, %v1271_v42 }
 0x477   :  { %2967 = vmatpush1.bf16.msra.mxu1 %v4459_v12  ;;  %2927 = vmatprep.subr.bf16.mxu0 %v4594_v13  ;;  %v4515_v12 = vcombine.low %v1219_v60, %v1223_v61  ;;  %v4650_v13 = vcombine.high %v1354_v9, %v1358_v10  ;;  %v5032_v61 = vld [vmem:[#allocation19 + $0x14] ss:$8 sps:$4 sm:$0xff]  }
 0x478   :  { %2968 = vmatprep.subr.bf16.mxu1 %v4468_v14  ;;  %v4524_v14 = vcombine.high %v1227_v0, %v1231_v11 }
 0x47a   :  { %2928 = vmatpush1.bf16.msra.mxu0 %v4593_v17  ;;  %v4649_v17 = vcombine.low %v1354_v9, %v1358_v10  ;;  %v5035_v9 = vld [vmem:[#allocation19 + $0x24] ss:$8 sps:$4 sm:$0xff]  }
 0x47b   :  { %2969 = vmatpush1.bf16.msra.mxu1 %v4467_v18  ;;  %2929 = vmatprep.subr.bf16.mxu0 %v4602_v37  ;;  %v4523_v18 = vcombine.low %v1227_v0, %v1231_v11  ;;  %v4658_v37 = vcombine.high %v1362_v56, %v1366_v15  ;;  %v1291_v0 = vld [vmem:[#allocation16 + $0x4d8] sm:$0xff] }
 0x47c   :  { %2970 = vmatprep.subr.bf16.mxu1 %v4476_v19  ;;  %v4532_v19 = vcombine.high %v1235_v16, %v1239_v57  ;;  %v1295_v11 = vld [vmem:[#allocation16 + $0x4f8] sm:$0xff] }
 0x47e   :  { %2930 = vmatpush1.bf16.msra.mxu0 %v4601_v23  ;;  %v4657_v23 = vcombine.low %v1362_v56, %v1366_v15  ;;  %v1303_v56 = vld [vmem:[#allocation16 + $0x538] sm:$0xff] }
 0x47f   :  { %2971 = vmatpush1.bf16.msra.mxu1 %v4475_v52  ;;  %2931 = vmatprep.subr.bf16.mxu0 %v4610_v24  ;;  %v4531_v52 = vcombine.low %v1235_v16, %v1239_v57  ;;  %v4666_v24 = vcombine.high %v1370_v20, %v1374_v21  ;;  %v5036_v15 = vld [vmem:[#allocation19 + $0x30] ss:$8 sps:$4 sm:$0xff]   ;;  %v5041_v16 = vld [vmem:[#allocation19 + $0x44] ss:$8 sps:$4 sm:$0xff]  }
 0x480   :  { %2972 = vmatprep.subr.bf16.mxu1 %v4484_v25  ;;  %v4540_v25 = vcombine.high %v1243_v44, %v1247_v47 }
 0x482   :  { %2932 = vmatpush1.bf16.msra.mxu0 %v4609_v30  ;;  %v4665_v30 = vcombine.low %v1370_v20, %v1374_v21  ;;  %v5044_v20 = vld [vmem:[#allocation19 + $0x54] ss:$8 sps:$4 sm:$0xff]  }
 0x483   :  { %2973 = vmatpush1.bf16.msra.mxu1 %v4483_v31  ;;  %2933 = vmatprep.subr.bf16.mxu0 %v4618_v32  ;;  %v4539_v31 = vcombine.low %v1243_v44, %v1247_v47  ;;  %v4674_v32 = vcombine.high %v1378_v26, %v1382_v27  ;;  %v1315_v44 = vld [vmem:[#allocation16 + $0x598] sm:$0xff] }
 0x484   :  { %2974 = vmatprep.subr.bf16.mxu1 %v4492_v33  ;;  %v4548_v33 = vcombine.high %v1251_v28, %v1255_v29  ;;  %v1319_v47 = vld [vmem:[#allocation16 + $0x5b8] sm:$0xff] }
 0x486   :  { %2934 = vmatpush1.bf16.msra.mxu0 %v4617_v51  ;;  %v4673_v51 = vcombine.low %v1378_v26, %v1382_v27  ;;  %v4612_v26 = vcombine.high %v1315_v44, %v1319_v47 }
 0x487   :  { %2975 = vmatpush1.bf16.msra.mxu1 %v4491_v54  ;;  %2935 = vmatprep.subr.bf16.mxu0 %v4626_v39  ;;  %v4547_v54 = vcombine.low %v1251_v28, %v1255_v29  ;;  %v4682_v39 = vcombine.high %v1386_v34, %v1390_v35  ;;  %v1323_v28 = vld [vmem:[#allocation16 + $0x5d8] sm:$0xff] }
 0x488   :  { %2976 = vmatprep.subr.bf16.mxu1 %v4500_v40  ;;  %v4556_v40 = vcombine.high %v1259_v38, %v1263_v50  ;;  %v1327_v29 = vld [vmem:[#allocation16 + $0x5f8] sm:$0xff] }
 0x489   :  { %v5050_v34 = vld [vmem:[#allocation19 + $0x74] ss:$8 sps:$4 sm:$0xff]   ;;  %v4620_v35 = vcombine.high %v1323_v28, %v1327_v29 }
 0x48a   :  { %2936 = vmatpush1.bf16.msra.mxu0 %v4625_v48  ;;  %v5029_v48 = vld [vmem:[#allocation19 + $0x4] ss:$8 sps:$4 sm:$0xff]   ;;  %v1331_v38 = vld [vmem:[#allocation16 + $0x618] sm:$0xff] }
 0x48b   :  { %2977 = vmatpush1.bf16.msra.mxu1 %v4499_v49  ;;  %2937 = vmatprep.subr.bf16.mxu0 %v4634_v53  ;;  %v4564_v49 = vcombine.high %v1267_v41, %v1271_v42  ;;  %v1275_v53 = vld [vmem:[#allocation16 + $0x458] sm:$0xff] }
 0x48c   :  { %2978 = vmatprep.subr.bf16.mxu1 %v4508_v55  ;;  %v1279_v55 = vld [vmem:[#allocation16 + $0x478] sm:$0xff] }
 0x48d   :  { %v4572_v60 = vcombine.high %v1275_v53, %v1279_v55  ;;  %v1335_v50 = vld [vmem:[#allocation16 + $0x638] sm:$0xff] }
 0x48e   :  { %2938 = vmatpush1.bf16.msra.mxu0 %v4633_v62  ;;  %v1283_v62 = vld [vmem:[#allocation16 + $0x498] sm:$0xff] }
 0x48f   :  { %2979 = vmatpush1.bf16.msra.mxu1 %v4507_v6  ;;  %2939 = vmatprep.subr.bf16.mxu0 %v4642_v7  ;;  %v1287_v6 = vld [vmem:[#allocation16 + $0x4b8] sm:$0xff] }
 0x490   :  { %2980 = vmatprep.subr.bf16.mxu1 %v4516_v8  ;;  %v5030_v7 = vld [vmem:[#allocation19 + $0x10] ss:$8 sps:$4 sm:$0xff]   ;;  %v4571_v8 = vcombine.low %v1275_v53, %v1279_v55  ;;  %v4580_v10 = vcombine.high %v1283_v62, %v1287_v6 }
 0x491   :  { %v1339_v41 = vld [vmem:[#allocation16 + $0x658] sm:$0xff] }
 0x492   :  { %2940 = vmatpush1.bf16.msra.mxu0 %v4641_v36  ;;  %v5033_v36 = vld [vmem:[#allocation19 + $0x20] ss:$8 sps:$4 sm:$0xff]   ;;  %v1343_v42 = vld [vmem:[#allocation16 + $0x678] sm:$0xff] }
 0x493   :  { %2981 = vmatpush1.bf16.msra.mxu1 %v4515_v12  ;;  %2941 = vmatprep.subr.bf16.mxu0 %v4650_v13  ;;  %v4579_v12 = vcombine.low %v1283_v62, %v1287_v6  ;;  %v5038_v13 = vld [vmem:[#allocation19 + $0x34] ss:$8 sps:$4 sm:$0xff]  }
 0x494   :  { %2982 = vmatprep.subr.bf16.mxu1 %v4524_v14  ;;  %v1299_v14 = vld [vmem:[#allocation16 + $0x518] sm:$0xff] }
 0x495   :  { %v4596_v57 = vcombine.high %v1299_v14, %v1303_v56  ;;  %v1347_v53 = vld [vmem:[#allocation16 + $0x698] sm:$0xff] }
 0x496   :  { %2942 = vmatpush1.bf16.msra.mxu0 %v4649_v17  ;;  %v1307_v17 = vld [vmem:[#allocation16 + $0x558] sm:$0xff] }
 0x497   :  { %2983 = vmatpush1.bf16.msra.mxu1 %v4523_v18  ;;  %2943 = vmatprep.subr.bf16.mxu0 %v4658_v37  ;;  %v1311_v18 = vld [vmem:[#allocation16 + $0x578] sm:$0xff]  ;;  %v5039_v37 = vld [vmem:[#allocation19 + $0x40] ss:$8 sps:$4 sm:$0xff]  }
 0x498   :  { %2984 = vmatprep.subr.bf16.mxu1 %v4532_v19  ;;  %v4595_v19 = vcombine.low %v1299_v14, %v1303_v56  ;;  %v4604_v21 = vcombine.high %v1307_v17, %v1311_v18  ;;  %v1351_v55 = vld [vmem:[#allocation16 + $0x6b8] sm:$0xff] }
 0x499   :  { %v1355_v62 = vld [vmem:[#allocation16 + $0x6d8] sm:$0xff] }
 0x49a   :  { %2944 = vmatpush1.bf16.msra.mxu0 %v4657_v23  ;;  %v5042_v23 = vld [vmem:[#allocation19 + $0x50] ss:$8 sps:$4 sm:$0xff]  }
 0x49b   :  { %2985 = vmatpush1.bf16.msra.mxu1 %v4531_v52  ;;  %2945 = vmatprep.subr.bf16.mxu0 %v4666_v24  ;;  %v4603_v52 = vcombine.low %v1307_v17, %v1311_v18  ;;  %v5047_v24 = vld [vmem:[#allocation19 + $0x64] ss:$8 sps:$4 sm:$0xff]   ;;  %v1359_v6 = vld [vmem:[#allocation16 + $0x6f8] sm:$0xff] }
 0x49c   :  { %2986 = vmatprep.subr.bf16.mxu1 %v4540_v25  ;;  %v1371_v14 = vld [vmem:[#allocation16 + $0x758] sm:$0xff] }
 0x49d   :  { %v1375_v56 = vld [vmem:[#allocation16 + $0x778] sm:$0xff] }
 0x49e   :  { %2946 = vmatpush1.bf16.msra.mxu0 %v4665_v30  ;;  %v1379_v17 = vld [vmem:[#allocation16 + $0x798] sm:$0xff] }
 0x49f   :  { %2987 = vmatpush1.bf16.msra.mxu1 %v4539_v31  ;;  %2947 = vmatprep.subr.bf16.mxu0 %v4674_v32  ;;  %v5045_v31 = vld [vmem:[#allocation19 + $0x60] ss:$8 sps:$4 sm:$0xff]   ;;  %v1383_v18 = vld [vmem:[#allocation16 + $0x7b8] sm:$0xff] }
 0x4a0   :  { %2988 = vmatprep.subr.bf16.mxu1 %v4548_v33  ;;  %v4611_v33 = vcombine.low %v1315_v44, %v1319_v47  ;;  %v1387_v44 = vld [vmem:[#allocation16 + $0x7d8] sm:$0xff] }
 0x4a1   :  { %v1391_v47 = vld [vmem:[#allocation16 + $0x7f8] sm:$0xff] }
 0x4a2   :  { %2948 = vmatpush1.bf16.msra.mxu0 %v4673_v51  ;;  %v5048_v51 = vld [vmem:[#allocation19 + $0x70] ss:$8 sps:$4 sm:$0xff]  }
 0x4a3   :  { %2989 = vmatpush1.bf16.msra.mxu1 %v4547_v54  ;;  %2949 = vmatprep.subr.bf16.mxu0 %v4682_v39  ;;  %v4619_v54 = vcombine.low %v1323_v28, %v1327_v29  ;;  %v5053_v39 = vld [vmem:[#allocation19 + $0x84] ss:$8 sps:$4 sm:$0xff]   ;;  %v5072_v28 = vld [vmem:[#allocation19 + $0xf0] ss:$8 sps:$4 sm:$0xff]   ;;  %v4683_v29 = vcombine.low %v1387_v44, %v1391_v47 }
 0x4a4   :  { %2990 = vmatprep.subr.bf16.mxu1 %v4556_v40  ;;  %v4628_v40 = vcombine.high %v1331_v38, %v1335_v50 }
 0x4a6   :  { %2950 = vmatpush1.bf16.msra.mxu0 %v4681_v43  ;;  %v5051_v43 = vld [vmem:[#allocation19 + $0x80] ss:$8 sps:$4 sm:$0xff]  }
 0x4a7   :  { %2991 = vmatpush1.bf16.msra.mxu1 %v4555_v46  ;;  %4166 = vmatprep.subr.bf16.mxu0 %v5029_v48  ;;  %v4627_v46 = vcombine.low %v1331_v38, %v1335_v50  ;;  %v5056_v48 = vld [vmem:[#allocation19 + $0x94] ss:$8 sps:$4 sm:$0xff]  }
 0x4a8   :  { %3001 = vmatprep.subr.bf16.mxu1 %v4564_v49  ;;  %v4636_v49 = vcombine.high %v1339_v41, %v1343_v42 }
 0x4a9   :  { %2952 = vmatmul.mubr.bf16.vlgmr.msra.gmra.mrb[8].mxu0 %v5894_v22 }
 0x4aa   :  { %2993 = vmatmul.mubr.bf16.vlgmr.msra.gmra.mrb[20].mxu1 %v5862_v5  ;;  %4167 = vmatpush1.bf16.msra.mxu0 %v5027_v58  ;;  %v4588_v5 = vcombine.high %v1291_v0, %v1295_v11  ;;  %v5054_v58 = vld [vmem:[#allocation19 + $0x90] ss:$8 sps:$4 sm:$0xff]  }
 0x4ab   :  { %3002 = vmatpush1.bf16.msra.mxu1 %v4563_v59  ;;  %3033 = vmatprep.mubr.bf16.mxu1 %v5892_v45  ;;  %v4587_v45 = vcombine.low %v1291_v0, %v1295_v11  ;;  %v4635_v59 = vcombine.low %v1339_v41, %v1343_v42  ;;  %v1363_v0 = vld [vmem:[#allocation16 + $0x718] sm:$0xff] }
 0x4ac   :  { %3003 = vmatprep.subr.bf16.mxu1 %v4572_v60  ;;  %4168 = vmatprep.subr.bf16.mxu0 %v5032_v61  ;;  %v5059_v60 = vld [vmem:[#allocation19 + $0xa4] ss:$8 sps:$4 sm:$0xff]   ;;  %v4644_v61 = vcombine.high %v1347_v53, %v1351_v55  ;;  %v1367_v11 = vld [vmem:[#allocation16 + $0x738] sm:$0xff] }
 0x4ae   :  { %4169 = vmatpush1.bf16.msra.mxu0 %v5030_v7  ;;  %v5057_v7 = vld [vmem:[#allocation19 + $0xa0] ss:$8 sps:$4 sm:$0xff]  }
 0x4af   :  { %3004 = vmatpush1.bf16.msra.mxu1 %v4571_v8  ;;  %4170 = vmatprep.subr.bf16.mxu0 %v5035_v9  ;;  %v4643_v8 = vcombine.low %v1347_v53, %v1351_v55  ;;  %v5062_v9 = vld [vmem:[#allocation19 + $0xb4] ss:$8 sps:$4 sm:$0xff]  }
 0x4b0   :  { %3005 = vmatprep.subr.bf16.mxu1 %v4580_v10  ;;  %v4652_v10 = vcombine.high %v1355_v62, %v1359_v6 }
 0x4b2   :  { %4171 = vmatpush1.bf16.msra.mxu0 %v5033_v36  ;;  %v5060_v36 = vld [vmem:[#allocation19 + $0xb0] ss:$8 sps:$4 sm:$0xff]  }
 0x4b3   :  { %3006 = vmatpush1.bf16.msra.mxu1 %v4579_v12  ;;  %4172 = vmatprep.subr.bf16.mxu0 %v5038_v13  ;;  %v4651_v12 = vcombine.low %v1355_v62, %v1359_v6  ;;  %v5065_v13 = vld [vmem:[#allocation19 + $0xc4] ss:$8 sps:$4 sm:$0xff]  }
 0x4b4   :  { %3007 = vmatprep.subr.bf16.mxu1 %v4588_v5  ;;  %v4660_v5 = vcombine.high %v1363_v0, %v1367_v11 }
 0x4b6   :  { %4173 = vmatpush1.bf16.msra.mxu0 %v5036_v15  ;;  %v5063_v15 = vld [vmem:[#allocation19 + $0xc0] ss:$8 sps:$4 sm:$0xff]  }
 0x4b7   :  { %3008 = vmatpush1.bf16.msra.mxu1 %v4587_v45  ;;  %4174 = vmatprep.subr.bf16.mxu0 %v5041_v16  ;;  %v4659_v45 = vcombine.low %v1363_v0, %v1367_v11  ;;  %v5068_v16 = vld [vmem:[#allocation19 + $0xd4] ss:$8 sps:$4 sm:$0xff]  }
 0x4b8   :  { %3009 = vmatprep.subr.bf16.mxu1 %v4596_v57  ;;  %v4668_v57 = vcombine.high %v1371_v14, %v1375_v56 }
 0x4ba   :  { %4175 = vmatpush1.bf16.msra.mxu0 %v5039_v37  ;;  %v5066_v37 = vld [vmem:[#allocation19 + $0xd0] ss:$8 sps:$4 sm:$0xff]  }
 0x4bb   :  { %3010 = vmatpush1.bf16.msra.mxu1 %v4595_v19  ;;  %4176 = vmatprep.subr.bf16.mxu0 %v5044_v20  ;;  %v4667_v19 = vcombine.low %v1371_v14, %v1375_v56  ;;  %v5071_v20 = vld [vmem:[#allocation19 + $0xe4] ss:$8 sps:$4 sm:$0xff]  }
 0x4bc   :  { %v5911_v25 = vpop.f32.mrb[12].mxu1  ;;  %3011 = vmatprep.subr.bf16.mxu1 %v4604_v21  ;;  %v4676_v21 = vcombine.high %v1379_v17, %v1383_v18 }
 0x4bd   :  { %v5913_v27 = vpop.f32.mrb[13].mxu1 }
 0x4be   :  { %v2752_v30 = vpop.f32.mrb[14].mxu1  ;;  %4177 = vmatpush1.bf16.msra.mxu0 %v5042_v23  ;;  %v5069_v23 = vld [vmem:[#allocation19 + $0xe0] ss:$8 sps:$4 sm:$0xff]  }
 0x4bf   :  { %3012 = vmatpush1.bf16.msra.mxu1 %v4603_v52  ;;  %v2753_v32 = vpop.f32.mrb[15].mxu1  ;;  %4178 = vmatprep.subr.bf16.mxu0 %v5047_v24  ;;  %v4675_v52 = vcombine.low %v1379_v17, %v1383_v18  ;;  %v5074_v24 = vld [vmem:[#allocation19 + $0xf4] ss:$8 sps:$4 sm:$0xff]   ;;  %v5077_v30 = vld [vmem:[#allocation19 + $0x104] ss:$8 sps:$4 sm:$0xff]  }
 0x4c0   :  { %3013 = vmatprep.subr.bf16.mxu1 %v4612_v26  ;;  %v4684_v26 = vcombine.high %v1387_v44, %v1391_v47  ;;  %v5930_v18 = vld [vmem:[%s6011_s13] sm:$0xff] }
 0x4c2   :  { %4179 = vmatpush1.bf16.msra.mxu0 %v5045_v31  ;;  %v5919_v31 = vld [vmem:[%s6010_s12] sm:$0xff] }
 0x4c3   :  { %3014 = vmatpush1.bf16.msra.mxu1 %v4611_v33  ;;  %4180 = vmatprep.subr.bf16.mxu0 %v5050_v34  ;;  %v1397_v32 = vrot.slane %v5919_v31, %v5802_v2  ;;  %v1401_v33 = vrot.slane %v5919_v31, %v5805_v4 }
 0x4c4   :  { %3015 = vmatprep.subr.bf16.mxu1 %v4620_v35 }
 0x4c5   :  { %v2749_v34 = vadd.f32 %v5911_v25, %v1397_v32  ;;  %v2751_v35 = vadd.f32 %v5913_v27, %v1401_v33 }
 0x4c6   :  { %4181 = vmatpush1.bf16.msra.mxu0 %v5048_v51 }
 0x4c7   :  { %3016 = vmatpush1.bf16.msra.mxu1 %v4619_v54  ;;  %4182 = vmatprep.subr.bf16.mxu0 %v5053_v39 }
 0x4c8   :  { %3017 = vmatprep.subr.bf16.mxu1 %v4628_v40 }
 0x4ca   :  { %4183 = vmatpush1.bf16.msra.mxu0 %v5051_v43 }
 0x4cb   :  { %3018 = vmatpush1.bf16.msra.mxu1 %v4627_v46  ;;  %4184 = vmatprep.subr.bf16.mxu0 %v5056_v48 }
 0x4cc   :  { %3019 = vmatprep.subr.bf16.mxu1 %v4636_v49 }
 0x4ce   :  { %4185 = vmatpush1.bf16.msra.mxu0 %v5054_v58 }
 0x4cf   :  { %3020 = vmatpush1.bf16.msra.mxu1 %v4635_v59  ;;  %4186 = vmatprep.subr.bf16.mxu0 %v5059_v60 }
 0x4d0   :  { %3021 = vmatprep.subr.bf16.mxu1 %v4644_v61 }
 0x4d2   :  { %4187 = vmatpush1.bf16.msra.mxu0 %v5057_v7 }
 0x4d3   :  { %3022 = vmatpush1.bf16.msra.mxu1 %v4643_v8  ;;  %4188 = vmatprep.subr.bf16.mxu0 %v5062_v9 }
 0x4d4   :  { %3023 = vmatprep.subr.bf16.mxu1 %v4652_v10 }
 0x4d6   :  { %4189 = vmatpush1.bf16.msra.mxu0 %v5060_v36 }
 0x4d7   :  { %3024 = vmatpush1.bf16.msra.mxu1 %v4651_v12  ;;  %4190 = vmatprep.subr.bf16.mxu0 %v5065_v13 }
 0x4d8   :  { %3025 = vmatprep.subr.bf16.mxu1 %v4660_v5 }
 0x4da   :  { %4191 = vmatpush1.bf16.msra.mxu0 %v5063_v15 }
 0x4db   :  { %3026 = vmatpush1.bf16.msra.mxu1 %v4659_v45  ;;  %4192 = vmatprep.subr.bf16.mxu0 %v5068_v16 }
 0x4dc   :  { %3027 = vmatprep.subr.bf16.mxu1 %v4668_v57 }
 0x4de   :  { %4193 = vmatpush1.bf16.msra.mxu0 %v5066_v37  ;;  %v5932_v37 = vld [vmem:[#allocation17] sm:$0xff] }
 0x4df   :  { %3028 = vmatpush1.bf16.msra.mxu1 %v4667_v19  ;;  %4194 = vmatprep.subr.bf16.mxu0 %v5071_v20  ;;  %v3200_v19 = vrot.slane %v5930_v18, %v5802_v2 }
 0x4e0   :  { %3029 = vmatprep.subr.bf16.mxu1 %v4676_v21  ;;  %v3204_v21 = vrot.slane %v5930_v18, %v5805_v4 }
 0x4e2   :  { %4195 = vmatpush1.bf16.msra.mxu0 %v5069_v23  ;;  %v3249_v23 = vrot.slane %v5932_v37, %v5802_v2 }
 0x4e3   :  { %3030 = vmatpush1.bf16.msra.mxu1 %v4675_v52  ;;  %4196 = vmatprep.subr.bf16.mxu0 %v5074_v24  ;;  %v3253_v24 = vrot.slane %v5932_v37, %v5805_v4 }
 0x4e4   :  { %3031 = vmatprep.subr.bf16.mxu1 %v4684_v26 }
 0x4e6   :  { %4197 = vmatpush1.bf16.msra.mxu0 %v5072_v28 }
 0x4e7   :  { %3032 = vmatpush1.bf16.msra.mxu1 %v4683_v29  ;;  %4207 = vmatprep.subr.bf16.mxu0 %v5077_v30 }
 0x4ea   :  { %3034 = vmatmul.mubr.bf16.vlgmr.msra.gmra.mrb[20].mxu1 %v5894_v22 }
 0x4fc   :  { %v2789_v38 = vpop.f32.mrb[4].mxu0 }
 0x4fd   :  { %v2790_v50 = vadd.f32 %v2789_v38, %v2749_v34  ;;  %v2791_v51 = vpop.f32.mrb[5].mxu0 }
 0x4fe   :  { %v2792_v54 = vadd.f32 %v2791_v51, %v2751_v35  ;;  %v2793_v22 = vpop.f32.mrb[6].mxu0 }
 0x4ff   :  { %v3044_v39 = vrot.slane %v2790_v50, 4  ;;  %v2794_v40 = vpop.f32.mrb[7].mxu0  ;;  %v1405_v22 = vrot.slane %v5919_v31, %v5855_v63 }
 0x500   :  { %v3050_v41 = vrot.slane %v2792_v54, 4  ;;  %v1409_v40 = vrot.slane %v5919_v31, %v5860_v3 }
 0x501   :  { %v3045_v42 = vadd.f32 %v3044_v39, %v2790_v50  ;;  %v5078_v39 = vld [vmem:[#allocation19 + $0x110] ss:$8 sps:$4 sm:$0xff]  }
 0x502   :  { %v3051_v43 = vadd.f32 %v3050_v41, %v2792_v54  ;;  %v5083_v41 = vld [vmem:[#allocation19 + $0x124] ss:$8 sps:$4 sm:$0xff]  }
 0x503   :  { %v3046_v46 = vrot.slane %v3045_v42, 2 }
 0x504   :  { %v3052_v48 = vrot.slane %v3051_v43, 2 }
 0x505   :  { %v3047_v49 = vadd.f32 %v3046_v46, %v3045_v42 }
 0x506   :  { %v3053_v53 = vadd.f32 %v3052_v48, %v3051_v43 }
 0x507   :  { %v3048_v55 = vrot.slane %v3047_v49, 1 }
 0x508   :  { %v3054_v58 = vrot.slane %v3053_v53, 1 }
 0x509   :  { %v3049_v59 = vadd.f32 %v3048_v55, %v3047_v49 }
 0x50a   :  { %v3055_v25 = vadd.f32 %v3054_v58, %v3053_v53  ;;  %v5081_v53 = vld [vmem:[#allocation19 + $0x120] ss:$8 sps:$4 sm:$0xff]  }
 0x50b   :  { %v3092_v60 = vmul.f32 0.125, %v3049_v59  ;;  %v5086_v59 = vld [vmem:[#allocation19 + $0x134] ss:$8 sps:$4 sm:$0xff]  }
 0x50c   :  { %v3093_v27 = vmul.f32 0.125, %v3055_v25 }
 0x50d   :  { %v3100_v61 = vsub.f32 %v2790_v50, %v3092_v60  ;;  %v5075_v50 = vld [vmem:[#allocation19 + $0x100] ss:$8 sps:$4 sm:$0xff]  }
 0x50e   :  { %v3101_v62 = vsub.f32 %v2792_v54, %v3093_v27  ;;  %v5080_v54 = vld [vmem:[#allocation19 + $0x114] ss:$8 sps:$4 sm:$0xff]  }
 0x50f   :  { %v3108_v6 = vmul.f32 %v3100_v61, %v3100_v61 }
 0x510   :  { %v3109_v7 = vmul.f32 %v3101_v62, %v3101_v62 }
 0x511   :  { %v3116_v8 = vrot.slane %v3108_v6, 4 }
 0x512   :  { %v3122_v9 = vrot.slane %v3109_v7, 4 }
 0x513   :  { %v3117_v10 = vadd.f32 %v3116_v8, %v3108_v6  ;;  %v5089_v6 = vld [vmem:[#allocation19 + $0x144] ss:$8 sps:$4 sm:$0xff]  }
 0x514   :  { %v3123_v0 = vadd.f32 %v3122_v9, %v3109_v7 }
 0x515   :  { %v3118_v11 = vrot.slane %v3117_v10, 2 }
 0x516   :  { %v3124_v36 = vrot.slane %v3123_v0, 2 }
 0x517   :  { %v3119_v12 = vadd.f32 %v3118_v11, %v3117_v10  ;;  %v5087_v10 = vld [vmem:[#allocation19 + $0x140] ss:$8 sps:$4 sm:$0xff]   ;;  %v5092_v11 = vld [vmem:[#allocation19 + $0x154] ss:$8 sps:$4 sm:$0xff]  }
 0x518   :  { %v3125_v13 = vadd.f32 %v3124_v36, %v3123_v0 }
 0x519   :  { %v3120_v5 = vrot.slane %v3119_v12, 1 }
 0x51a   :  { %v3126_v14 = vrot.slane %v3125_v13, 1 }
 0x51b   :  { %v3121_v56 = vadd.f32 %v3120_v5, %v3119_v12  ;;  %v5090_v5 = vld [vmem:[#allocation19 + $0x150] ss:$8 sps:$4 sm:$0xff]  }
 0x51c   :  { %v3127_v15 = vadd.f32 %v3126_v14, %v3125_v13 }
 0x51d   :  { %v3164_v45 = vmul.f32 0.125, %v3121_v56  ;;  %v5095_v56 = vld [vmem:[#allocation19 + $0x164] ss:$8 sps:$4 sm:$0xff]  }
 0x51e   :  { %v3165_v16 = vmul.f32 0.125, %v3127_v15 }
 0x51f   :  { %v3172_v57 = vadd.f32 0.8, %v3164_v45 }
 0x520   :  { %v3173_v17 = vadd.f32 0.8, %v3165_v16 }
 0x521   :  { %5231 = vrsqrt.f32 %v3172_v57  ;;  %v5093_v57 = vld [vmem:[#allocation19 + $0x160] ss:$8 sps:$4 sm:$0xff]  }
 0x522   :  { %5233 = vrsqrt.f32 %v3173_v17 }
 0x52b   :  { %v5232_v20 = vpop.eup %5231 }
 0x52c   :  { %v5234_v44 = vpop.eup %5233  ;;  %v3188_v47 = vmul.f32 %v5232_v20, %v3100_v61  ;;  %v5084_v61 = vld [vmem:[#allocation19 + $0x130] ss:$8 sps:$4 sm:$0xff]  }
 0x52d   :  { %v3189_v52 = vmul.f32 %v5234_v44, %v3101_v62 }
 0x52e   :  { %v3237_v26 = vmul.f32 %v3200_v19, %v3188_v47  ;;  %v5098_v19 = vld [vmem:[#allocation19 + $0x174] ss:$8 sps:$4 sm:$0xff]   ;;  %v5096_v47 = vld [vmem:[#allocation19 + $0x170] ss:$8 sps:$4 sm:$0xff]  }
 0x52f   :  { %v3238_v28 = vmul.f32 %v3204_v21, %v3189_v52  ;;  %v5101_v52 = vld [vmem:[#allocation19 + $0x184] ss:$8 sps:$4 sm:$0xff]  }
 0x530   :  { %v3286_v29 = vadd.f32 %v3249_v23, %v3237_v26 }
 0x531   :  { %v3287_v30 = vadd.f32 %v3253_v24, %v3238_v28 }
 0x532   :  { %vm3294_vm9 = vcmp.ge.f32.partialorder %v3286_v29, 0.0  ;;  %v3302_v32 = vmul.f32 0.01, %v3286_v29 }
 0x533   :  { %vm3295_vm10 = vcmp.ge.f32.partialorder %v3287_v30, 0.0  ;;  %v3303_v33 = vmul.f32 0.01, %v3287_v30 }
 0x534   :  { %v3310_v34 = vsel %vm3294_vm9, %v3286_v29, %v3302_v32  ;;  %v5099_v29 = vld [vmem:[#allocation19 + $0x180] ss:$8 sps:$4 sm:$0xff]   ;;  %v5104_v32 = vld [vmem:[#allocation19 + $0x194] ss:$8 sps:$4 sm:$0xff]  }
 0x535   :  { %v3311_v35 = vsel %vm3295_vm10, %v3287_v30, %v3303_v33  ;;  %v4829_v51 = vpack.c.bf16 %v3310_v34, %v3310_v34 }
 0x536   :  { %v4830_v38 = vpack.c.bf16 %v3311_v35, %v3311_v35 }
 0x538   :  { %4198 = vmatprep.mubr.bf16.mxu0 %v4830_v38  ;;  %v5102_v38 = vld [vmem:[#allocation19 + $0x190] ss:$8 sps:$4 sm:$0xff]  }
 0x539   :  { %4199 = vmatmul.mubr.bf16.vlgmr.msra.gmra.mrb[12].mxu0 %v4829_v51  ;;  %v5107_v51 = vld [vmem:[#allocation19 + $0x1a4] ss:$8 sps:$4 sm:$0xff]  }
 0x53a   :  { %4208 = vmatpush1.bf16.msra.mxu0 %v5075_v50 }
 0x53b   :  { %4209 = vmatprep.subr.bf16.mxu0 %v5080_v54 }
 0x53c   :  { %v2871_v42 = vpop.f32.mrb[16].mxu1 }
 0x53d   :  { %v4852_v43 = vadd.f32 %v2871_v42, %v1405_v22  ;;  %v2873_v46 = vpop.f32.mrb[17].mxu1  ;;  %v5110_v42 = vld [vmem:[#allocation19 + $0x1b4] ss:$8 sps:$4 sm:$0xff]  }
 0x53e   :  { %v4853_v48 = vadd.f32 %v2873_v46, %v1409_v40  ;;  %4210 = vmatpush1.bf16.msra.mxu0 %v5078_v39  ;;  %v2875_v49 = vpop.f32.mrb[18].mxu1  ;;  %v5105_v40 = vld [vmem:[#allocation19 + $0x1a0] ss:$8 sps:$4 sm:$0xff]   ;;  %v5108_v46 = vld [vmem:[#allocation19 + $0x1b0] ss:$8 sps:$4 sm:$0xff]  }
 0x53f   :  { %v3056_v55 = vrot.slane %v4852_v43, 4  ;;  %v2876_v58 = vpop.f32.mrb[19].mxu1  ;;  %4211 = vmatprep.subr.bf16.mxu0 %v5083_v41  ;;  %v5111_v49 = vld [vmem:[#allocation19 + $0x1c0] ss:$8 sps:$4 sm:$0xff]  }
 0x540   :  { %v3062_v25 = vrot.slane %v4853_v48, 4  ;;  %v5114_v58 = vld [vmem:[#allocation19 + $0x1d0] ss:$8 sps:$4 sm:$0xff]  }
 0x541   :  { %v3057_v60 = vadd.f32 %v4852_v43, %v3056_v55  ;;  %v3208_v55 = vrot.slane %v5930_v18, %v5855_v63 }
 0x542   :  { %v3063_v27 = vadd.f32 %v4853_v48, %v3062_v25  ;;  %4212 = vmatpush1.bf16.msra.mxu0 %v5081_v53  ;;  %v5116_v53 = vld [vmem:[#allocation19 + $0x1d4] ss:$8 sps:$4 sm:$0xff]   ;;  %v3212_v25 = vrot.slane %v5930_v18, %v5860_v3 }
 0x543   :  { %v3058_v62 = vrot.slane %v3057_v60, 2  ;;  %4213 = vmatprep.subr.bf16.mxu0 %v5086_v59 }
 0x544   :  { %v3064_v7 = vrot.slane %v3063_v27, 2 }
 0x545   :  { %v3059_v8 = vadd.f32 %v3058_v62, %v3057_v60  ;;  %v5119_v60 = vld [vmem:[#allocation19 + $0x1e4] ss:$8 sps:$4 sm:$0xff]   ;;  %v3257_v62 = vrot.slane %v5932_v37, %v5855_v63 }
 0x546   :  { %v3065_v9 = vadd.f32 %v3064_v7, %v3063_v27  ;;  %4214 = vmatpush1.bf16.msra.mxu0 %v5084_v61  ;;  %v3261_v7 = vrot.slane %v5932_v37, %v5860_v3  ;;  %v5125_v63 = vld [vmem:[#allocation19 + $0x204] ss:$8 sps:$4 sm:$0xff]   ;;  %v5955_v3 = vsub.s32 4, %v5799_v1 }
 0x547   :  { %v3060_v0 = vrot.slane %v3059_v8, 1  ;;  %4215 = vmatprep.subr.bf16.mxu0 %v5089_v6 }
 0x548   :  { %v3066_v36 = vrot.slane %v3065_v9, 1 }
 0x549   :  { %v3061_v12 = vadd.f32 %v3060_v0, %v3059_v8  ;;  %v5122_v0 = vld [vmem:[#allocation19 + $0x1f4] ss:$8 sps:$4 sm:$0xff]  }
 0x54a   :  { %v3067_v13 = vadd.f32 %v3066_v36, %v3065_v9  ;;  %4216 = vmatpush1.bf16.msra.mxu0 %v5087_v10  ;;  %v5117_v9 = vld [vmem:[#allocation19 + $0x1e0] ss:$8 sps:$4 sm:$0xff]  }
 0x54b   :  { %v3094_v14 = vmul.f32 0.125, %v3061_v12  ;;  %4217 = vmatprep.subr.bf16.mxu0 %v5092_v11  ;;  %v5120_v12 = vld [vmem:[#allocation19 + $0x1f0] ss:$8 sps:$4 sm:$0xff]  }
 0x54c   :  { %v3095_v15 = vmul.f32 0.125, %v3067_v13 }
 0x54d   :  { %v3102_v45 = vsub.f32 %v4852_v43, %v3094_v14 }
 0x54e   :  { %v3103_v16 = vsub.f32 %v4853_v48, %v3095_v15  ;;  %4218 = vmatpush1.bf16.msra.mxu0 %v5090_v5  ;;  %v5113_v48 = vld [vmem:[#allocation19 + $0x1c4] ss:$8 sps:$4 sm:$0xff]  }
 0x54f   :  { %v3110_v17 = vmul.f32 %v3102_v45, %v3102_v45  ;;  %4219 = vmatprep.subr.bf16.mxu0 %v5095_v56 }
 0x550   :  { %v3111_v20 = vmul.f32 %v3103_v16, %v3103_v16 }
 0x551   :  { %v3128_v21 = vrot.slane %v3110_v17, 4 }
 0x552   :  { %v3134_v44 = vrot.slane %v3111_v20, 4  ;;  %4220 = vmatpush1.bf16.msra.mxu0 %v5093_v57 }
 0x553   :  { %v3129_v23 = vadd.f32 %v3128_v21, %v3110_v17  ;;  %4221 = vmatprep.subr.bf16.mxu0 %v5098_v19  ;;  %v5128_v17 = vld [vmem:[#allocation19 + $0x214] ss:$8 sps:$4 sm:$0xff]   ;;  %v1413_v19 = vrot.slane %v5919_v31, %v5955_v3  ;;  %v5126_v21 = vld [vmem:[#allocation19 + $0x210] ss:$8 sps:$4 sm:$0xff]  }
 0x554   :  { %v3135_v24 = vadd.f32 %v3134_v44, %v3111_v20  ;;  %v5131_v44 = vld [vmem:[#allocation19 + $0x224] ss:$8 sps:$4 sm:$0xff]  }
 0x555   :  { %v3130_v26 = vrot.slane %v3129_v23, 2 }
 0x556   :  { %v3136_v28 = vrot.slane %v3135_v24, 2  ;;  %4222 = vmatpush1.bf16.msra.mxu0 %v5096_v47 }
 0x557   :  { %v3131_v30 = vadd.f32 %v3130_v26, %v3129_v23  ;;  %4223 = vmatprep.subr.bf16.mxu0 %v5101_v52 }
 0x558   :  { %v3137_v33 = vadd.f32 %v3136_v28, %v3135_v24  ;;  %v5129_v28 = vld [vmem:[#allocation19 + $0x220] ss:$8 sps:$4 sm:$0xff]  }
 0x559   :  { %v3132_v34 = vrot.slane %v3131_v30, 1 }
 0x55a   :  { %v3138_v35 = vrot.slane %v3137_v33, 1  ;;  %4224 = vmatpush1.bf16.msra.mxu0 %v5099_v29 }
 0x55b   :  { %v3133_v50 = vadd.f32 %v3132_v34, %v3131_v30  ;;  %4225 = vmatprep.subr.bf16.mxu0 %v5104_v32  ;;  %v5134_v32 = vld [vmem:[#allocation19 + $0x234] ss:$8 sps:$4 sm:$0xff]  }
 0x55c   :  { %v3139_v54 = vadd.f32 %v3138_v35, %v3137_v33 }
 0x55d   :  { %v3166_v22 = vmul.f32 0.125, %v3133_v50 }
 0x55e   :  { %v3167_v39 = vmul.f32 0.125, %v3139_v54  ;;  %4226 = vmatpush1.bf16.msra.mxu0 %v5102_v38  ;;  %v5132_v38 = vld [vmem:[#allocation19 + $0x230] ss:$8 sps:$4 sm:$0xff]  }
 0x55f   :  { %v3174_v41 = vadd.f32 0.8, %v3166_v22  ;;  %4227 = vmatprep.subr.bf16.mxu0 %v5107_v51  ;;  %v5137_v51 = vld [vmem:[#allocation19 + $0x244] ss:$8 sps:$4 sm:$0xff]  }
 0x560   :  { %v3175_v43 = vadd.f32 0.8, %v3167_v39 }
 0x561   :  { %5235 = vrsqrt.f32 %v3174_v41 }
 0x562   :  { %5237 = vrsqrt.f32 %v3175_v43  ;;  %4228 = vmatpush1.bf16.msra.mxu0 %v5105_v40  ;;  %v5135_v40 = vld [vmem:[#allocation19 + $0x240] ss:$8 sps:$4 sm:$0xff]  }
 0x563   :  { %4229 = vmatprep.subr.bf16.mxu0 %v5110_v42  ;;  %v5140_v42 = vld [vmem:[#allocation19 + $0x254] ss:$8 sps:$4 sm:$0xff]  }
 0x566   :  { %4230 = vmatpush1.bf16.msra.mxu0 %v5108_v46 }
 0x567   :  { %4231 = vmatprep.subr.bf16.mxu0 %v5113_v48 }
 0x56a   :  { %4232 = vmatpush1.bf16.msra.mxu0 %v5111_v49  ;;  %v5138_v49 = vld [vmem:[#allocation19 + $0x250] ss:$8 sps:$4 sm:$0xff]  }
 0x56b   :  { %v5236_v59 = vpop.eup %5235  ;;  %4233 = vmatprep.subr.bf16.mxu0 %v5116_v53 }
 0x56c   :  { %v5238_v27 = vpop.eup %5237  ;;  %v3190_v61 = vmul.f32 %v5236_v59, %v3102_v45  ;;  %v5123_v45 = vld [vmem:[#allocation19 + $0x200] ss:$8 sps:$4 sm:$0xff]  }
 0x56d   :  { %v3191_v6 = vmul.f32 %v5238_v27, %v3103_v16  ;;  %v5958_v16 = vsub.s32 5, %v5799_v1 }
 0x56e   :  { %v3239_v8 = vmul.f32 %v3208_v55, %v3190_v61  ;;  %4234 = vmatpush1.bf16.msra.mxu0 %v5114_v58  ;;  %v5143_v55 = vld [vmem:[#allocation19 + $0x264] ss:$8 sps:$4 sm:$0xff]   ;;  %v5146_v61 = vld [vmem:[#allocation19 + $0x274] ss:$8 sps:$4 sm:$0xff]  }
 0x56f   :  { %v3240_v10 = vmul.f32 %v3212_v25, %v3191_v6  ;;  %4235 = vmatprep.subr.bf16.mxu0 %v5119_v60  ;;  %v1417_v20 = vrot.slane %v5919_v31, %v5958_v16  ;;  %v5141_v60 = vld [vmem:[#allocation19 + $0x260] ss:$8 sps:$4 sm:$0xff]  }
 0x570   :  { %v3288_v11 = vadd.f32 %v3257_v62, %v3239_v8  ;;  %v5144_v8 = vld [vmem:[#allocation19 + $0x270] ss:$8 sps:$4 sm:$0xff]  }
 0x571   :  { %v3289_v36 = vadd.f32 %v3261_v7, %v3240_v10  ;;  %v5149_v10 = vld [vmem:[#allocation19 + $0x284] ss:$8 sps:$4 sm:$0xff]  }
 0x572   :  { %4236 = vmatpush1.bf16.msra.mxu0 %v5117_v9  ;;  %vm3296_vm11 = vcmp.ge.f32.partialorder %v3288_v11, 0.0  ;;  %v3304_v13 = vmul.f32 0.01, %v3288_v11 }
 0x573   :  { %4237 = vmatprep.subr.bf16.mxu0 %v5122_v0  ;;  %vm3297_vm12 = vcmp.ge.f32.partialorder %v3289_v36, 0.0  ;;  %v3305_v5 = vmul.f32 0.01, %v3289_v36 }
 0x574   :  { %v3312_v14 = vsel %vm3296_vm11, %v3288_v11, %v3304_v13 }
 0x575   :  { %v3313_v56 = vsel %vm3297_vm12, %v3289_v36, %v3305_v5  ;;  %v4831_v57 = vpack.c.bf16 %v3312_v14, %v3312_v14  ;;  %v5152_v5 = vld [vmem:[#allocation19 + $0x294] ss:$8 sps:$4 sm:$0xff]  }
 0x576   :  { %4238 = vmatpush1.bf16.msra.mxu0 %v5120_v12  ;;  %v4832_v15 = vpack.c.bf16 %v3313_v56, %v3313_v56  ;;  %v5147_v12 = vld [vmem:[#allocation19 + $0x280] ss:$8 sps:$4 sm:$0xff]  }
 0x577   :  { %4248 = vmatprep.subr.bf16.mxu0 %v5125_v63 }
 0x578   :  { %4239 = vmatprep.mubr.bf16.mxu0 %v4832_v15  ;;  %v5150_v15 = vld [vmem:[#allocation19 + $0x290] ss:$8 sps:$4 sm:$0xff]  }
 0x579   :  { %4240 = vmatmul.mubr.bf16.vlgmr.msra.gmra.mrb[12].mxu0 %v4831_v57  ;;  %v5155_v57 = vld [vmem:[#allocation19 + $0x2a4] ss:$8 sps:$4 sm:$0xff]  }
 0x57a   :  { %4249 = vmatpush1.bf16.msra.mxu0 %v5123_v45 }
 0x57b   :  { %4250 = vmatprep.subr.bf16.mxu0 %v5128_v17 }
 0x57c   :  { %v2953_v47 = vpop.f32.mrb[8].mxu0 }
 0x57d   :  { %v4854_v23 = vadd.f32 %v2953_v47, %v1413_v19  ;;  %v2955_v52 = vpop.f32.mrb[9].mxu0  ;;  %v5158_v47 = vld [vmem:[#allocation19 + $0x2b4] ss:$8 sps:$4 sm:$0xff]  }
 0x57e   :  { %v4855_v24 = vadd.f32 %v2955_v52, %v1417_v20  ;;  %v2957_v26 = vpop.f32.mrb[10].mxu0  ;;  %4251 = vmatpush1.bf16.msra.mxu0 %v5126_v21  ;;  %v5153_v21 = vld [vmem:[#allocation19 + $0x2a0] ss:$8 sps:$4 sm:$0xff]   ;;  %v5156_v52 = vld [vmem:[#allocation19 + $0x2b0] ss:$8 sps:$4 sm:$0xff]  }
 0x57f   :  { %v3068_v29 = vrot.slane %v4854_v23, 4  ;;  %v2958_v30 = vpop.f32.mrb[11].mxu0  ;;  %4252 = vmatprep.subr.bf16.mxu0 %v5131_v44  ;;  %v5159_v26 = vld [vmem:[#allocation19 + $0x2c0] ss:$8 sps:$4 sm:$0xff]  }
 0x580   :  { %v3074_v33 = vrot.slane %v4855_v24, 4  ;;  %v5162_v30 = vld [vmem:[#allocation19 + $0x2d0] ss:$8 sps:$4 sm:$0xff]  }
 0x581   :  { %v3069_v34 = vadd.f32 %v4854_v23, %v3068_v29  ;;  %v3216_v29 = vrot.slane %v5930_v18, %v5955_v3 }
 0x582   :  { %v3075_v35 = vadd.f32 %v4855_v24, %v3074_v33  ;;  %4253 = vmatpush1.bf16.msra.mxu0 %v5129_v28  ;;  %v5164_v28 = vld [vmem:[#allocation19 + $0x2d4] ss:$8 sps:$4 sm:$0xff]   ;;  %v3220_v33 = vrot.slane %v5930_v18, %v5958_v16 }
 0x583   :  { %v3070_v50 = vrot.slane %v3069_v34, 2  ;;  %4254 = vmatprep.subr.bf16.mxu0 %v5134_v32 }
 0x584   :  { %v3076_v54 = vrot.slane %v3075_v35, 2 }
 0x585   :  { %v3071_v22 = vadd.f32 %v3070_v50, %v3069_v34  ;;  %v5167_v34 = vld [vmem:[#allocation19 + $0x2e4] ss:$8 sps:$4 sm:$0xff]   ;;  %v3265_v50 = vrot.slane %v5932_v37, %v5955_v3 }
 0x586   :  { %v3077_v39 = vadd.f32 %v3076_v54, %v3075_v35  ;;  %4255 = vmatpush1.bf16.msra.mxu0 %v5132_v38  ;;  %v3269_v54 = vrot.slane %v5932_v37, %v5958_v16  ;;  %v5173_v3 = vld [vmem:[#allocation19 + $0x304] ss:$8 sps:$4 sm:$0xff]  }
 0x587   :  { %v3072_v41 = vrot.slane %v3071_v22, 1  ;;  %4256 = vmatprep.subr.bf16.mxu0 %v5137_v51 }
 0x588   :  { %v3078_v43 = vrot.slane %v3077_v39, 1 }
 0x589   :  { %v3073_v46 = vadd.f32 %v3072_v41, %v3071_v22  ;;  %v5170_v41 = vld [vmem:[#allocation19 + $0x2f4] ss:$8 sps:$4 sm:$0xff]  }
 0x58a   :  { %v3079_v48 = vadd.f32 %v3078_v43, %v3077_v39  ;;  %4257 = vmatpush1.bf16.msra.mxu0 %v5135_v40  ;;  %v5165_v39 = vld [vmem:[#allocation19 + $0x2e0] ss:$8 sps:$4 sm:$0xff]  }
 0x58b   :  { %v3096_v53 = vmul.f32 0.125, %v3073_v46  ;;  %4258 = vmatprep.subr.bf16.mxu0 %v5140_v42  ;;  %v5168_v46 = vld [vmem:[#allocation19 + $0x2f0] ss:$8 sps:$4 sm:$0xff]  }
 0x58c   :  { %v3097_v58 = vmul.f32 0.125, %v3079_v48 }
 0x58d   :  { %v3104_v59 = vsub.f32 %v4854_v23, %v3096_v53 }
 0x58e   :  { %v3105_v25 = vsub.f32 %v4855_v24, %v3097_v58  ;;  %4259 = vmatpush1.bf16.msra.mxu0 %v5138_v49  ;;  %v5161_v24 = vld [vmem:[#allocation19 + $0x2c4] ss:$8 sps:$4 sm:$0xff]   ;;  %v5171_v58 = vld [vmem:[#allocation19 + $0x300] ss:$8 sps:$4 sm:$0xff]  }
 0x58f   :  { %v3112_v27 = vmul.f32 %v3104_v59, %v3104_v59  ;;  %4260 = vmatprep.subr.bf16.mxu0 %v5143_v55 }
 0x590   :  { %v3113_v62 = vmul.f32 %v3105_v25, %v3105_v25 }
 0x591   :  { %v3140_v6 = vrot.slane %v3112_v27, 4 }
 0x592   :  { %v3146_v7 = vrot.slane %v3113_v62, 4  ;;  %4261 = vmatpush1.bf16.msra.mxu0 %v5141_v60  ;;  %v5976_v60 = vsub.s32 7, %v5799_v1 }
 0x593   :  { %v3141_v9 = vadd.f32 %v3140_v6, %v3112_v27  ;;  %4262 = vmatprep.subr.bf16.mxu0 %v5146_v61  ;;  %v5176_v27 = vld [vmem:[#allocation19 + $0x314] ss:$8 sps:$4 sm:$0xff]  }
 0x594   :  { %v3147_v0 = vadd.f32 %v3146_v7, %v3113_v62  ;;  %v5174_v62 = vld [vmem:[#allocation19 + $0x310] ss:$8 sps:$4 sm:$0xff]   ;;  %v1425_v6 = vrot.slane %v5919_v31, %v5976_v60  ;;  %v5179_v7 = vld [vmem:[#allocation19 + $0x324] ss:$8 sps:$4 sm:$0xff]  }
 0x595   :  { %v3142_v11 = vrot.slane %v3141_v9, 2 }
 0x596   :  { %v3148_v36 = vrot.slane %v3147_v0, 2  ;;  %4263 = vmatpush1.bf16.msra.mxu0 %v5144_v8 }
 0x597   :  { %v3143_v13 = vadd.f32 %v3142_v11, %v3141_v9  ;;  %4264 = vmatprep.subr.bf16.mxu0 %v5149_v10 }
 0x598   :  { %v3149_v63 = vadd.f32 %v3148_v36, %v3147_v0  ;;  %v5177_v0 = vld [vmem:[#allocation19 + $0x320] ss:$8 sps:$4 sm:$0xff]   ;;  %v5182_v36 = vld [vmem:[#allocation19 + $0x334] ss:$8 sps:$4 sm:$0xff]  }
 0x599   :  { %v3144_v14 = vrot.slane %v3143_v13, 1 }
 0x59a   :  { %v3150_v56 = vrot.slane %v3149_v63, 1  ;;  %4265 = vmatpush1.bf16.msra.mxu0 %v5147_v12 }
 0x59b   :  { %v3145_v45 = vadd.f32 %v3144_v14, %v3143_v13  ;;  %4266 = vmatprep.subr.bf16.mxu0 %v5152_v5  ;;  %v5180_v14 = vld [vmem:[#allocation19 + $0x330] ss:$8 sps:$4 sm:$0xff]  }
 0x59c   :  { %v3151_v17 = vadd.f32 %v3150_v56, %v3149_v63 }
 0x59d   :  { %v3168_v19 = vmul.f32 0.125, %v3145_v45 }
 0x59e   :  { %v3169_v20 = vmul.f32 0.125, %v3151_v17  ;;  %4267 = vmatpush1.bf16.msra.mxu0 %v5150_v15  ;;  %v5183_v17 = vld [vmem:[#allocation19 + $0x340] ss:$8 sps:$4 sm:$0xff]  }
 0x59f   :  { %v3176_v44 = vadd.f32 0.8, %v3168_v19  ;;  %4268 = vmatprep.subr.bf16.mxu0 %v5155_v57 }
 0x5a0   :  { %v3177_v23 = vadd.f32 0.8, %v3169_v20  ;;  %v5188_v20 = vld [vmem:[#allocation19 + $0x354] ss:$8 sps:$4 sm:$0xff]  }
 0x5a1   :  { %5239 = vrsqrt.f32 %v3176_v44 }
 0x5a2   :  { %5241 = vrsqrt.f32 %v3177_v23  ;;  %4269 = vmatpush1.bf16.msra.mxu0 %v5153_v21  ;;  %v5186_v23 = vld [vmem:[#allocation19 + $0x350] ss:$8 sps:$4 sm:$0xff]  }
 0x5a3   :  { %4270 = vmatprep.subr.bf16.mxu0 %v5158_v47 }
 0x5a6   :  { %4271 = vmatpush1.bf16.msra.mxu0 %v5156_v52 }
 0x5a7   :  { %4272 = vmatprep.subr.bf16.mxu0 %v5161_v24  ;;  %v5191_v24 = vld [vmem:[#allocation19 + $0x364] ss:$8 sps:$4 sm:$0xff]  }
 0x5aa   :  { %4273 = vmatpush1.bf16.msra.mxu0 %v5159_v26 }
 0x5ab   :  { %v5240_v32 = vpop.eup %5239  ;;  %4274 = vmatprep.subr.bf16.mxu0 %v5164_v28 }
 0x5ac   :  { %v5242_v35 = vpop.eup %5241  ;;  %v3192_v38 = vmul.f32 %v5240_v32, %v3104_v59  ;;  %v5973_v59 = vsub.s32 6, %v5799_v1 }
 0x5ad   :  { %v3193_v51 = vmul.f32 %v5242_v35, %v3105_v25 }
 0x5ae   :  { %v3241_v22 = vmul.f32 %v3216_v29, %v3192_v38  ;;  %4275 = vmatpush1.bf16.msra.mxu0 %v5162_v30  ;;  %v1421_v61 = vrot.slane %v5919_v31, %v5973_v59  ;;  %v5185_v31 = vld [vmem:[#allocation19 + $0x344] ss:$8 sps:$4 sm:$0xff]   ;;  %v5189_v30 = vld [vmem:[#allocation19 + $0x360] ss:$8 sps:$4 sm:$0xff]  }
 0x5af   :  { %v3242_v40 = vmul.f32 %v3220_v33, %v3193_v51  ;;  %4276 = vmatprep.subr.bf16.mxu0 %v5167_v34  ;;  %v5194_v33 = vld [vmem:[#allocation19 + $0x374] ss:$8 sps:$4 sm:$0xff]  }
 0x5b0   :  { %v3290_v42 = vadd.f32 %v3265_v50, %v3241_v22  ;;  %v5192_v50 = vld [vmem:[#allocation19 + $0x370] ss:$8 sps:$4 sm:$0xff]  }
 0x5b1   :  { %v3291_v43 = vadd.f32 %v3269_v54, %v3242_v40  ;;  %v5197_v54 = vld [vmem:[#allocation19 + $0x384] ss:$8 sps:$4 sm:$0xff]  }
 0x5b2   :  { %4277 = vmatpush1.bf16.msra.mxu0 %v5165_v39  ;;  %vm3298_vm13 = vcmp.ge.f32.partialorder %v3290_v42, 0.0  ;;  %v3306_v48 = vmul.f32 0.01, %v3290_v42 }
 0x5b3   :  { %4278 = vmatprep.subr.bf16.mxu0 %v5170_v41  ;;  %vm3299_vm14 = vcmp.ge.f32.partialorder %v3291_v43, 0.0  ;;  %v3307_v49 = vmul.f32 0.01, %v3291_v43  ;;  %v5195_v41 = vld [vmem:[#allocation19 + $0x380] ss:$8 sps:$4 sm:$0xff]  }
 0x5b4   :  { %v3314_v53 = vsel %vm3298_vm13, %v3290_v42, %v3306_v48 }
 0x5b5   :  { %v3315_v55 = vsel %vm3299_vm14, %v3291_v43, %v3307_v49  ;;  %v4833_v25 = vpack.c.bf16 %v3314_v53, %v3314_v53  ;;  %v5200_v43 = vld [vmem:[#allocation19 + $0x394] ss:$8 sps:$4 sm:$0xff]  }
 0x5b6   :  { %4279 = vmatpush1.bf16.msra.mxu0 %v5168_v46  ;;  %v4834_v16 = vpack.c.bf16 %v3315_v55, %v3315_v55  ;;  %v5203_v55 = vld [vmem:[#allocation19 + $0x3a4] ss:$8 sps:$4 sm:$0xff]  }
 0x5b7   :  { %4289 = vmatprep.subr.bf16.mxu0 %v5173_v3  ;;  %v5198_v3 = vld [vmem:[#allocation19 + $0x390] ss:$8 sps:$4 sm:$0xff]  }
 0x5b8   :  { %4280 = vmatprep.mubr.bf16.mxu0 %v4834_v16 }
 0x5b9   :  { %4281 = vmatmul.mubr.bf16.vlgmr.msra.gmra.mrb[12].mxu0 %v4833_v25 }
 0x5ba   :  { %4290 = vmatpush1.bf16.msra.mxu0 %v5171_v58 }
 0x5bb   :  { %4291 = vmatprep.subr.bf16.mxu0 %v5176_v27  ;;  %v5201_v27 = vld [vmem:[#allocation19 + $0x3a0] ss:$8 sps:$4 sm:$0xff]  }
 0x5bd   :  { %v3035_v8 = vpop.f32.mrb[20].mxu1 }
 0x5be   :  { %v4856_v9 = vadd.f32 %v3035_v8, %v1421_v61  ;;  %v3037_v10 = vpop.f32.mrb[21].mxu1  ;;  %4292 = vmatpush1.bf16.msra.mxu0 %v5174_v62  ;;  %v5206_v62 = vld [vmem:[#allocation19 + $0x3b4] ss:$8 sps:$4 sm:$0xff]   ;;  %v5204_v8 = vld [vmem:[#allocation19 + $0x3b0] ss:$8 sps:$4 sm:$0xff]  }
 0x5bf   :  { %v4857_v1 = vadd.f32 %v3037_v10, %v1425_v6  ;;  %v3039_v11 = vpop.f32.mrb[22].mxu1  ;;  %4293 = vmatprep.subr.bf16.mxu0 %v5179_v7  ;;  %v5207_v10 = vld [vmem:[#allocation19 + $0x3c0] ss:$8 sps:$4 sm:$0xff]  }
 0x5c0   :  { %v3080_v12 = vrot.slane %v4856_v9, 4  ;;  %v3040_v13 = vpop.f32.mrb[23].mxu1  ;;  %v3224_v11 = vrot.slane %v5930_v18, %v5973_v59 }
 0x5c1   :  { %v3086_v5 = vrot.slane %v4857_v1, 4  ;;  %v3228_v13 = vrot.slane %v5930_v18, %v5976_v60 }
 0x5c2   :  { %v3081_v63 = vadd.f32 %v4856_v9, %v3080_v12  ;;  %4294 = vmatpush1.bf16.msra.mxu0 %v5177_v0  ;;  %v5212_v0 = vld [vmem:[#allocation19 + $0x3d4] ss:$8 sps:$4 sm:$0xff]  }
 0x5c3   :  { %v3087_v56 = vadd.f32 %v4857_v1, %v3086_v5  ;;  %4295 = vmatprep.subr.bf16.mxu0 %v5182_v36  ;;  %v5215_v36 = vld [vmem:[#allocation19 + $0x3e4] ss:$8 sps:$4 sm:$0xff]  }
 0x5c4   :  { %v3082_v15 = vrot.slane %v3081_v63, 2 }
 0x5c5   :  { %v3088_v45 = vrot.slane %v3087_v56, 2 }
 0x5c6   :  { %v3083_v57 = vadd.f32 %v3082_v15, %v3081_v63  ;;  %4296 = vmatpush1.bf16.msra.mxu0 %v5180_v14  ;;  %v3273_v14 = vrot.slane %v5932_v37, %v5973_v59  ;;  %v3277_v15 = vrot.slane %v5932_v37, %v5976_v60  ;;  %v3486_v37 = vld [vmem:[#allocation20] sm:$0x3] }
 0x5c7   :  { %v3089_v19 = vadd.f32 %v3088_v45, %v3087_v56  ;;  %4297 = vmatprep.subr.bf16.mxu0 %v5185_v31  ;;  %v5213_v31 = vld [vmem:[#allocation19 + $0x3e0] ss:$8 sps:$4 sm:$0xff]   ;;  %v3491_v60 = vrot.slane %v3486_v37, %v5802_v2 }
 0x5c8   :  { %v3084_v21 = vrot.slane %v3083_v57, 1 }
 0x5c9   :  { %v3090_v44 = vrot.slane %v3089_v19, 1 }
 0x5ca   :  { %v3085_v47 = vadd.f32 %v3084_v21, %v3083_v57  ;;  %4298 = vmatpush1.bf16.msra.mxu0 %v5183_v17  ;;  %v5218_v57 = vld [vmem:[#allocation19 + $0x3f4] ss:$8 sps:$4 sm:$0xff]  }
 0x5cb   :  { %v3091_v52 = vadd.f32 %v3090_v44, %v3089_v19  ;;  %4299 = vmatprep.subr.bf16.mxu0 %v5188_v20  ;;  %v5216_v20 = vld [vmem:[#allocation19 + $0x3f0] ss:$8 sps:$4 sm:$0xff]  }
 0x5cc   :  { %v3098_v26 = vmul.f32 0.125, %v3085_v47 }
 0x5cd   :  { %v3099_v28 = vmul.f32 0.125, %v3091_v52 }
 0x5ce   :  { %v3106_v29 = vsub.f32 %v4856_v9, %v3098_v26  ;;  %4300 = vmatpush1.bf16.msra.mxu0 %v5186_v23  ;;  %v5209_v9 = vld [vmem:[#allocation19 + $0x3c4] ss:$8 sps:$4 sm:$0xff]  }
 0x5cf   :  { %v3107_v32 = vsub.f32 %v4857_v1, %v3099_v28  ;;  %4301 = vmatprep.subr.bf16.mxu0 %v5191_v24  ;;  %v5210_v1 = vld [vmem:[#allocation19 + $0x3d0] ss:$8 sps:$4 sm:$0xff]   ;;  %v3495_v24 = vrot.slane %v3486_v37, %v5805_v4 }
 0x5d0   :  { %v3114_v34 = vmul.f32 %v3106_v29, %v3106_v29 }
 0x5d1   :  { %v3115_v35 = vmul.f32 %v3107_v32, %v3107_v32 }
 0x5d2   :  { %v3152_v38 = vrot.slane %v3114_v34, 4  ;;  %4302 = vmatpush1.bf16.msra.mxu0 %v5189_v30 }
 0x5d3   :  { %v3158_v51 = vrot.slane %v3115_v35, 4  ;;  %4303 = vmatprep.subr.bf16.mxu0 %v5194_v33 }
 0x5d4   :  { %v3153_v22 = vadd.f32 %v3152_v38, %v3114_v34 }
 0x5d5   :  { %v3159_v39 = vadd.f32 %v3158_v51, %v3115_v35 }
 0x5d6   :  { %v3154_v40 = vrot.slane %v3153_v22, 2  ;;  %4304 = vmatpush1.bf16.msra.mxu0 %v5192_v50 }
 0x5d7   :  { %v3160_v42 = vrot.slane %v3159_v39, 2  ;;  %4305 = vmatprep.subr.bf16.mxu0 %v5197_v54 }
 0x5d8   :  { %v3155_v46 = vadd.f32 %v3154_v40, %v3153_v22 }
 0x5d9   :  { %v3161_v48 = vadd.f32 %v3160_v42, %v3159_v39 }
 0x5da   :  { %v3156_v49 = vrot.slane %v3155_v46, 1  ;;  %4306 = vmatpush1.bf16.msra.mxu0 %v5195_v41 }
 0x5db   :  { %v3162_v53 = vrot.slane %v3161_v48, 1  ;;  %4307 = vmatprep.subr.bf16.mxu0 %v5200_v43 }
 0x5dc   :  { %v3157_v16 = vadd.f32 %v3156_v49, %v3155_v46 }
 0x5dd   :  { %v3163_v58 = vadd.f32 %v3162_v53, %v3161_v48 }
 0x5de   :  { %v3170_v25 = vmul.f32 0.125, %v3157_v16  ;;  %4308 = vmatpush1.bf16.msra.mxu0 %v5198_v3 }
 0x5df   :  { %v3171_v61 = vmul.f32 0.125, %v3163_v58  ;;  %4309 = vmatprep.subr.bf16.mxu0 %v5203_v55 }
 0x5e0   :  { %v3178_v6 = vadd.f32 0.8, %v3170_v25 }
 0x5e1   :  { %v3179_v7 = vadd.f32 0.8, %v3171_v61 }
 0x5e2   :  { %5243 = vrsqrt.f32 %v3178_v6  ;;  %4310 = vmatpush1.bf16.msra.mxu0 %v5201_v27 }
 0x5e3   :  { %5245 = vrsqrt.f32 %v3179_v7  ;;  %4311 = vmatprep.subr.bf16.mxu0 %v5206_v62 }
 0x5e6   :  { %4312 = vmatpush1.bf16.msra.mxu0 %v5204_v8 }
 0x5e7   :  { %4313 = vmatprep.subr.bf16.mxu0 %v5209_v9 }
 0x5ea   :  { %4314 = vmatpush1.bf16.msra.mxu0 %v5207_v10 }
 0x5eb   :  { %4315 = vmatprep.subr.bf16.mxu0 %v5212_v0 }
 0x5ec   :  { %v5244_v12 = vpop.eup %5243 }
 0x5ed   :  { %v5246_v5 = vpop.eup %5245  ;;  %v3194_v63 = vmul.f32 %v5244_v12, %v3106_v29 }
 0x5ee   :  { %v3195_v56 = vmul.f32 %v5246_v5, %v3107_v32  ;;  %4316 = vmatpush1.bf16.msra.mxu0 %v5210_v1 }
 0x5ef   :  { %v3243_v45 = vmul.f32 %v3224_v11, %v3194_v63  ;;  %4317 = vmatprep.subr.bf16.mxu0 %v5215_v36 }
 0x5f0   :  { %v3244_v17 = vmul.f32 %v3228_v13, %v3195_v56 }
 0x5f1   :  { %v3292_v19 = vadd.f32 %v3273_v14, %v3243_v45 }
 0x5f2   :  { %4318 = vmatpush1.bf16.msra.mxu0 %v5213_v31  ;;  %v3293_v21 = vadd.f32 %v3277_v15, %v3244_v17 }
 0x5f3   :  { %4319 = vmatprep.subr.bf16.mxu0 %v5218_v57  ;;  %vm3300_vm15 = vcmp.ge.f32.partialorder %v3292_v19, 0.0  ;;  %v3308_v18 = vmul.f32 0.01, %v3292_v19 }
 0x5f4   :  { %vm3301_vm0 = vcmp.ge.f32.partialorder %v3293_v21, 0.0  ;;  %v3309_v44 = vmul.f32 0.01, %v3293_v21 }
 0x5f5   :  { %v3316_v59 = vsel %vm3300_vm15, %v3292_v19, %v3308_v18 }
 0x5f6   :  { %4320 = vmatpush1.bf16.msra.mxu0 %v5216_v20  ;;  %v3317_v47 = vsel %vm3301_vm0, %v3293_v21, %v3309_v44  ;;  %v4835_v52 = vpack.c.bf16 %v3316_v59, %v3316_v59 }
 0x5f7   :  { %v4836_v23 = vpack.c.bf16 %v3317_v47, %v3317_v47 }
 0x5f9   :  { %4321 = vmatprep.mubr.bf16.mxu0 %v4836_v23 }
 0x5fa   :  { %4322 = vmatmul.mubr.bf16.vlgmr.msra.gmra.mrb[12].mxu0 %v4835_v52 }
 0x6cd   :  { %v4323_v26 = vpop.f32.mrb[12].mxu0 }
 0x6ce   :  { %v4858_v28 = vadd.f32 %v4323_v26, %v3491_v60  ;;  %v4325_v29 = vpop.f32.mrb[13].mxu0 }
 0x6cf   :  { %v4859_v30 = vadd.f32 %v4325_v29, %v3495_v24  ;;  %v4327_v32 = vpop.f32.mrb[14].mxu0 }
 0x6d0   :  { %5247 = vtanh.f32 %v4858_v28  ;;  %v4328_v33 = vpop.f32.mrb[15].mxu0 }
 0x6d1   :  { %5249 = vtanh.f32 %v4859_v30 }
 0x6da   :  { %v5248_v34 = vpop.eup %5247 }
 0x6db   :  { %v5250_v35 = vpop.eup %5249  ;;  %4332 = vst [vmem:[%s6024_s21] sm:$0xff] %v5248_v34 }
 0x6dc   :  { %4333 = vst [vmem:[%s6024_s21 + $0x8] sm:$0xff] %v5250_v35 }
 0x6dd   :  { %4338 = vsyncpa [#allocation4], 1 }
 0x6de   :  { %4339 = vsyncpa [#allocation6], 1 }
 0x6df   :  { %4340 = vsyncpa [#allocation9], 1 }
 0x6e0   :  { %4341 = vsyncpa [#allocation12], 1 }
 0x6e1   :  { %4342 = vsyncpa [#allocation15], 1 }
 0x6e2   :  { %4343 = vsyncpa [#allocation18], 1 }
 0x6e3   :  { %4344 = vsyncpa [#allocation21], 1 }

</bundles_post_ra>
